<compile_context>
chip_gen: v6e
topology: v6e:2x2x1
jax: 0.10.0
libtpu: 0.0.40
codegen_flags: <defaults>
</compile_context>

<pallas_src>
from functools import partial

import numpy as np
import jax
import jax.numpy as jnp
from jax import lax
from jax.experimental import pallas as pl
from jax.experimental.pallas import tpu as pltpu


def _round_up(n, m):
    return ((n + m - 1) // m) * m


# ----------------------------- Pallas kernel --------------------------------

def _gru_kernel(T, Bp, P, unroll,
                x_ref, w_ih_ref, w_hh_rz_ref, w_hh_n_ref, b_gi_ref, b_hh_n_ref,
                fc_w_ref, fc_b_ref, out_ref, seq_scratch, gi_scratch):
    """One grid step == one GRU layer.

    x_ref       : (T*Bp, P)   bf16  time-major, zero-padded input (layer 0 LHS)
    w_ih_ref    : (P, 3P)     bf16  this layer's input-projection weights (r,z,n)
    w_hh_rz_ref : (P, 2P)     bf16  recurrent weights, r and z gates
    w_hh_n_ref  : (P, P)      bf16  recurrent weights, n gate
    b_gi_ref    : (1, 3P)     f32   b_ih (all gates) + b_hh_r/b_hh_z folded in
    b_hh_n_ref  : (1, P)      f32   recurrent bias of the n gate
    fc_w_ref    : (P, Op)     bf16  FC head weights
    fc_b_ref    : (1, Op)     f32
    out_ref     : (Bp, Op)    f32   written only on the last layer
    seq_scratch : (T*Bp, P)   bf16  inter-layer activations (persists across grid)
    gi_scratch  : (T*Bp, 3P)  f32   hoisted input projections for this layer
    """
    layer = pl.program_id(0)
    last_layer = pl.num_programs(0) - 1

    # ---- input projection for the WHOLE sequence: one big MXU matmul ----
    # (b_ih for all gates plus b_hh_r / b_hh_z are pre-folded into b_gi)
    @pl.when(layer == 0)
    def _():
        gi_scratch[...] = (
            jnp.dot(x_ref[...], w_ih_ref[...],
                    preferred_element_type=jnp.float32) + b_gi_ref[...])

    @pl.when(layer > 0)
    def _():
        gi_scratch[...] = (
            jnp.dot(seq_scratch[...], w_ih_ref[...],
                    preferred_element_type=jnp.float32) + b_gi_ref[...])

    # ---- loop invariants hoisted out of the recurrence ----
    whh_rz = w_hh_rz_ref[...]                                   # (P, 2P) bf16
    whh_n = w_hh_n_ref[...]                                     # (P, P)  bf16
    # pre-broadcast b_hh_n once per layer (JAX does not CSE broadcast_in_dim)
    bhh_n = jnp.zeros((Bp, P), jnp.float32) + b_hh_n_ref[...]   # (Bp, P)

    def step(t, h):
        row0 = pl.multiple_of(t * Bp, Bp)
        gi_t = gi_scratch[pl.ds(row0, Bp), :]                   # (Bp, 3P) f32
        h_b = h.astype(jnp.bfloat16)
        # split recurrent matmul: r/z sigmoids (EUP) overlap the n-gate MXU push
        gh_rz = jnp.dot(h_b, whh_rz, preferred_element_type=jnp.float32)
        gh_n = jnp.dot(h_b, whh_n, preferred_element_type=jnp.float32)
        # lane-aligned gate slices (boundaries are multiples of P = k*128)
        r = jax.nn.sigmoid(gi_t[:, 0:P] + gh_rz[:, 0:P])
        z = jax.nn.sigmoid(gi_t[:, P:2 * P] + gh_rz[:, P:2 * P])
        n = jnp.tanh(gi_t[:, 2 * P:3 * P] + r * (gh_n + bhh_n))
        h_new = n + z * (h - n)                                 # == (1-z)*n + z*h
        # bf16, full (16,128) tiles, lane-dense store; consumed by the next layer
        seq_scratch[pl.ds(row0, Bp), :] = h_new.astype(jnp.bfloat16)
        return h_new

    h_last = lax.fori_loop(0, T, step, jnp.zeros((Bp, P), jnp.float32),
                           unroll=unroll)

    # ---- fused FC head + sigmoid on the final hidden state of the last layer ----
    @pl.when(layer == last_layer)
    def _():
        out_ref[...] = jax.nn.sigmoid(
            jnp.dot(h_last.astype(jnp.bfloat16), fc_w_ref[...],
                    preferred_element_type=jnp.float32) + fc_b_ref[...])


# --------------------------- one-time weight packing --------------------------

def pack_params(params, input_size, hidden_size, output_size):
    """One-time repack (OUTSIDE the jitted forward): PyTorch (3H,in)/(3H,) layout
    -> transposed, per-gate 128-padded, gate-split, bf16 MXU layout, with
    b_ih + b_hh_{r,z} folded into a single hoisted-projection bias."""
    D, H, O = input_size, hidden_size, output_size
    layers = params["gru_layers"]
    L = len(layers)
    P = _round_up(max(D, H), 128)
    Op = _round_up(O, 128)

    w_ih_all = np.zeros((L, P, 3 * P), np.float32)
    w_hh_rz_all = np.zeros((L, P, 2 * P), np.float32)
    w_hh_n_all = np.zeros((L, P, P), np.float32)
    b_gi_all = np.zeros((L, 1, 3 * P), np.float32)
    b_hh_n_all = np.zeros((L, 1, P), np.float32)

    for l, layer in enumerate(layers):
        w_ih = np.asarray(layer["w_ih"], np.float32)     # (3H, in_dim)
        w_hh = np.asarray(layer["w_hh"], np.float32)     # (3H, H)
        b_ih = np.asarray(layer["b_ih"], np.float32)     # (3H,)
        b_hh = np.asarray(layer["b_hh"], np.float32)     # (3H,)
        in_dim = w_ih.shape[1]
        for g in range(3):                               # gate order: r, z, n
            w_ih_all[l, :in_dim, g * P:g * P + H] = w_ih[g * H:(g + 1) * H, :].T
            b_gi_all[l, 0, g * P:g * P + H] = b_ih[g * H:(g + 1) * H]
        for g in range(2):                               # r, z recurrent weights
            w_hh_rz_all[l, :H, g * P:g * P + H] = w_hh[g * H:(g + 1) * H, :].T
            # fold b_hh_r / b_hh_z into the hoisted input projection bias
            b_gi_all[l, 0, g * P:g * P + H] += b_hh[g * H:(g + 1) * H]
        w_hh_n_all[l, :H, :H] = w_hh[2 * H:3 * H, :].T
        b_hh_n_all[l, 0, :H] = b_hh[2 * H:3 * H]

    fc_w = np.zeros((P, Op), np.float32)
    fc_w[:H, :O] = np.asarray(params["fc_w"], np.float32).T
    fc_b = np.zeros((1, Op), np.float32)
    fc_b[0, :O] = np.asarray(params["fc_b"], np.float32)

    return dict(
        w_ih=jnp.asarray(w_ih_all, jnp.bfloat16),        # (L, P, 3P)
        w_hh_rz=jnp.asarray(w_hh_rz_all, jnp.bfloat16),  # (L, P, 2P)
        w_hh_n=jnp.asarray(w_hh_n_all, jnp.bfloat16),    # (L, P, P)
        b_gi=jnp.asarray(b_gi_all),                      # (L, 1, 3P) f32
        b_hh_n=jnp.asarray(b_hh_n_all),                  # (L, 1, P)  f32
        fc_w=jnp.asarray(fc_w, jnp.bfloat16),            # (P, Op)
        fc_b=jnp.asarray(fc_b),                          # (1, Op)    f32
    )


def _vmem_limit_bytes(T, Bp, P, Op):
    """Scoped-VMEM limit sized to the real footprint (+ headroom)."""
    x_b = 2 * (T * Bp * P) * 2                          # bf16 input, 2 buffers
    w_b = 2 * (P * 3 * P + P * 2 * P + P * P) * 2       # per-layer bf16 weights, 2 buffers
    bias_b = 2 * (3 * P + P) * 4
    fc_bytes = 2 * (P * Op * 2 + Op * 4)
    out_b = 2 * (Bp * Op * 4)
    seq_b = (T * Bp * P) * 2                            # bf16 scratch
    gi_b = (T * Bp * 3 * P) * 4                         # f32 scratch
    total = x_b + w_b + bias_b + fc_bytes + out_b + seq_b + gi_b
    # floor at the usual 32 MiB default, cap below physical VMEM (v5e/v6e 128 MiB).
    return min(max(total + (4 << 20), 32 << 20), 100 << 20)


# ------------------------------- jitted forward -------------------------------

@partial(jax.jit, static_argnames=("output_size",))
def gru_model_forward(x, packed, output_size):
    """x: (B, T, input_size) f32, batch_first. Returns (B, output_size) f32."""
    B, T, D = x.shape
    L, P, threeP = packed["w_ih"].shape
    Op = packed["fc_w"].shape[1]

    Bp = _round_up(max(B, 16), 16)       # full bf16 (16,128) sublane tiles

    # time-major, zero-padded, 2-D bf16 input (no in-kernel reshape/relayout)
    x_t = jnp.transpose(x, (1, 0, 2))                               # (T, B, D)
    x_pad = jnp.zeros((T, Bp, P), x.dtype).at[:, :B, :D].set(x_t)
    x_pad = x_pad.reshape(T * Bp, P).astype(jnp.bfloat16)

    unroll = True if T <= 32 else 8
    kernel = partial(_gru_kernel, T, Bp, P, unroll)

    out = pl.pallas_call(
        kernel,
        out_shape=jax.ShapeDtypeStruct((Bp, Op), jnp.float32),
        grid_spec=pltpu.PrefetchScalarGridSpec(
            num_scalar_prefetch=0,
            grid=(L,),                                   # layer loop: streams weights
            in_specs=[
                pl.BlockSpec((T * Bp, P), lambda l: (0, 0)),           # x
                pl.BlockSpec((None, P, 3 * P), lambda l: (l, 0, 0)),   # w_ih
                pl.BlockSpec((None, P, 2 * P), lambda l: (l, 0, 0)),   # w_hh (r,z)
                pl.BlockSpec((None, P, P), lambda l: (l, 0, 0)),       # w_hh (n)
                pl.BlockSpec((None, 1, 3 * P), lambda l: (l, 0, 0)),   # b_gi
                pl.BlockSpec((None, 1, P), lambda l: (l, 0, 0)),       # b_hh_n
                pl.BlockSpec((P, Op), lambda l: (0, 0)),               # fc_w
                pl.BlockSpec((1, Op), lambda l: (0, 0)),               # fc_b
            ],
            out_specs=pl.BlockSpec((Bp, Op), lambda l: (0, 0)),
            scratch_shapes=[
                pltpu.VMEM((T * Bp, P), jnp.bfloat16),       # inter-layer activations
                pltpu.VMEM((T * Bp, 3 * P), jnp.float32),    # hoisted input projections
            ],
        ),
        compiler_params=pltpu.CompilerParams(
            dimension_semantics=("arbitrary",),
            vmem_limit_bytes=_vmem_limit_bytes(T, Bp, P, Op),
        ),
    )(x_pad, packed["w_ih"], packed["w_hh_rz"], packed["w_hh_n"],
      packed["b_gi"], packed["b_hh_n"], packed["fc_w"], packed["fc_b"])

    return out[:B, :output_size]


# ---------------------------- pure-JAX reference -----------------------------

def gru_reference(x, params):
    """f32 reference matching PyTorch nn.GRU (eval) + Linear + sigmoid."""
    h_seq = jnp.transpose(x, (1, 0, 2))          # (T, B, D)
    B = x.shape[0]
    for layer in params["gru_layers"]:
        w_ih, w_hh = layer["w_ih"], layer["w_hh"]
        b_ih, b_hh = layer["b_ih"], layer["b_hh"]
        H = w_hh.shape[1]
        h = jnp.zeros((B, H), jnp.float32)
        outs = []
        for t in range(h_seq.shape[0]):
            gi = h_seq[t] @ w_ih.T + b_ih
            gh = h @ w_hh.T + b_hh
            i_r, i_z, i_n = gi[:, :H], gi[:, H:2 * H], gi[:, 2 * H:]
            h_r, h_z, h_n = gh[:, :H], gh[:, H:2 * H], gh[:, 2 * H:]
            r = jax.nn.sigmoid(i_r + h_r)
            z = jax.nn.sigmoid(i_z + h_z)
            n = jnp.tanh(i_n + r * h_n)
            h = (1.0 - z) * n + z * h
            outs.append(h)
        h_seq = jnp.stack(outs)
    return jax.nn.sigmoid(h_seq[-1] @ params["fc_w"].T + params["fc_b"])


# --------------------------- parameter construction --------------------------

def init_params(key, input_size, hidden_size, output_size, num_layers):
    """Deterministic init mimicking PyTorch's U(-1/sqrt(H), 1/sqrt(H))."""
    bound = 1.0 / jnp.sqrt(jnp.float32(hidden_size))
    layers = []
    for l in range(num_layers):
        in_dim = input_size if l == 0 else hidden_size
        key, k1, k2, k3, k4 = jax.random.split(key, 5)
        layers.append(dict(
            w_ih=jax.random.uniform(k1, (3 * hidden_size, in_dim),
                                    jnp.float32, -bound, bound),
            w_hh=jax.random.uniform(k2, (3 * hidden_size, hidden_size),
                                    jnp.float32, -bound, bound),
            b_ih=jax.random.uniform(k3, (3 * hidden_size,),
                                    jnp.float32, -bound, bound),
            b_hh=jax.random.uniform(k4, (3 * hidden_size,),
                                    jnp.float32, -bound, bound),
        ))
    key, k5, k6 = jax.random.split(key, 3)
    fc_w = jax.random.uniform(k5, (output_size, hidden_size),
                              jnp.float32, -bound, bound)
    fc_b = jax.random.uniform(k6, (output_size,),
                              jnp.float32, -bound, bound)
    return {"gru_layers": layers, "fc_w": fc_w, "fc_b": fc_b}


# ----------------------------------- main ------------------------------------

if __name__ == "__main__":
    B, T = 2, 8
    input_size, hidden_size, output_size, num_layers = 16, 32, 8, 2

    key = jax.random.PRNGKey(0)
    key, kx = jax.random.split(key)
    x = jax.random.normal(kx, (B, T, input_size), dtype=jnp.float32)
    params = init_params(key, input_size, hidden_size, output_size, num_layers)

    # one-time weight repacking (kept out of the jitted forward on purpose)
    packed = pack_params(params, input_size, hidden_size, output_size)

    out = gru_model_forward(x, packed, output_size=output_size)
    out = jax.block_until_ready(out)

    assert out.shape == (B, output_size), out.shape
    assert out.dtype == jnp.float32

    ref = gru_reference(x, params)
    max_err = float(jnp.max(jnp.abs(out - ref)))
    assert max_err < 5e-2, f"max abs err vs reference: {max_err}"

    print("KERNEL_OK")
</pallas_src>

<mosaic_0001>
module attributes {stable_mosaic.version = 11 : i64} {
  func.func @_gru_kernel(%arg0: i32, %arg1: memref<128x128xbf16, #tpu.memory_space<vmem>>, %arg2: memref<1x128x384xbf16, #tpu.memory_space<vmem>>, %arg3: memref<1x128x256xbf16, #tpu.memory_space<vmem>>, %arg4: memref<1x128x128xbf16, #tpu.memory_space<vmem>>, %arg5: memref<1x1x384xf32, #tpu.memory_space<vmem>>, %arg6: memref<1x1x128xf32, #tpu.memory_space<vmem>>, %arg7: memref<128x128xbf16, #tpu.memory_space<vmem>>, %arg8: memref<1x128xf32, #tpu.memory_space<vmem>>, %arg9: memref<16x128xf32, #tpu.memory_space<vmem>>, %arg10: memref<128x128xbf16, #tpu.memory_space<vmem>>, %arg11: memref<128x384xf32, #tpu.memory_space<vmem>>) attributes {dimension_semantics = [#tpu.dimension_semantics<arbitrary>], iteration_bounds = array<i64: 2>, scalar_prefetch = 0 : i64, scratch_operands = 2 : i64, tpu.core_type = #tpu.core_type<tc>, window_params = [{pipeline_mode = #tpu.pipeline_mode<synchronous>, transform_indices = @transform_0, window_bounds = array<i64: 128, 128>}, {transform_indices = @transform_1, window_bounds = array<i64: 1, 128, 384>}, {transform_indices = @transform_2, window_bounds = array<i64: 1, 128, 256>}, {transform_indices = @transform_3, window_bounds = array<i64: 1, 128, 128>}, {transform_indices = @transform_4, window_bounds = array<i64: 1, 1, 384>}, {transform_indices = @transform_5, window_bounds = array<i64: 1, 1, 128>}, {pipeline_mode = #tpu.pipeline_mode<synchronous>, transform_indices = @transform_6, window_bounds = array<i64: 128, 128>}, {pipeline_mode = #tpu.pipeline_mode<synchronous>, transform_indices = @transform_7, window_bounds = array<i64: 1, 128>}, {pipeline_mode = #tpu.pipeline_mode<synchronous>, transform_indices = @transform_8, window_bounds = array<i64: 16, 128>}]} {
    %c0_i32 = arith.constant 0 : i32
    %0 = arith.cmpi eq, %arg0, %c0_i32 : i32
    %1 = arith.extui %0 : i1 to i32
    %c0_i32_0 = arith.constant 0 : i32
    %2 = arith.cmpi ne, %1, %c0_i32_0 : i32
    scf.if %2 {
      %c0_70 = arith.constant 0 : index
      %c0_71 = arith.constant 0 : index
      %291 = vector.load %arg1[%c0_70, %c0_71] : memref<128x128xbf16, #tpu.memory_space<vmem>>, vector<128x128xbf16>
      %c0_72 = arith.constant 0 : index
      %c0_73 = arith.constant 0 : index
      %c0_74 = arith.constant 0 : index
      %292 = vector.load %arg2[%c0_72, %c0_73, %c0_74] : memref<1x128x384xbf16, #tpu.memory_space<vmem>>, vector<1x128x384xbf16>
      %293 = vector.shape_cast %292 : vector<1x128x384xbf16> to vector<128x384xbf16>
      %cst_75 = arith.constant dense<0.000000e+00> : vector<128x384xf32>
      %294 = tpu.matmul %291, %293, %cst_75 {dimension_numbers = #tpu.dot_dimension_numbers<[1], [0], [0], [1], [0, 0, 1, 1], [], []>} : vector<128x128xbf16>, vector<128x384xbf16>, vector<128x384xf32> -> vector<128x384xf32>
      %c0_76 = arith.constant 0 : index
      %c0_77 = arith.constant 0 : index
      %c0_78 = arith.constant 0 : index
      %295 = vector.load %arg5[%c0_76, %c0_77, %c0_78] : memref<1x1x384xf32, #tpu.memory_space<vmem>>, vector<1x1x384xf32>
      %296 = vector.shape_cast %295 : vector<1x1x384xf32> to vector<1x384xf32>
      %297 = vector.broadcast %296 : vector<1x384xf32> to vector<128x384xf32>
      %298 = arith.addf %294, %297 : vector<128x384xf32>
      %c0_79 = arith.constant 0 : index
      %c0_80 = arith.constant 0 : index
      %299 = vector.load %arg11[%c0_79, %c0_80] : memref<128x384xf32, #tpu.memory_space<vmem>>, vector<128x384xf32>
      tpu.vector_store %arg11[%c0_79, %c0_80], %298 {strides = array<i32>} : memref<128x384xf32, #tpu.memory_space<vmem>>, vector<128x384xf32>,
    } else {
    }
    %c0_i32_1 = arith.constant 0 : i32
    %3 = arith.cmpi sgt, %arg0, %c0_i32_1 : i32
    %4 = arith.extui %3 : i1 to i32
    %c0_i32_2 = arith.constant 0 : i32
    %5 = arith.cmpi ne, %4, %c0_i32_2 : i32
    scf.if %5 {
      %c0_70 = arith.constant 0 : index
      %c0_71 = arith.constant 0 : index
      %291 = vector.load %arg10[%c0_70, %c0_71] : memref<128x128xbf16, #tpu.memory_space<vmem>>, vector<128x128xbf16>
      %c0_72 = arith.constant 0 : index
      %c0_73 = arith.constant 0 : index
      %c0_74 = arith.constant 0 : index
      %292 = vector.load %arg2[%c0_72, %c0_73, %c0_74] : memref<1x128x384xbf16, #tpu.memory_space<vmem>>, vector<1x128x384xbf16>
      %293 = vector.shape_cast %292 : vector<1x128x384xbf16> to vector<128x384xbf16>
      %cst_75 = arith.constant dense<0.000000e+00> : vector<128x384xf32>
      %294 = tpu.matmul %291, %293, %cst_75 {dimension_numbers = #tpu.dot_dimension_numbers<[1], [0], [0], [1], [0, 0, 1, 1], [], []>} : vector<128x128xbf16>, vector<128x384xbf16>, vector<128x384xf32> -> vector<128x384xf32>
      %c0_76 = arith.constant 0 : index
      %c0_77 = arith.constant 0 : index
      %c0_78 = arith.constant 0 : index
      %295 = vector.load %arg5[%c0_76, %c0_77, %c0_78] : memref<1x1x384xf32, #tpu.memory_space<vmem>>, vector<1x1x384xf32>
      %296 = vector.shape_cast %295 : vector<1x1x384xf32> to vector<1x384xf32>
      %297 = vector.broadcast %296 : vector<1x384xf32> to vector<128x384xf32>
      %298 = arith.addf %294, %297 : vector<128x384xf32>
      %c0_79 = arith.constant 0 : index
      %c0_80 = arith.constant 0 : index
      %299 = vector.load %arg11[%c0_79, %c0_80] : memref<128x384xf32, #tpu.memory_space<vmem>>, vector<128x384xf32>
      tpu.vector_store %arg11[%c0_79, %c0_80], %298 {strides = array<i32>} : memref<128x384xf32, #tpu.memory_space<vmem>>, vector<128x384xf32>,
    } else {
    }
    %c0 = arith.constant 0 : index
    %c0_3 = arith.constant 0 : index
    %c0_4 = arith.constant 0 : index
    %6 = vector.load %arg3[%c0, %c0_3, %c0_4] : memref<1x128x256xbf16, #tpu.memory_space<vmem>>, vector<1x128x256xbf16>
    %7 = vector.shape_cast %6 : vector<1x128x256xbf16> to vector<128x256xbf16>
    %c0_5 = arith.constant 0 : index
    %c0_6 = arith.constant 0 : index
    %c0_7 = arith.constant 0 : index
    %8 = vector.load %arg4[%c0_5, %c0_6, %c0_7] : memref<1x128x128xbf16, #tpu.memory_space<vmem>>, vector<1x128x128xbf16>
    %9 = vector.shape_cast %8 : vector<1x128x128xbf16> to vector<128x128xbf16>
    %cst = arith.constant 0.000000e+00 : f32
    %10 = vector.broadcast %cst : f32 to vector<16x128xf32>
    %c0_8 = arith.constant 0 : index
    %c0_9 = arith.constant 0 : index
    %c0_10 = arith.constant 0 : index
    %11 = vector.load %arg6[%c0_8, %c0_9, %c0_10] : memref<1x1x128xf32, #tpu.memory_space<vmem>>, vector<1x1x128xf32>
    %12 = vector.shape_cast %11 : vector<1x1x128xf32> to vector<1x128xf32>
    %13 = vector.broadcast %12 : vector<1x128xf32> to vector<16x128xf32>
    %14 = arith.addf %10, %13 : vector<16x128xf32>
    %cst_11 = arith.constant 0.000000e+00 : f32
    %15 = vector.broadcast %cst_11 : f32 to vector<16x128xf32>
    %c0_i32_12 = arith.constant 0 : i32
    %c16_i32 = arith.constant 16 : i32
    %16 = arith.muli %c0_i32_12, %c16_i32 : i32
    %17 = tpu.assume_multiple %16, 16 : i32
    %18 = arith.index_cast %17 : i32 to index
    %c0_13 = arith.constant 0 : index
    %19 = vector.load %arg11[%18, %c0_13] : memref<128x384xf32, #tpu.memory_space<vmem>>, vector<16x384xf32>
    %20 = arith.truncf %15 : vector<16x128xf32> to vector<16x128xbf16>
    %cst_14 = arith.constant dense<0.000000e+00> : vector<16x256xf32>
    %21 = tpu.matmul %20, %7, %cst_14 {dimension_numbers = #tpu.dot_dimension_numbers<[1], [0], [0], [1], [0, 0, 1, 1], [], []>} : vector<16x128xbf16>, vector<128x256xbf16>, vector<16x256xf32> -> vector<16x256xf32>
    %cst_15 = arith.constant dense<0.000000e+00> : vector<16x128xf32>
    %22 = tpu.matmul %20, %9, %cst_15 {dimension_numbers = #tpu.dot_dimension_numbers<[1], [0], [0], [1], [0, 0, 1, 1], [], []>} : vector<16x128xbf16>, vector<128x128xbf16>, vector<16x128xf32> -> vector<16x128xf32>
    %23 = vector.extract_strided_slice %19 {offsets = [0, 0], sizes = [16, 128], strides = [1, 1]} : vector<16x384xf32> to vector<16x128xf32>
    %24 = vector.extract_strided_slice %21 {offsets = [0, 0], sizes = [16, 128], strides = [1, 1]} : vector<16x256xf32> to vector<16x128xf32>
    %25 = arith.addf %23, %24 : vector<16x128xf32>
    %26 = arith.negf %25 : vector<16x128xf32>
    %27 = math.exp %26 : vector<16x128xf32>
    %cst_16 = arith.constant 1.000000e+00 : f32
    %28 = vector.broadcast %cst_16 : f32 to vector<16x128xf32>
    %29 = arith.addf %28, %27 : vector<16x128xf32>
    %30 = arith.divf %28, %29 : vector<16x128xf32>
    %31 = vector.extract_strided_slice %19 {offsets = [0, 128], sizes = [16, 128], strides = [1, 1]} : vector<16x384xf32> to vector<16x128xf32>
    %32 = vector.extract_strided_slice %21 {offsets = [0, 128], sizes = [16, 128], strides = [1, 1]} : vector<16x256xf32> to vector<16x128xf32>
    %33 = arith.addf %31, %32 : vector<16x128xf32>
    %34 = arith.negf %33 : vector<16x128xf32>
    %35 = math.exp %34 : vector<16x128xf32>
    %cst_17 = arith.constant 1.000000e+00 : f32
    %36 = vector.broadcast %cst_17 : f32 to vector<16x128xf32>
    %37 = arith.addf %36, %35 : vector<16x128xf32>
    %38 = arith.divf %36, %37 : vector<16x128xf32>
    %39 = vector.extract_strided_slice %19 {offsets = [0, 256], sizes = [16, 128], strides = [1, 1]} : vector<16x384xf32> to vector<16x128xf32>
    %40 = arith.addf %22, %14 : vector<16x128xf32>
    %41 = arith.mulf %30, %40 : vector<16x128xf32>
    %42 = arith.addf %39, %41 : vector<16x128xf32>
    %43 = math.tanh %42 : vector<16x128xf32>
    %44 = arith.subf %15, %43 : vector<16x128xf32>
    %45 = arith.mulf %38, %44 : vector<16x128xf32>
    %46 = arith.addf %43, %45 : vector<16x128xf32>
    %47 = arith.truncf %46 : vector<16x128xf32> to vector<16x128xbf16>
    %48 = arith.index_cast %17 : i32 to index
    %c0_18 = arith.constant 0 : index
    %49 = vector.load %arg10[%48, %c0_18] : memref<128x128xbf16, #tpu.memory_space<vmem>>, vector<16x128xbf16>
    tpu.vector_store %arg10[%48, %c0_18], %47 {strides = array<i32>} : memref<128x128xbf16, #tpu.memory_space<vmem>>, vector<16x128xbf16>,
    %c1_i32 = arith.constant 1 : i32
    %c16_i32_19 = arith.constant 16 : i32
    %50 = arith.muli %c1_i32, %c16_i32_19 : i32
    %51 = tpu.assume_multiple %50, 16 : i32
    %52 = arith.index_cast %51 : i32 to index
    %c0_20 = arith.constant 0 : index
    %53 = vector.load %arg11[%52, %c0_20] : memref<128x384xf32, #tpu.memory_space<vmem>>, vector<16x384xf32>
    %54 = arith.truncf %46 : vector<16x128xf32> to vector<16x128xbf16>
    %cst_21 = arith.constant dense<0.000000e+00> : vector<16x256xf32>
    %55 = tpu.matmul %54, %7, %cst_21 {dimension_numbers = #tpu.dot_dimension_numbers<[1], [0], [0], [1], [0, 0, 1, 1], [], []>} : vector<16x128xbf16>, vector<128x256xbf16>, vector<16x256xf32> -> vector<16x256xf32>
    %cst_22 = arith.constant dense<0.000000e+00> : vector<16x128xf32>
    %56 = tpu.matmul %54, %9, %cst_22 {dimension_numbers = #tpu.dot_dimension_numbers<[1], [0], [0], [1], [0, 0, 1, 1], [], []>} : vector<16x128xbf16>, vector<128x128xbf16>, vector<16x128xf32> -> vector<16x128xf32>
    %57 = vector.extract_strided_slice %53 {offsets = [0, 0], sizes = [16, 128], strides = [1, 1]} : vector<16x384xf32> to vector<16x128xf32>
    %58 = vector.extract_strided_slice %55 {offsets = [0, 0], sizes = [16, 128], strides = [1, 1]} : vector<16x256xf32> to vector<16x128xf32>
    %59 = arith.addf %57, %58 : vector<16x128xf32>
    %60 = arith.negf %59 : vector<16x128xf32>
    %61 = math.exp %60 : vector<16x128xf32>
    %cst_23 = arith.constant 1.000000e+00 : f32
    %62 = vector.broadcast %cst_23 : f32 to vector<16x128xf32>
    %63 = arith.addf %62, %61 : vector<16x128xf32>
    %64 = arith.divf %62, %63 : vector<16x128xf32>
    %65 = vector.extract_strided_slice %53 {offsets = [0, 128], sizes = [16, 128], strides = [1, 1]} : vector<16x384xf32> to vector<16x128xf32>
    %66 = vector.extract_strided_slice %55 {offsets = [0, 128], sizes = [16, 128], strides = [1, 1]} : vector<16x256xf32> to vector<16x128xf32>
    %67 = arith.addf %65, %66 : vector<16x128xf32>
    %68 = arith.negf %67 : vector<16x128xf32>
    %69 = math.exp %68 : vector<16x128xf32>
    %cst_24 = arith.constant 1.000000e+00 : f32
    %70 = vector.broadcast %cst_24 : f32 to vector<16x128xf32>
    %71 = arith.addf %70, %69 : vector<16x128xf32>
    %72 = arith.divf %70, %71 : vector<16x128xf32>
    %73 = vector.extract_strided_slice %53 {offsets = [0, 256], sizes = [16, 128], strides = [1, 1]} : vector<16x384xf32> to vector<16x128xf32>
    %74 = arith.addf %56, %14 : vector<16x128xf32>
    %75 = arith.mulf %64, %74 : vector<16x128xf32>
    %76 = arith.addf %73, %75 : vector<16x128xf32>
    %77 = math.tanh %76 : vector<16x128xf32>
    %78 = arith.subf %46, %77 : vector<16x128xf32>
    %79 = arith.mulf %72, %78 : vector<16x128xf32>
    %80 = arith.addf %77, %79 : vector<16x128xf32>
    %81 = arith.truncf %80 : vector<16x128xf32> to vector<16x128xbf16>
    %82 = arith.index_cast %51 : i32 to index
    %c0_25 = arith.constant 0 : index
    %83 = vector.load %arg10[%82, %c0_25] : memref<128x128xbf16, #tpu.memory_space<vmem>>, vector<16x128xbf16>
    tpu.vector_store %arg10[%82, %c0_25], %81 {strides = array<i32>} : memref<128x128xbf16, #tpu.memory_space<vmem>>, vector<16x128xbf16>,
    %c2_i32 = arith.constant 2 : i32
    %c16_i32_26 = arith.constant 16 : i32
    %84 = arith.muli %c2_i32, %c16_i32_26 : i32
    %85 = tpu.assume_multiple %84, 16 : i32
    %86 = arith.index_cast %85 : i32 to index
    %c0_27 = arith.constant 0 : index
    %87 = vector.load %arg11[%86, %c0_27] : memref<128x384xf32, #tpu.memory_space<vmem>>, vector<16x384xf32>
    %88 = arith.truncf %80 : vector<16x128xf32> to vector<16x128xbf16>
    %cst_28 = arith.constant dense<0.000000e+00> : vector<16x256xf32>
    %89 = tpu.matmul %88, %7, %cst_28 {dimension_numbers = #tpu.dot_dimension_numbers<[1], [0], [0], [1], [0, 0, 1, 1], [], []>} : vector<16x128xbf16>, vector<128x256xbf16>, vector<16x256xf32> -> vector<16x256xf32>
    %cst_29 = arith.constant dense<0.000000e+00> : vector<16x128xf32>
    %90 = tpu.matmul %88, %9, %cst_29 {dimension_numbers = #tpu.dot_dimension_numbers<[1], [0], [0], [1], [0, 0, 1, 1], [], []>} : vector<16x128xbf16>, vector<128x128xbf16>, vector<16x128xf32> -> vector<16x128xf32>
    %91 = vector.extract_strided_slice %87 {offsets = [0, 0], sizes = [16, 128], strides = [1, 1]} : vector<16x384xf32> to vector<16x128xf32>
    %92 = vector.extract_strided_slice %89 {offsets = [0, 0], sizes = [16, 128], strides = [1, 1]} : vector<16x256xf32> to vector<16x128xf32>
    %93 = arith.addf %91, %92 : vector<16x128xf32>
    %94 = arith.negf %93 : vector<16x128xf32>
    %95 = math.exp %94 : vector<16x128xf32>
    %cst_30 = arith.constant 1.000000e+00 : f32
    %96 = vector.broadcast %cst_30 : f32 to vector<16x128xf32>
    %97 = arith.addf %96, %95 : vector<16x128xf32>
    %98 = arith.divf %96, %97 : vector<16x128xf32>
    %99 = vector.extract_strided_slice %87 {offsets = [0, 128], sizes = [16, 128], strides = [1, 1]} : vector<16x384xf32> to vector<16x128xf32>
    %100 = vector.extract_strided_slice %89 {offsets = [0, 128], sizes = [16, 128], strides = [1, 1]} : vector<16x256xf32> to vector<16x128xf32>
    %101 = arith.addf %99, %100 : vector<16x128xf32>
    %102 = arith.negf %101 : vector<16x128xf32>
    %103 = math.exp %102 : vector<16x128xf32>
    %cst_31 = arith.constant 1.000000e+00 : f32
    %104 = vector.broadcast %cst_31 : f32 to vector<16x128xf32>
    %105 = arith.addf %104, %103 : vector<16x128xf32>
    %106 = arith.divf %104, %105 : vector<16x128xf32>
    %107 = vector.extract_strided_slice %87 {offsets = [0, 256], sizes = [16, 128], strides = [1, 1]} : vector<16x384xf32> to vector<16x128xf32>
    %108 = arith.addf %90, %14 : vector<16x128xf32>
    %109 = arith.mulf %98, %108 : vector<16x128xf32>
    %110 = arith.addf %107, %109 : vector<16x128xf32>
    %111 = math.tanh %110 : vector<16x128xf32>
    %112 = arith.subf %80, %111 : vector<16x128xf32>
    %113 = arith.mulf %106, %112 : vector<16x128xf32>
    %114 = arith.addf %111, %113 : vector<16x128xf32>
    %115 = arith.truncf %114 : vector<16x128xf32> to vector<16x128xbf16>
    %116 = arith.index_cast %85 : i32 to index
    %c0_32 = arith.constant 0 : index
    %117 = vector.load %arg10[%116, %c0_32] : memref<128x128xbf16, #tpu.memory_space<vmem>>, vector<16x128xbf16>
    tpu.vector_store %arg10[%116, %c0_32], %115 {strides = array<i32>} : memref<128x128xbf16, #tpu.memory_space<vmem>>, vector<16x128xbf16>,
    %c3_i32 = arith.constant 3 : i32
    %c16_i32_33 = arith.constant 16 : i32
    %118 = arith.muli %c3_i32, %c16_i32_33 : i32
    %119 = tpu.assume_multiple %118, 16 : i32
    %120 = arith.index_cast %119 : i32 to index
    %c0_34 = arith.constant 0 : index
    %121 = vector.load %arg11[%120, %c0_34] : memref<128x384xf32, #tpu.memory_space<vmem>>, vector<16x384xf32>
    %122 = arith.truncf %114 : vector<16x128xf32> to vector<16x128xbf16>
    %cst_35 = arith.constant dense<0.000000e+00> : vector<16x256xf32>
    %123 = tpu.matmul %122, %7, %cst_35 {dimension_numbers = #tpu.dot_dimension_numbers<[1], [0], [0], [1], [0, 0, 1, 1], [], []>} : vector<16x128xbf16>, vector<128x256xbf16>, vector<16x256xf32> -> vector<16x256xf32>
    %cst_36 = arith.constant dense<0.000000e+00> : vector<16x128xf32>
    %124 = tpu.matmul %122, %9, %cst_36 {dimension_numbers = #tpu.dot_dimension_numbers<[1], [0], [0], [1], [0, 0, 1, 1], [], []>} : vector<16x128xbf16>, vector<128x128xbf16>, vector<16x128xf32> -> vector<16x128xf32>
    %125 = vector.extract_strided_slice %121 {offsets = [0, 0], sizes = [16, 128], strides = [1, 1]} : vector<16x384xf32> to vector<16x128xf32>
    %126 = vector.extract_strided_slice %123 {offsets = [0, 0], sizes = [16, 128], strides = [1, 1]} : vector<16x256xf32> to vector<16x128xf32>
    %127 = arith.addf %125, %126 : vector<16x128xf32>
    %128 = arith.negf %127 : vector<16x128xf32>
    %129 = math.exp %128 : vector<16x128xf32>
    %cst_37 = arith.constant 1.000000e+00 : f32
    %130 = vector.broadcast %cst_37 : f32 to vector<16x128xf32>
    %131 = arith.addf %130, %129 : vector<16x128xf32>
    %132 = arith.divf %130, %131 : vector<16x128xf32>
    %133 = vector.extract_strided_slice %121 {offsets = [0, 128], sizes = [16, 128], strides = [1, 1]} : vector<16x384xf32> to vector<16x128xf32>
    %134 = vector.extract_strided_slice %123 {offsets = [0, 128], sizes = [16, 128], strides = [1, 1]} : vector<16x256xf32> to vector<16x128xf32>
    %135 = arith.addf %133, %134 : vector<16x128xf32>
    %136 = arith.negf %135 : vector<16x128xf32>
    %137 = math.exp %136 : vector<16x128xf32>
    %cst_38 = arith.constant 1.000000e+00 : f32
    %138 = vector.broadcast %cst_38 : f32 to vector<16x128xf32>
    %139 = arith.addf %138, %137 : vector<16x128xf32>
    %140 = arith.divf %138, %139 : vector<16x128xf32>
    %141 = vector.extract_strided_slice %121 {offsets = [0, 256], sizes = [16, 128], strides = [1, 1]} : vector<16x384xf32> to vector<16x128xf32>
    %142 = arith.addf %124, %14 : vector<16x128xf32>
    %143 = arith.mulf %132, %142 : vector<16x128xf32>
    %144 = arith.addf %141, %143 : vector<16x128xf32>
    %145 = math.tanh %144 : vector<16x128xf32>
    %146 = arith.subf %114, %145 : vector<16x128xf32>
    %147 = arith.mulf %140, %146 : vector<16x128xf32>
    %148 = arith.addf %145, %147 : vector<16x128xf32>
    %149 = arith.truncf %148 : vector<16x128xf32> to vector<16x128xbf16>
    %150 = arith.index_cast %119 : i32 to index
    %c0_39 = arith.constant 0 : index
    %151 = vector.load %arg10[%150, %c0_39] : memref<128x128xbf16, #tpu.memory_space<vmem>>, vector<16x128xbf16>
    tpu.vector_store %arg10[%150, %c0_39], %149 {strides = array<i32>} : memref<128x128xbf16, #tpu.memory_space<vmem>>, vector<16x128xbf16>,
    %c4_i32 = arith.constant 4 : i32
    %c16_i32_40 = arith.constant 16 : i32
    %152 = arith.muli %c4_i32, %c16_i32_40 : i32
    %153 = tpu.assume_multiple %152, 16 : i32
    %154 = arith.index_cast %153 : i32 to index
    %c0_41 = arith.constant 0 : index
    %155 = vector.load %arg11[%154, %c0_41] : memref<128x384xf32, #tpu.memory_space<vmem>>, vector<16x384xf32>
    %156 = arith.truncf %148 : vector<16x128xf32> to vector<16x128xbf16>
    %cst_42 = arith.constant dense<0.000000e+00> : vector<16x256xf32>
    %157 = tpu.matmul %156, %7, %cst_42 {dimension_numbers = #tpu.dot_dimension_numbers<[1], [0], [0], [1], [0, 0, 1, 1], [], []>} : vector<16x128xbf16>, vector<128x256xbf16>, vector<16x256xf32> -> vector<16x256xf32>
    %cst_43 = arith.constant dense<0.000000e+00> : vector<16x128xf32>
    %158 = tpu.matmul %156, %9, %cst_43 {dimension_numbers = #tpu.dot_dimension_numbers<[1], [0], [0], [1], [0, 0, 1, 1], [], []>} : vector<16x128xbf16>, vector<128x128xbf16>, vector<16x128xf32> -> vector<16x128xf32>
    %159 = vector.extract_strided_slice %155 {offsets = [0, 0], sizes = [16, 128], strides = [1, 1]} : vector<16x384xf32> to vector<16x128xf32>
    %160 = vector.extract_strided_slice %157 {offsets = [0, 0], sizes = [16, 128], strides = [1, 1]} : vector<16x256xf32> to vector<16x128xf32>
    %161 = arith.addf %159, %160 : vector<16x128xf32>
    %162 = arith.negf %161 : vector<16x128xf32>
    %163 = math.exp %162 : vector<16x128xf32>
    %cst_44 = arith.constant 1.000000e+00 : f32
    %164 = vector.broadcast %cst_44 : f32 to vector<16x128xf32>
    %165 = arith.addf %164, %163 : vector<16x128xf32>
    %166 = arith.divf %164, %165 : vector<16x128xf32>
    %167 = vector.extract_strided_slice %155 {offsets = [0, 128], sizes = [16, 128], strides = [1, 1]} : vector<16x384xf32> to vector<16x128xf32>
    %168 = vector.extract_strided_slice %157 {offsets = [0, 128], sizes = [16, 128], strides = [1, 1]} : vector<16x256xf32> to vector<16x128xf32>
    %169 = arith.addf %167, %168 : vector<16x128xf32>
    %170 = arith.negf %169 : vector<16x128xf32>
    %171 = math.exp %170 : vector<16x128xf32>
    %cst_45 = arith.constant 1.000000e+00 : f32
    %172 = vector.broadcast %cst_45 : f32 to vector<16x128xf32>
    %173 = arith.addf %172, %171 : vector<16x128xf32>
    %174 = arith.divf %172, %173 : vector<16x128xf32>
    %175 = vector.extract_strided_slice %155 {offsets = [0, 256], sizes = [16, 128], strides = [1, 1]} : vector<16x384xf32> to vector<16x128xf32>
    %176 = arith.addf %158, %14 : vector<16x128xf32>
    %177 = arith.mulf %166, %176 : vector<16x128xf32>
    %178 = arith.addf %175, %177 : vector<16x128xf32>
    %179 = math.tanh %178 : vector<16x128xf32>
    %180 = arith.subf %148, %179 : vector<16x128xf32>
    %181 = arith.mulf %174, %180 : vector<16x128xf32>
    %182 = arith.addf %179, %181 : vector<16x128xf32>
    %183 = arith.truncf %182 : vector<16x128xf32> to vector<16x128xbf16>
    %184 = arith.index_cast %153 : i32 to index
    %c0_46 = arith.constant 0 : index
    %185 = vector.load %arg10[%184, %c0_46] : memref<128x128xbf16, #tpu.memory_space<vmem>>, vector<16x128xbf16>
    tpu.vector_store %arg10[%184, %c0_46], %183 {strides = array<i32>} : memref<128x128xbf16, #tpu.memory_space<vmem>>, vector<16x128xbf16>,
    %c5_i32 = arith.constant 5 : i32
    %c16_i32_47 = arith.constant 16 : i32
    %186 = arith.muli %c5_i32, %c16_i32_47 : i32
    %187 = tpu.assume_multiple %186, 16 : i32
    %188 = arith.index_cast %187 : i32 to index
    %c0_48 = arith.constant 0 : index
    %189 = vector.load %arg11[%188, %c0_48] : memref<128x384xf32, #tpu.memory_space<vmem>>, vector<16x384xf32>
    %190 = arith.truncf %182 : vector<16x128xf32> to vector<16x128xbf16>
    %cst_49 = arith.constant dense<0.000000e+00> : vector<16x256xf32>
    %191 = tpu.matmul %190, %7, %cst_49 {dimension_numbers = #tpu.dot_dimension_numbers<[1], [0], [0], [1], [0, 0, 1, 1], [], []>} : vector<16x128xbf16>, vector<128x256xbf16>, vector<16x256xf32> -> vector<16x256xf32>
    %cst_50 = arith.constant dense<0.000000e+00> : vector<16x128xf32>
    %192 = tpu.matmul %190, %9, %cst_50 {dimension_numbers = #tpu.dot_dimension_numbers<[1], [0], [0], [1], [0, 0, 1, 1], [], []>} : vector<16x128xbf16>, vector<128x128xbf16>, vector<16x128xf32> -> vector<16x128xf32>
    %193 = vector.extract_strided_slice %189 {offsets = [0, 0], sizes = [16, 128], strides = [1, 1]} : vector<16x384xf32> to vector<16x128xf32>
    %194 = vector.extract_strided_slice %191 {offsets = [0, 0], sizes = [16, 128], strides = [1, 1]} : vector<16x256xf32> to vector<16x128xf32>
    %195 = arith.addf %193, %194 : vector<16x128xf32>
    %196 = arith.negf %195 : vector<16x128xf32>
    %197 = math.exp %196 : vector<16x128xf32>
    %cst_51 = arith.constant 1.000000e+00 : f32
    %198 = vector.broadcast %cst_51 : f32 to vector<16x128xf32>
    %199 = arith.addf %198, %197 : vector<16x128xf32>
    %200 = arith.divf %198, %199 : vector<16x128xf32>
    %201 = vector.extract_strided_slice %189 {offsets = [0, 128], sizes = [16, 128], strides = [1, 1]} : vector<16x384xf32> to vector<16x128xf32>
    %202 = vector.extract_strided_slice %191 {offsets = [0, 128], sizes = [16, 128], strides = [1, 1]} : vector<16x256xf32> to vector<16x128xf32>
    %203 = arith.addf %201, %202 : vector<16x128xf32>
    %204 = arith.negf %203 : vector<16x128xf32>
    %205 = math.exp %204 : vector<16x128xf32>
    %cst_52 = arith.constant 1.000000e+00 : f32
    %206 = vector.broadcast %cst_52 : f32 to vector<16x128xf32>
    %207 = arith.addf %206, %205 : vector<16x128xf32>
    %208 = arith.divf %206, %207 : vector<16x128xf32>
    %209 = vector.extract_strided_slice %189 {offsets = [0, 256], sizes = [16, 128], strides = [1, 1]} : vector<16x384xf32> to vector<16x128xf32>
    %210 = arith.addf %192, %14 : vector<16x128xf32>
    %211 = arith.mulf %200, %210 : vector<16x128xf32>
    %212 = arith.addf %209, %211 : vector<16x128xf32>
    %213 = math.tanh %212 : vector<16x128xf32>
    %214 = arith.subf %182, %213 : vector<16x128xf32>
    %215 = arith.mulf %208, %214 : vector<16x128xf32>
    %216 = arith.addf %213, %215 : vector<16x128xf32>
    %217 = arith.truncf %216 : vector<16x128xf32> to vector<16x128xbf16>
    %218 = arith.index_cast %187 : i32 to index
    %c0_53 = arith.constant 0 : index
    %219 = vector.load %arg10[%218, %c0_53] : memref<128x128xbf16, #tpu.memory_space<vmem>>, vector<16x128xbf16>
    tpu.vector_store %arg10[%218, %c0_53], %217 {strides = array<i32>} : memref<128x128xbf16, #tpu.memory_space<vmem>>, vector<16x128xbf16>,
    %c6_i32 = arith.constant 6 : i32
    %c16_i32_54 = arith.constant 16 : i32
    %220 = arith.muli %c6_i32, %c16_i32_54 : i32
    %221 = tpu.assume_multiple %220, 16 : i32
    %222 = arith.index_cast %221 : i32 to index
    %c0_55 = arith.constant 0 : index
    %223 = vector.load %arg11[%222, %c0_55] : memref<128x384xf32, #tpu.memory_space<vmem>>, vector<16x384xf32>
    %224 = arith.truncf %216 : vector<16x128xf32> to vector<16x128xbf16>
    %cst_56 = arith.constant dense<0.000000e+00> : vector<16x256xf32>
    %225 = tpu.matmul %224, %7, %cst_56 {dimension_numbers = #tpu.dot_dimension_numbers<[1], [0], [0], [1], [0, 0, 1, 1], [], []>} : vector<16x128xbf16>, vector<128x256xbf16>, vector<16x256xf32> -> vector<16x256xf32>
    %cst_57 = arith.constant dense<0.000000e+00> : vector<16x128xf32>
    %226 = tpu.matmul %224, %9, %cst_57 {dimension_numbers = #tpu.dot_dimension_numbers<[1], [0], [0], [1], [0, 0, 1, 1], [], []>} : vector<16x128xbf16>, vector<128x128xbf16>, vector<16x128xf32> -> vector<16x128xf32>
    %227 = vector.extract_strided_slice %223 {offsets = [0, 0], sizes = [16, 128], strides = [1, 1]} : vector<16x384xf32> to vector<16x128xf32>
    %228 = vector.extract_strided_slice %225 {offsets = [0, 0], sizes = [16, 128], strides = [1, 1]} : vector<16x256xf32> to vector<16x128xf32>
    %229 = arith.addf %227, %228 : vector<16x128xf32>
    %230 = arith.negf %229 : vector<16x128xf32>
    %231 = math.exp %230 : vector<16x128xf32>
    %cst_58 = arith.constant 1.000000e+00 : f32
    %232 = vector.broadcast %cst_58 : f32 to vector<16x128xf32>
    %233 = arith.addf %232, %231 : vector<16x128xf32>
    %234 = arith.divf %232, %233 : vector<16x128xf32>
    %235 = vector.extract_strided_slice %223 {offsets = [0, 128], sizes = [16, 128], strides = [1, 1]} : vector<16x384xf32> to vector<16x128xf32>
    %236 = vector.extract_strided_slice %225 {offsets = [0, 128], sizes = [16, 128], strides = [1, 1]} : vector<16x256xf32> to vector<16x128xf32>
    %237 = arith.addf %235, %236 : vector<16x128xf32>
    %238 = arith.negf %237 : vector<16x128xf32>
    %239 = math.exp %238 : vector<16x128xf32>
    %cst_59 = arith.constant 1.000000e+00 : f32
    %240 = vector.broadcast %cst_59 : f32 to vector<16x128xf32>
    %241 = arith.addf %240, %239 : vector<16x128xf32>
    %242 = arith.divf %240, %241 : vector<16x128xf32>
    %243 = vector.extract_strided_slice %223 {offsets = [0, 256], sizes = [16, 128], strides = [1, 1]} : vector<16x384xf32> to vector<16x128xf32>
    %244 = arith.addf %226, %14 : vector<16x128xf32>
    %245 = arith.mulf %234, %244 : vector<16x128xf32>
    %246 = arith.addf %243, %245 : vector<16x128xf32>
    %247 = math.tanh %246 : vector<16x128xf32>
    %248 = arith.subf %216, %247 : vector<16x128xf32>
    %249 = arith.mulf %242, %248 : vector<16x128xf32>
    %250 = arith.addf %247, %249 : vector<16x128xf32>
    %251 = arith.truncf %250 : vector<16x128xf32> to vector<16x128xbf16>
    %252 = arith.index_cast %221 : i32 to index
    %c0_60 = arith.constant 0 : index
    %253 = vector.load %arg10[%252, %c0_60] : memref<128x128xbf16, #tpu.memory_space<vmem>>, vector<16x128xbf16>
    tpu.vector_store %arg10[%252, %c0_60], %251 {strides = array<i32>} : memref<128x128xbf16, #tpu.memory_space<vmem>>, vector<16x128xbf16>,
    %c7_i32 = arith.constant 7 : i32
    %c16_i32_61 = arith.constant 16 : i32
    %254 = arith.muli %c7_i32, %c16_i32_61 : i32
    %255 = tpu.assume_multiple %254, 16 : i32
    %256 = arith.index_cast %255 : i32 to index
    %c0_62 = arith.constant 0 : index
    %257 = vector.load %arg11[%256, %c0_62] : memref<128x384xf32, #tpu.memory_space<vmem>>, vector<16x384xf32>
    %258 = arith.truncf %250 : vector<16x128xf32> to vector<16x128xbf16>
    %cst_63 = arith.constant dense<0.000000e+00> : vector<16x256xf32>
    %259 = tpu.matmul %258, %7, %cst_63 {dimension_numbers = #tpu.dot_dimension_numbers<[1], [0], [0], [1], [0, 0, 1, 1], [], []>} : vector<16x128xbf16>, vector<128x256xbf16>, vector<16x256xf32> -> vector<16x256xf32>
    %cst_64 = arith.constant dense<0.000000e+00> : vector<16x128xf32>
    %260 = tpu.matmul %258, %9, %cst_64 {dimension_numbers = #tpu.dot_dimension_numbers<[1], [0], [0], [1], [0, 0, 1, 1], [], []>} : vector<16x128xbf16>, vector<128x128xbf16>, vector<16x128xf32> -> vector<16x128xf32>
    %261 = vector.extract_strided_slice %257 {offsets = [0, 0], sizes = [16, 128], strides = [1, 1]} : vector<16x384xf32> to vector<16x128xf32>
    %262 = vector.extract_strided_slice %259 {offsets = [0, 0], sizes = [16, 128], strides = [1, 1]} : vector<16x256xf32> to vector<16x128xf32>
    %263 = arith.addf %261, %262 : vector<16x128xf32>
    %264 = arith.negf %263 : vector<16x128xf32>
    %265 = math.exp %264 : vector<16x128xf32>
    %cst_65 = arith.constant 1.000000e+00 : f32
    %266 = vector.broadcast %cst_65 : f32 to vector<16x128xf32>
    %267 = arith.addf %266, %265 : vector<16x128xf32>
    %268 = arith.divf %266, %267 : vector<16x128xf32>
    %269 = vector.extract_strided_slice %257 {offsets = [0, 128], sizes = [16, 128], strides = [1, 1]} : vector<16x384xf32> to vector<16x128xf32>
    %270 = vector.extract_strided_slice %259 {offsets = [0, 128], sizes = [16, 128], strides = [1, 1]} : vector<16x256xf32> to vector<16x128xf32>
    %271 = arith.addf %269, %270 : vector<16x128xf32>
    %272 = arith.negf %271 : vector<16x128xf32>
    %273 = math.exp %272 : vector<16x128xf32>
    %cst_66 = arith.constant 1.000000e+00 : f32
    %274 = vector.broadcast %cst_66 : f32 to vector<16x128xf32>
    %275 = arith.addf %274, %273 : vector<16x128xf32>
    %276 = arith.divf %274, %275 : vector<16x128xf32>
    %277 = vector.extract_strided_slice %257 {offsets = [0, 256], sizes = [16, 128], strides = [1, 1]} : vector<16x384xf32> to vector<16x128xf32>
    %278 = arith.addf %260, %14 : vector<16x128xf32>
    %279 = arith.mulf %268, %278 : vector<16x128xf32>
    %280 = arith.addf %277, %279 : vector<16x128xf32>
    %281 = math.tanh %280 : vector<16x128xf32>
    %282 = arith.subf %250, %281 : vector<16x128xf32>
    %283 = arith.mulf %276, %282 : vector<16x128xf32>
    %284 = arith.addf %281, %283 : vector<16x128xf32>
    %285 = arith.truncf %284 : vector<16x128xf32> to vector<16x128xbf16>
    %286 = arith.index_cast %255 : i32 to index
    %c0_67 = arith.constant 0 : index
    %287 = vector.load %arg10[%286, %c0_67] : memref<128x128xbf16, #tpu.memory_space<vmem>>, vector<16x128xbf16>
    tpu.vector_store %arg10[%286, %c0_67], %285 {strides = array<i32>} : memref<128x128xbf16, #tpu.memory_space<vmem>>, vector<16x128xbf16>,
    %c8_i32 = arith.constant 8 : i32
    %c1_i32_68 = arith.constant 1 : i32
    %288 = arith.cmpi eq, %arg0, %c1_i32_68 : i32
    %289 = arith.extui %288 : i1 to i32
    %c0_i32_69 = arith.constant 0 : i32
    %290 = arith.cmpi ne, %289, %c0_i32_69 : i32
    scf.if %290 {
      %291 = arith.truncf %284 : vector<16x128xf32> to vector<16x128xbf16>
      %c0_70 = arith.constant 0 : index
      %c0_71 = arith.constant 0 : index
      %292 = vector.load %arg7[%c0_70, %c0_71] : memref<128x128xbf16, #tpu.memory_space<vmem>>, vector<128x128xbf16>
      %cst_72 = arith.constant dense<0.000000e+00> : vector<16x128xf32>
      %293 = tpu.matmul %291, %292, %cst_72 {dimension_numbers = #tpu.dot_dimension_numbers<[1], [0], [0], [1], [0, 0, 1, 1], [], []>} : vector<16x128xbf16>, vector<128x128xbf16>, vector<16x128xf32> -> vector<16x128xf32>
      %c0_73 = arith.constant 0 : index
      %c0_74 = arith.constant 0 : index
      %294 = vector.load %arg8[%c0_73, %c0_74] : memref<1x128xf32, #tpu.memory_space<vmem>>, vector<1x128xf32>
      %295 = vector.broadcast %294 : vector<1x128xf32> to vector<16x128xf32>
      %296 = arith.addf %293, %295 : vector<16x128xf32>
      %297 = arith.negf %296 : vector<16x128xf32>
      %298 = math.exp %297 : vector<16x128xf32>
      %cst_75 = arith.constant 1.000000e+00 : f32
      %299 = vector.broadcast %cst_75 : f32 to vector<16x128xf32>
      %300 = arith.addf %299, %298 : vector<16x128xf32>
      %301 = arith.divf %299, %300 : vector<16x128xf32>
      %c0_76 = arith.constant 0 : index
      %c0_77 = arith.constant 0 : index
      %302 = vector.load %arg9[%c0_76, %c0_77] : memref<16x128xf32, #tpu.memory_space<vmem>>, vector<16x128xf32>
      tpu.vector_store %arg9[%c0_76, %c0_77], %301 {strides = array<i32>} : memref<16x128xf32, #tpu.memory_space<vmem>>, vector<16x128xf32>,
    } else {
    }
    return
  }
  func.func @transform_0(%arg0: i32) -> (i32, i32) {
    %c0_i32 = arith.constant 0 : i32
    %c0_i32_0 = arith.constant 0 : i32
    %c0_i32_1 = arith.constant 0 : i32
    return %c0_i32, %c0_i32_0 : i32, i32
  }
  func.func @transform_1(%arg0: i32) -> (i32, i32, i32) {
    %c0_i32 = arith.constant 0 : i32
    %c0_i32_0 = arith.constant 0 : i32
    %c0_i32_1 = arith.constant 0 : i32
    return %arg0, %c0_i32, %c0_i32_0 : i32, i32, i32
  }
  func.func @transform_2(%arg0: i32) -> (i32, i32, i32) {
    %c0_i32 = arith.constant 0 : i32
    %c0_i32_0 = arith.constant 0 : i32
    %c0_i32_1 = arith.constant 0 : i32
    return %arg0, %c0_i32, %c0_i32_0 : i32, i32, i32
  }
  func.func @transform_3(%arg0: i32) -> (i32, i32, i32) {
    %c0_i32 = arith.constant 0 : i32
    %c0_i32_0 = arith.constant 0 : i32
    %c0_i32_1 = arith.constant 0 : i32
    return %arg0, %c0_i32, %c0_i32_0 : i32, i32, i32
  }
  func.func @transform_4(%arg0: i32) -> (i32, i32, i32) {
    %c0_i32 = arith.constant 0 : i32
    %c0_i32_0 = arith.constant 0 : i32
    %c0_i32_1 = arith.constant 0 : i32
    return %arg0, %c0_i32, %c0_i32_0 : i32, i32, i32
  }
  func.func @transform_5(%arg0: i32) -> (i32, i32, i32) {
    %c0_i32 = arith.constant 0 : i32
    %c0_i32_0 = arith.constant 0 : i32
    %c0_i32_1 = arith.constant 0 : i32
    return %arg0, %c0_i32, %c0_i32_0 : i32, i32, i32
  }
  func.func @transform_6(%arg0: i32) -> (i32, i32) {
    %c0_i32 = arith.constant 0 : i32
    %c0_i32_0 = arith.constant 0 : i32
    %c0_i32_1 = arith.constant 0 : i32
    return %c0_i32, %c0_i32_0 : i32, i32
  }
  func.func @transform_7(%arg0: i32) -> (i32, i32) {
    %c0_i32 = arith.constant 0 : i32
    %c0_i32_0 = arith.constant 0 : i32
    %c0_i32_1 = arith.constant 0 : i32
    return %c0_i32, %c0_i32_0 : i32, i32
  }
  func.func @transform_8(%arg0: i32) -> (i32, i32) {
    %c0_i32 = arith.constant 0 : i32
    %c0_i32_0 = arith.constant 0 : i32
    %c0_i32_1 = arith.constant 0 : i32
    return %c0_i32, %c0_i32_0 : i32, i32
  }
}

</mosaic_0001>

<bundles_post_ra>
// kernel: gru_model_forward.1
= control target key start
LH: loop header
LB: loop body
LE: loop exit
PB: predicated region body
PF: predicated region fallthrough
CT: control target
= control target key end

     0   :  { %s5057_s0 = inlined_call_operand.vmem [shape: bf16[128,128], index: 0, kind: input, shape index: {}]   ;;  %s5058_s1 = inlined_call_operand.hbm [shape: bf16[2,128,384], index: 1, kind: input, shape index: {}]   ;;  %s5059_s2 = inlined_call_operand.hbm [shape: bf16[2,128,256], index: 2, kind: input, shape index: {}]   ;;  %s5060_s3 = inlined_call_operand.hbm [shape: bf16[2,128,128], index: 3, kind: input, shape index: {}]   ;;  %s5061_s4 = inlined_call_operand.vmem [shape: f32[2,1,384], index: 4, kind: input, shape index: {}]   ;;  %s5062_s5 = inlined_call_operand.vmem [shape: f32[2,1,128], index: 5, kind: input, shape index: {}]   ;;  %s5063_s6 = inlined_call_operand.vmem [shape: bf16[128,128], index: 6, kind: input, shape index: {}]   ;;  %s5064_s7 = inlined_call_operand.vmem [shape: f32[1,128], index: 7, kind: input, shape index: {}]   ;;  %s5065_s8 = inlined_call_operand.vmem [shape: f32[16,128], index: 8, kind: output, shape index: {}]  }
   0x1   :  { %5067 = sst [smem:[#allocation12_spill]] %s5058_s1 }
   0x2   :  { %5068 = sst [smem:[#allocation13_spill]] %s5059_s2 }
   0x3   :  { %13 = vsyncpa [#allocation5], 0 }
   0x4   :  { %15 = vsyncpa [#allocation5 + $0x1], 0 }
   0x5   :  { %16 = vsyncpa [#allocation7], 0 }
   0x6   :  { %18 = vsyncpa [#allocation7 + $0x1], 0  ;;  %s4130_s27 = smov 0   ;;  %s4132_s28 = smov 0  }
   0x7   :  { %s4134_s29 = smov 0   ;;  %s4136_s30 = smov 0  }
   0x8 LB: > { %s4149_s9 = sadd.s32 4294967295, %s4067_s30   ;;  %s4152_s10 = sadd.s32 1, %s4067_s30   ;;  %s4067_s30 = sphi %s4136_s30, %s5082_s30   ;;  %s4063_s29 = sphi %s4134_s29, %s5081_s29   ;;  %s4059_s28 = sphi %s4132_s28, %s5080_s28   ;;  %s4055_s27 = sphi %s4130_s27, %s5079_s27  }
   0x9   : > { %s49_s11 = ssub.s32 %s4067_s30, %s4152_s10  ;;  %s52_s12 = sadd.s32 1, %s4063_s29 }
   0xa   : > { %p50_p0 = scmp.eq.s32.totalorder %s49_s11, 0  ;;  %p59_p1 = scmp.ne.s32.totalorder %s4063_s29, %s4059_s28 }
   0xb   : > { %p60_p2 = scmp.eq.s32.totalorder %s4067_s30, 0  ;;  %p65_p3 = scmp.ne.s32.totalorder %s4059_s28, %s4055_s27 }
   0xc   : > { %s4162_s13 = scalar_select %p50_p0, %s4063_s29, %s52_s12  }
   0xd   : > { %p61_p4 = por %p60_p2, %p59_p1  ;;  %p66_p5 = scmp.eq.s32.totalorder %s4149_s9, 0 }
   0xe   : > { %5069 = sst [smem:[#allocation11_spill]] %s4162_s13  ;;  %p3586_p6 = scmp.lt.s32.totalorder %s4067_s30, 2 }
   0xf   : > { %p4166_p7 = por %p66_p5, %p65_p3  ;;  %s4171_s15 = sand.u32 1, %s4063_s29  }
  0x10   : > { %p4173_p8 = pnand %p3586_p6, %p61_p4  ;;  %s286_s17 = sand.u32 1, %s4067_s30  }
  0x11   : > { %s5070_s14 = scalar_select %p4166_p7, 1, 0 }
  0x12   : > { %s2989_s18 = sshll.u32 %s4171_s15, 7  ;;  %s3151_s19 = sshll.u32 %s4067_s30, 11 }
  0x13   : > { %s290_s20 = scalar_lea.vmem [#allocation6], %s2989_s18  ;;  %s5072_s2 = sld [smem:[#allocation13_spill]] }
  0x14   : > { %s297_s21 = sshll.u32 %s290_s20, 4  ;;  %s4187_s25 = scalar_lea.sflag [#allocation7], %s286_s17  ;;  %s4185_s21 = int_to_ptr.vmem [resolvable:$true] %s297_s21 }
  0x15   : > { %p4193_p10 = pneg %p4173_p8 }
  0x19   : > { %s4183_s24 = scalar_lea.hbm %s5072_s2, %s3151_s19  ;;  %s3950_s18 = scalar_lea.hbm %s5072_s2, 4096 }
  0x1a   : > { %s3945_s26 = scalar_lea.hbm %s4183_s24, 2048  ;;  %p3951_p13 = scmp.lt.s32.totalorder %s4183_s24, %s5072_s2 }
  0x1b   : > { %p3946_p9 = scmp.ne.s32.totalorder %s4183_s24, %s3945_s26  ;;  %p3952_p0 = scmp.lt.s32.totalorder %s3950_s18, %s3945_s26 }
  0x1d   : > { %p3948_p11 = pnand %p4193_p10, %p3946_p9  ;;  %p3953_p1 = por %p3952_p0, %p3951_p13 }
  0x1f   : > { %p3949_p12 = pneg %p3948_p11 }
  0x21   : > { %p3954_p2 = pnand %p3953_p1, %p3949_p12 }
  0x23   : > { %3957 = shalt.err (!%p3954_p2)
}
  0x24   : > { %s3958_s17 = scalar_lea.vmem %s4185_s21, 2048  ;;  %s4069_s22 = smov [#allocation6]  }
  0x25   : > { %p3959_p3 = scmp.ne.s32.totalorder %s4185_s21, %s3958_s17  ;;  %s3963_s23 = sshll.u32 %s4069_s22, 4  ;;  %s3964_s23 = int_to_ptr.vmem [resolvable:$false] %s3963_s23 }
  0x26   : > { %s3965_s11 = scalar_lea.vmem %s3964_s23, 4096  ;;  %p3966_p6 = scmp.lt.s32.totalorder %s4185_s21, %s3964_s23 }
  0x27   : > { %p3961_p4 = pnand %p3959_p3, %p4193_p10  ;;  %p3967_p9 = scmp.lt.s32.totalorder %s3965_s11, %s3958_s17 }
  0x29   : > { %p3962_p5 = pneg %p3961_p4  ;;  %p3968_p11 = por %p3967_p9, %p3966_p6 }
  0x2b   : > { %p3969_p7 = pnand %p3968_p11, %p3962_p5 }
  0x2d   : > { %3972 = shalt.err (!%p3969_p7)
}
  0x2e   : > { %s4070_s26 = smov 128   ;;  %s4071_s12 = smov 8  }
  0x2f   : > { %3582 = dma.hbm_to_vmem [thread:$0]  (!%p4173_p8), %s4183_s24, 2048, %s4185_s21, %s4187_s25, %s4070_s26, %s4070_s26, %s4071_s12  }
  0x30   : > { %p2995_p12 = scmp.ge.s32.totalorder %s4067_s30, 1  ;;  %p339_p13 = scmp.lt.s32.totalorder %s4067_s30, 3 }
  0x31   : > { %s3566_s18 = smul.u32 192, %s4171_s15  ;;  %s5075_s1 = sld [smem:[#allocation12_spill]] }
  0x32   : > { %p4219_p0 = pnand %p2995_p12, %p339_p13  ;;  %s3567_s20 = smul.u32 3072, %s4067_s30 }
  0x33   : > { %s269_s11 = scalar_lea.vmem [#allocation4], %s3566_s18  ;;  %s266_s21 = scalar_lea.sflag [#allocation5], %s4171_s15 }
  0x34   : > { %s5074_s19 = scalar_select %p4219_p0, 1, 0 }
  0x35   : > { %s276_s2 = sshll.u32 %s269_s11, 4  ;;  %s4229_s2 = int_to_ptr.vmem [resolvable:$true] %s276_s2 }
  0x37   : > { %s4227_s23 = scalar_lea.hbm %s5075_s1, %s3567_s20  ;;  %s3978_s13 = scalar_lea.hbm %s5075_s1, 6144 }
  0x38   : > { %s3973_s24 = scalar_lea.hbm %s4227_s23, 3072  ;;  %p3979_p3 = scmp.lt.s32.totalorder %s4227_s23, %s5075_s1 }
  0x39   : > { %p3974_p7 = scmp.ne.s32.totalorder %s4227_s23, %s3973_s24  ;;  %p3980_p4 = scmp.lt.s32.totalorder %s3978_s13, %s3973_s24 }
  0x3b   : > { %p3976_p1 = pnand %p3974_p7, %p4193_p10  ;;  %p3981_p5 = por %p3980_p4, %p3979_p3 }
  0x3d   : > { %p3977_p2 = pneg %p3976_p1 }
  0x3f   : > { %p3982_p6 = pnand %p3981_p5, %p3977_p2 }
  0x41   : > { %3985 = shalt.err (!%p3982_p6)
}
  0x42   : > { %s3986_s18 = scalar_lea.vmem %s4229_s2, 3072  ;;  %s4072_s22 = smov [#allocation4]  }
  0x43   : > { %p3987_p9 = scmp.ne.s32.totalorder %s4229_s2, %s3986_s18  ;;  %s3991_s11 = sshll.u32 %s4072_s22, 4  ;;  %s3992_s11 = int_to_ptr.vmem [resolvable:$false] %s3991_s11 }
  0x44   : > { %s3993_s26 = scalar_lea.vmem %s3992_s11, 6144  ;;  %p3994_p13 = scmp.lt.s32.totalorder %s4229_s2, %s3992_s11 }
  0x45   : > { %p3989_p11 = pnand %p3987_p9, %p4193_p10  ;;  %p3995_p7 = scmp.lt.s32.totalorder %s3993_s26, %s3986_s18 }
  0x47   : > { %p3990_p12 = pneg %p3989_p11  ;;  %p3996_p1 = por %p3995_p7, %p3994_p13 }
  0x49   : > { %p3997_p0 = pnand %p3996_p1, %p3990_p12 }
  0x4b   : > { %4000 = shalt.err (!%p3997_p0)
}
  0x4c   : > { %s4073_s13 = smov 192   ;;  %s4074_s24 = smov 12  }
  0x4d   : > { %3579 = dma.hbm_to_vmem [thread:$0]  (!%p4173_p8), %s4227_s23, 3072, %s4229_s2, %s266_s21, %s4073_s13, %s4073_s13, %s4074_s24  }
  0x4e   : > { %s2992_s12 = sshll.u32 %s4171_s15, 6  ;;  %s3152_s17 = sshll.u32 %s4067_s30, 10 }
  0x4f   : > { %s4259_s18 = scalar_lea.hbm %s5060_s3, %s3152_s17  ;;  %s311_s11 = scalar_lea.vmem [#allocation8], %s2992_s12 }
  0x50   : > { %s318_s26 = sshll.u32 %s311_s11, 4  ;;  %s4001_s1 = scalar_lea.hbm %s4259_s18, 1024  ;;  %s4261_s26 = int_to_ptr.vmem [resolvable:$true] %s318_s26 }
  0x51   : > { %p4002_p0 = scmp.ne.s32.totalorder %s4259_s18, %s4001_s1  ;;  %s4006_s30 = scalar_lea.hbm %s5060_s3, 2048 }
  0x52   : > { %p4007_p4 = scmp.lt.s32.totalorder %s4259_s18, %s5060_s3  ;;  %p4008_p5 = scmp.lt.s32.totalorder %s4006_s30, %s4001_s1 }
  0x53   : > { %p4004_p2 = pnand %p4002_p0, %p4193_p10 }
  0x54   : > { %p4009_p6 = por %p4008_p5, %p4007_p4 }
  0x55   : > { %p4005_p3 = pneg %p4004_p2 }
  0x57   : > { %p4010_p9 = pnand %p4009_p6, %p4005_p3 }
  0x59   : > { %4013 = shalt.err (!%p4010_p9)
}
  0x5a   : > { %s4014_s13 = scalar_lea.vmem %s4261_s26, 1024  ;;  %s4075_s24 = smov [#allocation8]  }
  0x5b   : > { %p4015_p11 = scmp.ne.s32.totalorder %s4261_s26, %s4014_s13  ;;  %s4019_s12 = sshll.u32 %s4075_s24, 4  ;;  %s4020_s12 = int_to_ptr.vmem [resolvable:$false] %s4019_s12 }
  0x5c   : > { %s4021_s17 = scalar_lea.vmem %s4020_s12, 2048  ;;  %p4022_p7 = scmp.lt.s32.totalorder %s4261_s26, %s4020_s12 }
  0x5d   : > { %p4017_p12 = pnand %p4015_p11, %p4193_p10  ;;  %p4023_p1 = scmp.lt.s32.totalorder %s4021_s17, %s4014_s13 }
  0x5f   : > { %p4018_p13 = pneg %p4017_p12  ;;  %p4024_p0 = por %p4023_p1, %p4022_p7 }
  0x61   : > { %p4025_p2 = pnand %p4024_p0, %p4018_p13 }
  0x63   : > { %4028 = shalt.err (!%p4025_p2)
}
  0x64   : > { %s4076_s1 = smov 64   ;;  %s4077_s20 = smov 4  }
  0x65   : > { %3585 = dma.hbm_to_vmem [thread:$0]  (!%p4173_p8), %s4259_s18, 1024, %s4261_s26, %s4187_s25, %s4076_s1, %s4076_s1, %s4077_s20  }
  0x66   : > { %p5076_p10 = scmp.ne.s32.totalorder %s5074_s19, 0 }
  0x67   : > { %s345_s27 = sand.u32 (!%p5076_p10), 1, %s4059_s28   ;;  %p5077_p3 = scmp.ne.s32.totalorder (!%p5076_p10), %s5070_s14, 0 }
  0x68   : > { %343 = sbr.rel (%p5076_p10) target bundleno = 3066 (0xbfa), region = 52  ;;  %s346_s11 = scalar_lea.sflag (!%p5076_p10), [#allocation5], %s345_s27 }
  0x69   : > { %s3568_s22 = smul.u32 (!%p5076_p10), 192, %s345_s27 }
  0x6b   : > { %s4287_s2 = scalar_lea.vmem (!%p5076_p10), [#allocation4], %s3568_s22 }
  0x6d   : > { %4046 = dma.done.wait (%p5077_p3), %s346_s11, 3072  }
  0x6e   : > { %4048 = vsyncadd (%p5077_p3), %s346_s11, 4294964224  ;;  %s354_s15 = sand.u32 1, %s4149_s9   ;;  %s2996_s16 = sshll.u32 %s345_s27, 7 }
  0x6f   : > { %s355_s25 = scalar_lea.sflag [#allocation7], %s354_s15  ;;  %s4294_s18 = scalar_lea.vmem [#allocation6], %s2996_s16 }
  0x70   : > { %4050 = dma.done.wait (%p5077_p3), %s355_s25, 3072  }
  0x71   : > { %4052 = vsyncadd (%p5077_p3), %s355_s25, 4294964224  ;;  %s2997_s19 = sshll.u32 %s345_s27, 6  ;;  %p412_p8 = scmp.lt.s32.totalorder %s4149_s9, 1 }
  0x72   : > { %s4312_s1 = scalar_lea.vmem [#allocation8], %s2997_s19  ;;  %p2998_p4 = scmp.ne.s32.totalorder %s4149_s9, 0 }
  0x73   : > { %s413_s26 = scalar_select %p412_p8, %s4149_s9, 1 }
  0x74   : > { %423 = sbr.rel (%p2998_p4) target bundleno = 412 (0x19c), region = 68 }
  0x75   : > { %s3569_s30 = smul.u32 3, %s413_s26  ;;  %s4305_s13 = scalar_lea.vmem %s5062_s5, %s413_s26 }
  0x77   : > { %s4310_s17 = scalar_lea.vmem %s5061_s4, %s3569_s30 }
  0x79   : > { %v3632_v0 = vld [vmem:[%s4287_s2 + $0xac] ss:$12 sps:$4 sm:$0xff]   ;;  %v3634_v1 = vld [vmem:[%s4287_s2 + $0xa8] ss:$12 sps:$4 sm:$0xff]   ;;  %v4078_v2 = vmov 0   ;;  %v3658_v12 = vld [vmem:[%s5057_s0] sm:$0xff]   ;;  %v474_v33 = vlaneseq }
  0x7a   : > { %697 = vmatprep.mubr.bf16.mxu0 %v4078_v2  ;;  %665 = vmatprep.subr.bf16.mxu0 %v3632_v0  ;;  %v3635_v3 = vld [vmem:[%s4287_s2 + $0x94] ss:$12 sps:$4 sm:$0xff]   ;;  %v3637_v4 = vld [vmem:[%s4287_s2 + $0x90] ss:$12 sps:$4 sm:$0xff]   ;;  %v3640_v6 = vld [vmem:[%s4287_s2 + $0x78] ss:$12 sps:$4 sm:$0xff]  }
  0x7b   : > { %666 = vmatpush1.bf16.msra.mxu0 %v3634_v1  ;;  %v3638_v5 = vld [vmem:[%s4287_s2 + $0x7c] ss:$12 sps:$4 sm:$0xff]   ;;  %v3641_v7 = vld [vmem:[%s4287_s2 + $0x64] ss:$12 sps:$4 sm:$0xff]   ;;  %v3643_v9 = vld [vmem:[%s4287_s2 + $0x60] ss:$12 sps:$4 sm:$0xff]   ;;  %3338 = vmatprep.mubr.bf16.mxu1 %v3658_v12 }
  0x7c   : > { %667 = vmatprep.subr.bf16.mxu0 %v3635_v3  ;;  %v3653_v8 = vld [vmem:[%s4287_s2 + $0xb0] ss:$12 sps:$4 sm:$0xff]   ;;  %v3644_v10 = vld [vmem:[%s4287_s2 + $0x4c] ss:$12 sps:$4 sm:$0xff]   ;;  %v3646_v14 = vld [vmem:[%s4287_s2 + $0x48] ss:$12 sps:$4 sm:$0xff]  }
  0x7d   : > { %3322 = vmatprep.subr.bf16.mxu1 %v3653_v8  ;;  %v3657_v11 = vld [vmem:[%s4287_s2 + $0x98] ss:$12 sps:$4 sm:$0xff]   ;;  %v3659_v13 = vld [vmem:[%s4287_s2 + $0x80] ss:$12 sps:$4 sm:$0xff]   ;;  %v3660_v16 = vld [vmem:[%s4287_s2 + $0x68] ss:$12 sps:$4 sm:$0xff]  }
  0x7e   : > { %3323 = vmatpush3.bf16.msra.mxu1 %v3653_v8  ;;  %v3647_v15 = vld [vmem:[%s4287_s2 + $0x34] ss:$12 sps:$4 sm:$0xff]   ;;  %v3649_v17 = vld [vmem:[%s4287_s2 + $0x30] ss:$12 sps:$4 sm:$0xff]   ;;  %v3652_v20 = vld [vmem:[%s4287_s2 + $0x18] ss:$12 sps:$4 sm:$0xff]  }
  0x7f   : > { %668 = vmatpush1.bf16.msra.mxu0 %v3637_v4  ;;  %3324 = vmatprep.subr.bf16.mxu1 %v3657_v11  ;;  %v3650_v18 = vld [vmem:[%s4287_s2 + $0x1c] ss:$12 sps:$4 sm:$0xff]   ;;  %v3654_v21 = vld [vmem:[%s4287_s2 + $0x4] ss:$12 sps:$4 sm:$0xff]   ;;  %v3656_v23 = vld [vmem:[%s4287_s2] ss:$12 sps:$4 sm:$0xff]  }
  0x80   : > { %669 = vmatprep.subr.bf16.mxu0 %v3638_v5  ;;  %v3662_v19 = vld [vmem:[%s4287_s2 + $0x50] ss:$12 sps:$4 sm:$0xff]   ;;  %v3663_v22 = vld [vmem:[%s4287_s2 + $0x38] ss:$12 sps:$4 sm:$0xff]   ;;  %v3665_v24 = vld [vmem:[%s4287_s2 + $0x20] ss:$12 sps:$4 sm:$0xff]  }
  0x81   : > { %v3666_v25 = vld [vmem:[%s4287_s2 + $0x8] ss:$12 sps:$4 sm:$0xff]   ;;  %v3667_v28 = vld [vmem:[%s5057_s0 + $0x18] sm:$0xff]   ;;  %v3668_v29 = vld [vmem:[%s5057_s0 + $0x20] sm:$0xff]   ;;  %v475_v34 = vshrl.u32 %v474_v33, 7 }
  0x82   : > { %3325 = vmatpush3.bf16.msra.mxu1 %v3657_v11  ;;  %v3661_v26 = vld [vmem:[%s5057_s0 + $0x8] sm:$0xff]   ;;  %v3664_v27 = vld [vmem:[%s5057_s0 + $0x10] sm:$0xff]   ;;  %v3671_v32 = vld [vmem:[%s5057_s0 + $0x38] sm:$0xff]  }
  0x83   : > { %670 = vmatpush1.bf16.msra.mxu0 %v3640_v6  ;;  %3326 = vmatprep.subr.bf16.mxu1 %v3659_v13  ;;  %v3670_v30 = vld [vmem:[%s5057_s0 + $0x30] sm:$0xff]   ;;  %v3669_v31 = vld [vmem:[%s5057_s0 + $0x28] sm:$0xff]   ;;  %v476_v35 = vsub.s32 0, %v475_v34  ;;  %v472_v36 = vld [vmem:[%s4310_s17] sm:$0x7]  ;;  %v480_v37 = vsub.s32 1, %v475_v34 }
  0x84   : > { %671 = vmatprep.subr.bf16.mxu0 %v3641_v7  ;;  %v484_v44 = vsub.s32 2, %v475_v34 }
  0x85   : > { %v4372_v38 = vrot.slane %v472_v36, %v476_v35  ;;  %v4374_v39 = vrot.slane %v472_v36, %v480_v37 }
  0x86   : > { %3327 = vmatpush3.bf16.msra.mxu1 %v3659_v13  ;;  %v4380_v49 = vrot.slane %v472_v36, %v484_v44 }
  0x87   : > { %672 = vmatpush1.bf16.msra.mxu0 %v3643_v9  ;;  %3328 = vmatprep.subr.bf16.mxu1 %v3660_v16 }
  0x88   : > { %673 = vmatprep.subr.bf16.mxu0 %v3644_v10 }
  0x8a   : > { %3329 = vmatpush3.bf16.msra.mxu1 %v3660_v16 }
  0x8b   : > { %674 = vmatpush1.bf16.msra.mxu0 %v3646_v14  ;;  %3330 = vmatprep.subr.bf16.mxu1 %v3662_v19 }
  0x8c   : > { %675 = vmatprep.subr.bf16.mxu0 %v3647_v15 }
  0x8e   : > { %3331 = vmatpush3.bf16.msra.mxu1 %v3662_v19 }
  0x8f   : > { %676 = vmatpush1.bf16.msra.mxu0 %v3649_v17  ;;  %3332 = vmatprep.subr.bf16.mxu1 %v3663_v22 }
  0x90   : > { %677 = vmatprep.subr.bf16.mxu0 %v3650_v18 }
  0x92   : > { %3333 = vmatpush3.bf16.msra.mxu1 %v3663_v22 }
  0x93   : > { %678 = vmatpush1.bf16.msra.mxu0 %v3652_v20  ;;  %3334 = vmatprep.subr.bf16.mxu1 %v3665_v24 }
  0x94   : > { %679 = vmatprep.subr.bf16.mxu0 %v3654_v21 }
  0x96   : > { %3335 = vmatpush3.bf16.msra.mxu1 %v3665_v24 }
  0x97   : > { %680 = vmatpush1.bf16.msra.mxu0 %v3656_v23  ;;  %3336 = vmatprep.subr.bf16.mxu1 %v3666_v25 }
  0x9a   : > { %698 = vmatmul.mubr.bf16.vlgmr.msra.gmra.mxu0 %v3658_v12  ;;  %3337 = vmatpush3.bf16.msra.mxu1 %v3666_v25 }
  0x9b   : > { %707 = vmatprep.mubr.bf16.mxu0 %v4078_v2 }
  0x9d   : > { %3339 = vmatmul.mubr.bf16.vlgmr.msra.gmra.mxu1 %v3661_v26 }
  0x9e   : > { %3342 = vmatprep.mubr.bf16.mxu1 %v3664_v27 }
  0xa2   : > { %708 = vmatmul.mubr.bf16.gmra.mxu0 %v3661_v26 }
  0xa3   : > { %717 = vmatprep.mubr.bf16.mxu0 %v4078_v2 }
  0xa5   : > { %3343 = vmatmul.mubr.bf16.gmra.mxu1 %v3667_v28 }
  0xa6   : > { %3346 = vmatprep.mubr.bf16.mxu1 %v3668_v29 }
  0xaa   : > { %718 = vmatmul.mubr.bf16.gmra.mxu0 %v3664_v27 }
  0xab   : > { %727 = vmatprep.mubr.bf16.mxu0 %v4078_v2 }
  0xad   : > { %3347 = vmatmul.mubr.bf16.gmra.mxu1 %v3669_v31 }
  0xae   : > { %3350 = vmatprep.mubr.bf16.mxu1 %v3670_v30 }
  0xb2   : > { %728 = vmatmul.mubr.bf16.gmra.mxu0 %v3667_v28 }
  0xb3   : > { %737 = vmatprep.mubr.bf16.mxu0 %v4078_v2 }
  0xb5   : > { %3351 = vmatmul.mubr.bf16.gmra.mxu1 %v3671_v32 }
  0xba   : > { %738 = vmatmul.mubr.bf16.gmra.mxu0 %v3668_v29 }
  0xbb   : > { %747 = vmatprep.mubr.bf16.mxu0 %v4078_v2 }
  0xc2   : > { %748 = vmatmul.mubr.bf16.gmra.mxu0 %v3669_v31 }
  0xc3   : > { %757 = vmatprep.mubr.bf16.mxu0 %v4078_v2 }
  0xca   : > { %758 = vmatmul.mubr.bf16.gmra.mxu0 %v3670_v30 }
  0xcb   : > { %767 = vmatprep.mubr.bf16.mxu0 %v4078_v2 }
  0xd2   : > { %768 = vmatmul.mubr.bf16.gmra.mxu0 %v3671_v32 }
 0x15a   : > { %v699_v40 = vpop.f32.mrf.mxu0 }
 0x15b   : > { %v700_v41 = vadd.f32 %v699_v40, %v4372_v38 }
 0x15c   : > { %v701_v42 = vpop.f32.mrf.mxu0 }
 0x15d   : > { %875 = vst [vmem:[#allocation3 + $0xb0] sm:$0xff] %v700_v41  ;;  %v702_v43 = vadd.f32 %v701_v42, %v4374_v39  ;;  %v3340_v53 = vpop.f32.mrf.mxu1 }
 0x15e   : > { %v703_v45 = vpop.f32.mrf.mxu0  ;;  %v821_v55 = vadd.f32 %v3340_v53, %v4380_v49 }
 0x15f   : > { %876 = vst [vmem:[#allocation3 + $0xd0] sm:$0xff] %v702_v43  ;;  %v704_v46 = vadd.f32 %v703_v45, %v4372_v38  ;;  %v812_v57 = vpop.f32.mrf.mxu1 }
 0x160   : > { %v705_v47 = vpop.f32.mrf.mxu0  ;;  %883 = vst [vmem:[#allocation3 + $0x108] sm:$0xff] %v821_v55  ;;  %v813_v59 = vadd.f32 %v812_v57, %v4380_v49 }
 0x161   : > { %878 = vst [vmem:[#allocation3 + $0x48] sm:$0xff] %v704_v46  ;;  %v706_v48 = vadd.f32 %v705_v47, %v4374_v39  ;;  %v3341_v61 = vpop.f32.mrf.mxu1 }
 0x162   : > { %v709_v50 = vpop.f32.mrf.mxu0  ;;  %877 = vst [vmem:[#allocation3 + $0x10] sm:$0xff] %v813_v59  ;;  %v824_v63 = vadd.f32 %v3341_v61, %v4380_v49 }
 0x163   : > { %879 = vst [vmem:[#allocation3 + $0x160] sm:$0xff] %v706_v48  ;;  %v710_v51 = vadd.f32 %v709_v50, %v4372_v38  ;;  %v815_v1 = vpop.f32.mrf.mxu1 }
 0x164   : > { %v711_v52 = vpop.f32.mrf.mxu0  ;;  %886 = vst [vmem:[#allocation3 + $0x118] sm:$0xff] %v824_v63  ;;  %v816_v3 = vadd.f32 %v815_v1, %v4380_v49 }
 0x165   : > { %881 = vst [vmem:[#allocation3 + $0x40] sm:$0xff] %v710_v51  ;;  %v712_v54 = vadd.f32 %v711_v52, %v4374_v39  ;;  %v3344_v5 = vpop.f32.mrf.mxu1 }
 0x166   : > { %v713_v56 = vpop.f32.mrf.mxu0  ;;  %880 = vst [vmem:[#allocation3 + $0x128] sm:$0xff] %v816_v3  ;;  %v837_v7 = vadd.f32 %v3344_v5, %v4380_v49 }
 0x167   : > { %882 = vst [vmem:[#allocation3 + $0x178] sm:$0xff] %v712_v54  ;;  %v714_v58 = vadd.f32 %v713_v56, %v4372_v38  ;;  %v828_v9 = vpop.f32.mrf.mxu1 }
 0x168   : > { %v715_v60 = vpop.f32.mrf.mxu0  ;;  %895 = vst [vmem:[#allocation3 + $0xe0] sm:$0xff] %v837_v7  ;;  %v829_v11 = vadd.f32 %v828_v9, %v4380_v49 }
 0x169   : > { %884 = vst [vmem:[#allocation3 + $0x110] sm:$0xff] %v714_v58  ;;  %v716_v62 = vadd.f32 %v715_v60, %v4374_v39  ;;  %v3345_v13 = vpop.f32.mrf.mxu1 }
 0x16a   : > { %v719_v0 = vpop.f32.mrf.mxu0  ;;  %889 = vst [vmem:[#allocation3 + $0x58] sm:$0xff] %v829_v11  ;;  %v840_v15 = vadd.f32 %v3345_v13, %v4380_v49 }
 0x16b   : > { %885 = vst [vmem:[#allocation3 + $0x90] sm:$0xff] %v716_v62  ;;  %v720_v2 = vadd.f32 %v719_v0, %v4372_v38  ;;  %v831_v17 = vpop.f32.mrf.mxu1 }
 0x16c   : > { %v721_v4 = vpop.f32.mrf.mxu0  ;;  %898 = vst [vmem:[#allocation3 + $0x168] sm:$0xff] %v840_v15  ;;  %v832_v19 = vadd.f32 %v831_v17, %v4380_v49 }
 0x16d   : > { %887 = vst [vmem:[#allocation3 + $0x148] sm:$0xff] %v720_v2  ;;  %v722_v6 = vadd.f32 %v721_v4, %v4374_v39  ;;  %v3348_v21 = vpop.f32.mrf.mxu1 }
 0x16e   : > { %v723_v8 = vpop.f32.mrf.mxu0  ;;  %892 = vst [vmem:[#allocation3 + $0x130] sm:$0xff] %v832_v19  ;;  %v853_v23 = vadd.f32 %v3348_v21, %v4380_v49 }
 0x16f   : > { %888 = vst [vmem:[#allocation3 + $0x100] sm:$0xff] %v722_v6  ;;  %v724_v10 = vadd.f32 %v723_v8, %v4372_v38  ;;  %v844_v25 = vpop.f32.mrf.mxu1 }
 0x170   : > { %v725_v12 = vpop.f32.mrf.mxu0  ;;  %907 = vst [vmem:[#allocation3 + $0x60] sm:$0xff] %v853_v23  ;;  %v845_v27 = vadd.f32 %v844_v25, %v4380_v49 }
 0x171   : > { %890 = vst [vmem:[#allocation3 + $0xd8] sm:$0xff] %v724_v10  ;;  %v726_v14 = vadd.f32 %v725_v12, %v4374_v39  ;;  %v3349_v29 = vpop.f32.mrf.mxu1 }
 0x172   : > { %v729_v16 = vpop.f32.mrf.mxu0  ;;  %901 = vst [vmem:[#allocation3 + $0x20] sm:$0xff] %v845_v27  ;;  %v856_v31 = vadd.f32 %v3349_v29, %v4380_v49 }
 0x173   : > { %891 = vst [vmem:[#allocation3 + $0x80] sm:$0xff] %v726_v14  ;;  %v730_v18 = vadd.f32 %v729_v16, %v4372_v38  ;;  %v847_v33 = vpop.f32.mrf.mxu1 }
 0x174   : > { %v731_v20 = vpop.f32.mrf.mxu0  ;;  %910 = vst [vmem:[#allocation3 + $0x38] sm:$0xff] %v856_v31  ;;  %v848_v35 = vadd.f32 %v847_v33, %v4380_v49 }
 0x175   : > { %893 = vst [vmem:[#allocation3 + $0x138] sm:$0xff] %v730_v18  ;;  %v732_v22 = vadd.f32 %v731_v20, %v4374_v39  ;;  %v3352_v37 = vpop.f32.mrf.mxu1 }
 0x176   : > { %v733_v24 = vpop.f32.mrf.mxu0  ;;  %904 = vst [vmem:[#allocation3 + $0x170] sm:$0xff] %v848_v35  ;;  %v869_v41 = vadd.f32 %v3352_v37, %v4380_v49 }
 0x177   : > { %894 = vst [vmem:[#allocation3 + $0x120] sm:$0xff] %v732_v22  ;;  %v734_v26 = vadd.f32 %v733_v24, %v4372_v38  ;;  %v860_v43 = vpop.f32.mrf.mxu1 }
 0x178   : > { %v735_v28 = vpop.f32.mrf.mxu0  ;;  %919 = vst [vmem:[#allocation3 + $0x70] sm:$0xff] %v869_v41  ;;  %v861_v45 = vadd.f32 %v860_v43, %v4380_v49 }
 0x179   : > { %896 = vst [vmem:[#allocation3 + $0xa8] sm:$0xff] %v734_v26  ;;  %v736_v30 = vadd.f32 %v735_v28, %v4374_v39  ;;  %v3353_v47 = vpop.f32.mrf.mxu1 }
 0x17a   : > { %v739_v32 = vpop.f32.mrf.mxu0  ;;  %913 = vst [vmem:[#allocation3 + $0x98] sm:$0xff] %v861_v45  ;;  %v872_v50 = vadd.f32 %v3353_v47, %v4380_v49 }
 0x17b   : > { %897 = vst [vmem:[#allocation3 + $0xb8] sm:$0xff] %v736_v30  ;;  %v740_v34 = vadd.f32 %v739_v32, %v4372_v38  ;;  %v863_v52 = vpop.f32.mrf.mxu1 }
 0x17c   : > { %v741_v36 = vpop.f32.mrf.mxu0  ;;  %922 = vst [vmem:[#allocation3 + $0x150] sm:$0xff] %v872_v50  ;;  %v864_v54 = vadd.f32 %v863_v52, %v4380_v49 }
 0x17d   : > { %899 = vst [vmem:[#allocation3 + $0xe8] sm:$0xff] %v740_v34  ;;  %v742_v40 = vadd.f32 %v741_v36, %v4374_v39 }
 0x17e   : > { %v743_v42 = vpop.f32.mrf.mxu0  ;;  %916 = vst [vmem:[#allocation3 + $0x78] sm:$0xff] %v864_v54 }
 0x17f   : > { %900 = vst [vmem:[#allocation3 + $0xf8] sm:$0xff] %v742_v40  ;;  %v744_v44 = vadd.f32 %v743_v42, %v4372_v38 }
 0x180   : > { %v745_v46 = vpop.f32.mrf.mxu0 }
 0x181   : > { %902 = vst [vmem:[#allocation3 + $0x88] sm:$0xff] %v744_v44  ;;  %v746_v48 = vadd.f32 %v745_v46, %v4374_v39 }
 0x182   : > { %v749_v51 = vpop.f32.mrf.mxu0 }
 0x183   : > { %903 = vst [vmem:[#allocation3 + $0xa0] sm:$0xff] %v746_v48  ;;  %v750_v53 = vadd.f32 %v749_v51, %v4372_v38 }
 0x184   : > { %v751_v55 = vpop.f32.mrf.mxu0 }
 0x185   : > { %905 = vst [vmem:[#allocation3 + $0xf0] sm:$0xff] %v750_v53  ;;  %v752_v56 = vadd.f32 %v751_v55, %v4374_v39 }
 0x186   : > { %v753_v57 = vpop.f32.mrf.mxu0 }
 0x187   : > { %906 = vst [vmem:[#allocation3 + $0x140] sm:$0xff] %v752_v56  ;;  %v754_v58 = vadd.f32 %v753_v57, %v4372_v38 }
 0x188   : > { %v755_v59 = vpop.f32.mrf.mxu0 }
 0x189   : > { %908 = vst [vmem:[#allocation3 + $0xc8] sm:$0xff] %v754_v58  ;;  %v756_v60 = vadd.f32 %v755_v59, %v4374_v39 }
 0x18a   : > { %v759_v61 = vpop.f32.mrf.mxu0 }
 0x18b   : > { %909 = vst [vmem:[#allocation3 + $0x28] sm:$0xff] %v756_v60  ;;  %v760_v62 = vadd.f32 %v759_v61, %v4372_v38 }
 0x18c   : > { %v761_v63 = vpop.f32.mrf.mxu0 }
 0x18d   : > { %911 = vst [vmem:[#allocation3 + $0xc0] sm:$0xff] %v760_v62  ;;  %v762_v49 = vadd.f32 %v761_v63, %v4374_v39 }
 0x18e   : > { %v763_v0 = vpop.f32.mrf.mxu0 }
 0x18f   : > { %912 = vst [vmem:[#allocation3 + $0x18] sm:$0xff] %v762_v49  ;;  %v764_v1 = vadd.f32 %v763_v0, %v4372_v38 }
 0x190   : > { %v765_v2 = vpop.f32.mrf.mxu0 }
 0x191   : > { %914 = vst [vmem:[#allocation3 + $0x8] sm:$0xff] %v764_v1  ;;  %v766_v3 = vadd.f32 %v765_v2, %v4374_v39 }
 0x192   : > { %v769_v4 = vpop.f32.mrf.mxu0 }
 0x193   : > { %915 = vst [vmem:[#allocation3] sm:$0xff] %v766_v3  ;;  %v770_v5 = vadd.f32 %v769_v4, %v4372_v38 }
 0x194   : > { %v771_v6 = vpop.f32.mrf.mxu0 }
 0x195   : > { %917 = vst [vmem:[#allocation3 + $0x50] sm:$0xff] %v770_v5  ;;  %v772_v7 = vadd.f32 %v771_v6, %v4374_v39 }
 0x196   : > { %v773_v8 = vpop.f32.mrf.mxu0 }
 0x197   : > { %918 = vst [vmem:[#allocation3 + $0x68] sm:$0xff] %v772_v7  ;;  %v774_v9 = vadd.f32 %v773_v8, %v4372_v38 }
 0x198   : > { %v775_v10 = vpop.f32.mrf.mxu0 }
 0x199   : > { %920 = vst [vmem:[#allocation3 + $0x30] sm:$0xff] %v774_v9  ;;  %v776_v11 = vadd.f32 %v775_v10, %v4374_v39 }
 0x19b   : > { %921 = vst [vmem:[#allocation3 + $0x158] sm:$0xff] %v776_v11 }
 0x19c PF: > { %p3031_p5 = scmp.le.s32.totalorder %s4149_s9, 0 }
 0x19e   : > { %926 = sbr.rel (%p3031_p5) target bundleno = 710 (0x2c6), region = 72 }
 0x1a3   : > { %v3672_v12 = vld [vmem:[%s4287_s2 + $0xac] ss:$12 sps:$4 sm:$0xff]   ;;  %v3674_v38 = vld [vmem:[%s4287_s2 + $0xa8] ss:$12 sps:$4 sm:$0xff]   ;;  %v4079_v13 = vmov 0   ;;  %v3698_v22 = vld [vmem:[#allocation2] sm:$0xff]   ;;  %v977_v45 = vlaneseq }
 0x1a4   : > { %1200 = vmatprep.mubr.bf16.mxu0 %v4079_v13  ;;  %1168 = vmatprep.subr.bf16.mxu0 %v3672_v12  ;;  %v3675_v39 = vld [vmem:[%s4287_s2 + $0x94] ss:$12 sps:$4 sm:$0xff]   ;;  %v3677_v14 = vld [vmem:[%s4287_s2 + $0x90] ss:$12 sps:$4 sm:$0xff]   ;;  %v3680_v16 = vld [vmem:[%s4287_s2 + $0x78] ss:$12 sps:$4 sm:$0xff]  }
 0x1a5   : > { %1169 = vmatpush1.bf16.msra.mxu0 %v3674_v38  ;;  %v3678_v15 = vld [vmem:[%s4287_s2 + $0x7c] ss:$12 sps:$4 sm:$0xff]   ;;  %v3681_v17 = vld [vmem:[%s4287_s2 + $0x64] ss:$12 sps:$4 sm:$0xff]   ;;  %v3683_v19 = vld [vmem:[%s4287_s2 + $0x60] ss:$12 sps:$4 sm:$0xff]   ;;  %3370 = vmatprep.mubr.bf16.mxu1 %v3698_v22 }
 0x1a6   : > { %1170 = vmatprep.subr.bf16.mxu0 %v3675_v39  ;;  %v3693_v18 = vld [vmem:[%s4287_s2 + $0xb0] ss:$12 sps:$4 sm:$0xff]   ;;  %v3684_v20 = vld [vmem:[%s4287_s2 + $0x4c] ss:$12 sps:$4 sm:$0xff]   ;;  %v3686_v24 = vld [vmem:[%s4287_s2 + $0x48] ss:$12 sps:$4 sm:$0xff]  }
 0x1a7   : > { %3354 = vmatprep.subr.bf16.mxu1 %v3693_v18  ;;  %v3697_v21 = vld [vmem:[%s4287_s2 + $0x98] ss:$12 sps:$4 sm:$0xff]   ;;  %v3699_v23 = vld [vmem:[%s4287_s2 + $0x80] ss:$12 sps:$4 sm:$0xff]   ;;  %v3700_v26 = vld [vmem:[%s4287_s2 + $0x68] ss:$12 sps:$4 sm:$0xff]  }
 0x1a8   : > { %3355 = vmatpush3.bf16.msra.mxu1 %v3693_v18  ;;  %v3687_v25 = vld [vmem:[%s4287_s2 + $0x34] ss:$12 sps:$4 sm:$0xff]   ;;  %v3689_v27 = vld [vmem:[%s4287_s2 + $0x30] ss:$12 sps:$4 sm:$0xff]   ;;  %v3692_v30 = vld [vmem:[%s4287_s2 + $0x18] ss:$12 sps:$4 sm:$0xff]  }
 0x1a9   : > { %1171 = vmatpush1.bf16.msra.mxu0 %v3677_v14  ;;  %3356 = vmatprep.subr.bf16.mxu1 %v3697_v21  ;;  %v3690_v28 = vld [vmem:[%s4287_s2 + $0x1c] ss:$12 sps:$4 sm:$0xff]   ;;  %v3694_v31 = vld [vmem:[%s4287_s2 + $0x4] ss:$12 sps:$4 sm:$0xff]   ;;  %v3696_v33 = vld [vmem:[%s4287_s2] ss:$12 sps:$4 sm:$0xff]  }
 0x1aa   : > { %1172 = vmatprep.subr.bf16.mxu0 %v3678_v15  ;;  %v3702_v29 = vld [vmem:[%s4287_s2 + $0x50] ss:$12 sps:$4 sm:$0xff]   ;;  %v3703_v32 = vld [vmem:[%s4287_s2 + $0x38] ss:$12 sps:$4 sm:$0xff]   ;;  %v3705_v34 = vld [vmem:[%s4287_s2 + $0x20] ss:$12 sps:$4 sm:$0xff]  }
 0x1ab   : > { %v3706_v35 = vld [vmem:[%s4287_s2 + $0x8] ss:$12 sps:$4 sm:$0xff]   ;;  %v3707_v40 = vld [vmem:[#allocation2 + $0x18] sm:$0xff]   ;;  %v3708_v41 = vld [vmem:[#allocation2 + $0x20] sm:$0xff]   ;;  %v978_v46 = vshrl.u32 %v977_v45, 7 }
 0x1ac   : > { %3357 = vmatpush3.bf16.msra.mxu1 %v3697_v21  ;;  %v3701_v36 = vld [vmem:[#allocation2 + $0x8] sm:$0xff]   ;;  %v3704_v37 = vld [vmem:[#allocation2 + $0x10] sm:$0xff]   ;;  %v3711_v44 = vld [vmem:[#allocation2 + $0x38] sm:$0xff]  }
 0x1ad   : > { %1173 = vmatpush1.bf16.msra.mxu0 %v3680_v16  ;;  %3358 = vmatprep.subr.bf16.mxu1 %v3699_v23  ;;  %v3710_v42 = vld [vmem:[#allocation2 + $0x30] sm:$0xff]   ;;  %v3709_v43 = vld [vmem:[#allocation2 + $0x28] sm:$0xff]   ;;  %v979_v47 = vsub.s32 0, %v978_v46  ;;  %v975_v48 = vld [vmem:[%s4310_s17] sm:$0x7]  ;;  %v983_v50 = vsub.s32 1, %v978_v46 }
 0x1ae   : > { %1174 = vmatprep.subr.bf16.mxu0 %v3681_v17  ;;  %v987_v57 = vsub.s32 2, %v978_v46 }
 0x1af   : > { %v4460_v51 = vrot.slane %v975_v48, %v979_v47  ;;  %v4462_v52 = vrot.slane %v975_v48, %v983_v50 }
 0x1b0   : > { %3359 = vmatpush3.bf16.msra.mxu1 %v3699_v23  ;;  %v4468_v62 = vrot.slane %v975_v48, %v987_v57 }
 0x1b1   : > { %1175 = vmatpush1.bf16.msra.mxu0 %v3683_v19  ;;  %3360 = vmatprep.subr.bf16.mxu1 %v3700_v26 }
 0x1b2   : > { %1176 = vmatprep.subr.bf16.mxu0 %v3684_v20 }
 0x1b4   : > { %3361 = vmatpush3.bf16.msra.mxu1 %v3700_v26 }
 0x1b5   : > { %1177 = vmatpush1.bf16.msra.mxu0 %v3686_v24  ;;  %3362 = vmatprep.subr.bf16.mxu1 %v3702_v29 }
 0x1b6   : > { %1178 = vmatprep.subr.bf16.mxu0 %v3687_v25 }
 0x1b8   : > { %3363 = vmatpush3.bf16.msra.mxu1 %v3702_v29 }
 0x1b9   : > { %1179 = vmatpush1.bf16.msra.mxu0 %v3689_v27  ;;  %3364 = vmatprep.subr.bf16.mxu1 %v3703_v32 }
 0x1ba   : > { %1180 = vmatprep.subr.bf16.mxu0 %v3690_v28 }
 0x1bc   : > { %3365 = vmatpush3.bf16.msra.mxu1 %v3703_v32 }
 0x1bd   : > { %1181 = vmatpush1.bf16.msra.mxu0 %v3692_v30  ;;  %3366 = vmatprep.subr.bf16.mxu1 %v3705_v34 }
 0x1be   : > { %1182 = vmatprep.subr.bf16.mxu0 %v3694_v31 }
 0x1c0   : > { %3367 = vmatpush3.bf16.msra.mxu1 %v3705_v34 }
 0x1c1   : > { %1183 = vmatpush1.bf16.msra.mxu0 %v3696_v33  ;;  %3368 = vmatprep.subr.bf16.mxu1 %v3706_v35 }
 0x1c4   : > { %1201 = vmatmul.mubr.bf16.vlgmr.msra.gmra.mxu0 %v3698_v22  ;;  %3369 = vmatpush3.bf16.msra.mxu1 %v3706_v35 }
 0x1c5   : > { %1210 = vmatprep.mubr.bf16.mxu0 %v4079_v13 }
 0x1c7   : > { %3371 = vmatmul.mubr.bf16.vlgmr.msra.gmra.mxu1 %v3701_v36 }
 0x1c8   : > { %3374 = vmatprep.mubr.bf16.mxu1 %v3704_v37 }
 0x1cc   : > { %1211 = vmatmul.mubr.bf16.gmra.mxu0 %v3701_v36 }
 0x1cd   : > { %1220 = vmatprep.mubr.bf16.mxu0 %v4079_v13 }
 0x1cf   : > { %3375 = vmatmul.mubr.bf16.gmra.mxu1 %v3707_v40 }
 0x1d0   : > { %3378 = vmatprep.mubr.bf16.mxu1 %v3708_v41 }
 0x1d4   : > { %1221 = vmatmul.mubr.bf16.gmra.mxu0 %v3704_v37 }
 0x1d5   : > { %1230 = vmatprep.mubr.bf16.mxu0 %v4079_v13 }
 0x1d7   : > { %3379 = vmatmul.mubr.bf16.gmra.mxu1 %v3709_v43 }
 0x1d8   : > { %3382 = vmatprep.mubr.bf16.mxu1 %v3710_v42 }
 0x1dc   : > { %1231 = vmatmul.mubr.bf16.gmra.mxu0 %v3707_v40 }
 0x1dd   : > { %1240 = vmatprep.mubr.bf16.mxu0 %v4079_v13 }
 0x1df   : > { %3383 = vmatmul.mubr.bf16.gmra.mxu1 %v3711_v44 }
 0x1e4   : > { %1241 = vmatmul.mubr.bf16.gmra.mxu0 %v3708_v41 }
 0x1e5   : > { %1250 = vmatprep.mubr.bf16.mxu0 %v4079_v13 }
 0x1ec   : > { %1251 = vmatmul.mubr.bf16.gmra.mxu0 %v3709_v43 }
 0x1ed   : > { %1260 = vmatprep.mubr.bf16.mxu0 %v4079_v13 }
 0x1f4   : > { %1261 = vmatmul.mubr.bf16.gmra.mxu0 %v3710_v42 }
 0x1f5   : > { %1270 = vmatprep.mubr.bf16.mxu0 %v4079_v13 }
 0x1fc   : > { %1271 = vmatmul.mubr.bf16.gmra.mxu0 %v3711_v44 }
 0x284   : > { %v1202_v53 = vpop.f32.mrf.mxu0 }
 0x285   : > { %v1203_v54 = vadd.f32 %v1202_v53, %v4460_v51 }
 0x286   : > { %v1204_v55 = vpop.f32.mrf.mxu0 }
 0x287   : > { %1378 = vst [vmem:[#allocation3 + $0xb0] sm:$0xff] %v1203_v54  ;;  %v1205_v56 = vadd.f32 %v1204_v55, %v4462_v52  ;;  %v3372_v1 = vpop.f32.mrf.mxu1 }
 0x288   : > { %v1206_v58 = vpop.f32.mrf.mxu0  ;;  %v1324_v3 = vadd.f32 %v3372_v1, %v4468_v62 }
 0x289   : > { %1379 = vst [vmem:[#allocation3 + $0xd0] sm:$0xff] %v1205_v56  ;;  %v1207_v59 = vadd.f32 %v1206_v58, %v4460_v51  ;;  %v1315_v5 = vpop.f32.mrf.mxu1 }
 0x28a   : > { %v1208_v60 = vpop.f32.mrf.mxu0  ;;  %1386 = vst [vmem:[#allocation3 + $0x108] sm:$0xff] %v1324_v3  ;;  %v1316_v7 = vadd.f32 %v1315_v5, %v4468_v62 }
 0x28b   : > { %1381 = vst [vmem:[#allocation3 + $0x48] sm:$0xff] %v1207_v59  ;;  %v1209_v61 = vadd.f32 %v1208_v60, %v4462_v52  ;;  %v3373_v9 = vpop.f32.mrf.mxu1 }
 0x28c   : > { %v1212_v63 = vpop.f32.mrf.mxu0  ;;  %1380 = vst [vmem:[#allocation3 + $0x10] sm:$0xff] %v1316_v7  ;;  %v1327_v11 = vadd.f32 %v3373_v9, %v4468_v62 }
 0x28d   : > { %1382 = vst [vmem:[#allocation3 + $0x160] sm:$0xff] %v1209_v61  ;;  %v1213_v49 = vadd.f32 %v1212_v63, %v4460_v51  ;;  %v1318_v38 = vpop.f32.mrf.mxu1 }
 0x28e   : > { %v1214_v0 = vpop.f32.mrf.mxu0  ;;  %1389 = vst [vmem:[#allocation3 + $0x118] sm:$0xff] %v1327_v11  ;;  %v1319_v39 = vadd.f32 %v1318_v38, %v4468_v62 }
 0x28f   : > { %1384 = vst [vmem:[#allocation3 + $0x40] sm:$0xff] %v1213_v49  ;;  %v1215_v2 = vadd.f32 %v1214_v0, %v4462_v52  ;;  %v3376_v15 = vpop.f32.mrf.mxu1 }
 0x290   : > { %v1216_v4 = vpop.f32.mrf.mxu0  ;;  %1383 = vst [vmem:[#allocation3 + $0x128] sm:$0xff] %v1319_v39  ;;  %v1340_v17 = vadd.f32 %v3376_v15, %v4468_v62 }
 0x291   : > { %1385 = vst [vmem:[#allocation3 + $0x178] sm:$0xff] %v1215_v2  ;;  %v1217_v6 = vadd.f32 %v1216_v4, %v4460_v51  ;;  %v1331_v19 = vpop.f32.mrf.mxu1 }
 0x292   : > { %v1218_v8 = vpop.f32.mrf.mxu0  ;;  %1398 = vst [vmem:[#allocation3 + $0xe0] sm:$0xff] %v1340_v17  ;;  %v1332_v21 = vadd.f32 %v1331_v19, %v4468_v62 }
 0x293   : > { %1387 = vst [vmem:[#allocation3 + $0x110] sm:$0xff] %v1217_v6  ;;  %v1219_v10 = vadd.f32 %v1218_v8, %v4462_v52  ;;  %v3377_v23 = vpop.f32.mrf.mxu1 }
 0x294   : > { %v1222_v12 = vpop.f32.mrf.mxu0  ;;  %1392 = vst [vmem:[#allocation3 + $0x58] sm:$0xff] %v1332_v21  ;;  %v1343_v25 = vadd.f32 %v3377_v23, %v4468_v62 }
 0x295   : > { %1388 = vst [vmem:[#allocation3 + $0x90] sm:$0xff] %v1219_v10  ;;  %v1223_v13 = vadd.f32 %v1222_v12, %v4460_v51  ;;  %v1334_v27 = vpop.f32.mrf.mxu1 }
 0x296   : > { %v1224_v14 = vpop.f32.mrf.mxu0  ;;  %1401 = vst [vmem:[#allocation3 + $0x168] sm:$0xff] %v1343_v25  ;;  %v1335_v29 = vadd.f32 %v1334_v27, %v4468_v62 }
 0x297   : > { %1390 = vst [vmem:[#allocation3 + $0x148] sm:$0xff] %v1223_v13  ;;  %v1225_v16 = vadd.f32 %v1224_v14, %v4462_v52  ;;  %v3380_v31 = vpop.f32.mrf.mxu1 }
 0x298   : > { %v1226_v18 = vpop.f32.mrf.mxu0  ;;  %1395 = vst [vmem:[#allocation3 + $0x130] sm:$0xff] %v1335_v29  ;;  %v1356_v33 = vadd.f32 %v3380_v31, %v4468_v62 }
 0x299   : > { %1391 = vst [vmem:[#allocation3 + $0x100] sm:$0xff] %v1225_v16  ;;  %v1227_v20 = vadd.f32 %v1226_v18, %v4460_v51  ;;  %v1347_v35 = vpop.f32.mrf.mxu1 }
 0x29a   : > { %v1228_v22 = vpop.f32.mrf.mxu0  ;;  %1410 = vst [vmem:[#allocation3 + $0x60] sm:$0xff] %v1356_v33  ;;  %v1348_v37 = vadd.f32 %v1347_v35, %v4468_v62 }
 0x29b   : > { %1393 = vst [vmem:[#allocation3 + $0xd8] sm:$0xff] %v1227_v20  ;;  %v1229_v24 = vadd.f32 %v1228_v22, %v4462_v52  ;;  %v3381_v41 = vpop.f32.mrf.mxu1 }
 0x29c   : > { %v1232_v26 = vpop.f32.mrf.mxu0  ;;  %1404 = vst [vmem:[#allocation3 + $0x20] sm:$0xff] %v1348_v37  ;;  %v1359_v43 = vadd.f32 %v3381_v41, %v4468_v62 }
 0x29d   : > { %1394 = vst [vmem:[#allocation3 + $0x80] sm:$0xff] %v1229_v24  ;;  %v1233_v28 = vadd.f32 %v1232_v26, %v4460_v51  ;;  %v1350_v45 = vpop.f32.mrf.mxu1 }
 0x29e   : > { %v1234_v30 = vpop.f32.mrf.mxu0  ;;  %1413 = vst [vmem:[#allocation3 + $0x38] sm:$0xff] %v1359_v43  ;;  %v1351_v47 = vadd.f32 %v1350_v45, %v4468_v62 }
 0x29f   : > { %1396 = vst [vmem:[#allocation3 + $0x138] sm:$0xff] %v1233_v28  ;;  %v1235_v32 = vadd.f32 %v1234_v30, %v4462_v52  ;;  %v3384_v50 = vpop.f32.mrf.mxu1 }
 0x2a0   : > { %v1236_v34 = vpop.f32.mrf.mxu0  ;;  %1407 = vst [vmem:[#allocation3 + $0x170] sm:$0xff] %v1351_v47  ;;  %v1372_v54 = vadd.f32 %v3384_v50, %v4468_v62 }
 0x2a1   : > { %1397 = vst [vmem:[#allocation3 + $0x120] sm:$0xff] %v1235_v32  ;;  %v1237_v36 = vadd.f32 %v1236_v34, %v4460_v51  ;;  %v1363_v56 = vpop.f32.mrf.mxu1 }
 0x2a2   : > { %v1238_v40 = vpop.f32.mrf.mxu0  ;;  %1422 = vst [vmem:[#allocation3 + $0x70] sm:$0xff] %v1372_v54  ;;  %v1364_v58 = vadd.f32 %v1363_v56, %v4468_v62 }
 0x2a3   : > { %1399 = vst [vmem:[#allocation3 + $0xa8] sm:$0xff] %v1237_v36  ;;  %v1239_v42 = vadd.f32 %v1238_v40, %v4462_v52  ;;  %v3385_v60 = vpop.f32.mrf.mxu1 }
 0x2a4   : > { %v1242_v44 = vpop.f32.mrf.mxu0  ;;  %1416 = vst [vmem:[#allocation3 + $0x98] sm:$0xff] %v1364_v58  ;;  %v1375_v63 = vadd.f32 %v3385_v60, %v4468_v62 }
 0x2a5   : > { %1400 = vst [vmem:[#allocation3 + $0xb8] sm:$0xff] %v1239_v42  ;;  %v1243_v46 = vadd.f32 %v1242_v44, %v4460_v51  ;;  %v1366_v0 = vpop.f32.mrf.mxu1 }
 0x2a6   : > { %v1244_v48 = vpop.f32.mrf.mxu0  ;;  %1425 = vst [vmem:[#allocation3 + $0x150] sm:$0xff] %v1375_v63  ;;  %v1367_v2 = vadd.f32 %v1366_v0, %v4468_v62 }
 0x2a7   : > { %1402 = vst [vmem:[#allocation3 + $0xe8] sm:$0xff] %v1243_v46  ;;  %v1245_v53 = vadd.f32 %v1244_v48, %v4462_v52 }
 0x2a8   : > { %v1246_v55 = vpop.f32.mrf.mxu0  ;;  %1419 = vst [vmem:[#allocation3 + $0x78] sm:$0xff] %v1367_v2 }
 0x2a9   : > { %1403 = vst [vmem:[#allocation3 + $0xf8] sm:$0xff] %v1245_v53  ;;  %v1247_v57 = vadd.f32 %v1246_v55, %v4460_v51 }
 0x2aa   : > { %v1248_v59 = vpop.f32.mrf.mxu0 }
 0x2ab   : > { %1405 = vst [vmem:[#allocation3 + $0x88] sm:$0xff] %v1247_v57  ;;  %v1249_v61 = vadd.f32 %v1248_v59, %v4462_v52 }
 0x2ac   : > { %v1252_v49 = vpop.f32.mrf.mxu0 }
 0x2ad   : > { %1406 = vst [vmem:[#allocation3 + $0xa0] sm:$0xff] %v1249_v61  ;;  %v1253_v1 = vadd.f32 %v1252_v49, %v4460_v51 }
 0x2ae   : > { %v1254_v3 = vpop.f32.mrf.mxu0 }
 0x2af   : > { %1408 = vst [vmem:[#allocation3 + $0xf0] sm:$0xff] %v1253_v1  ;;  %v1255_v4 = vadd.f32 %v1254_v3, %v4462_v52 }
 0x2b0   : > { %v1256_v5 = vpop.f32.mrf.mxu0 }
 0x2b1   : > { %1409 = vst [vmem:[#allocation3 + $0x140] sm:$0xff] %v1255_v4  ;;  %v1257_v6 = vadd.f32 %v1256_v5, %v4460_v51 }
 0x2b2   : > { %v1258_v7 = vpop.f32.mrf.mxu0 }
 0x2b3   : > { %1411 = vst [vmem:[#allocation3 + $0xc8] sm:$0xff] %v1257_v6  ;;  %v1259_v8 = vadd.f32 %v1258_v7, %v4462_v52 }
 0x2b4   : > { %v1262_v9 = vpop.f32.mrf.mxu0 }
 0x2b5   : > { %1412 = vst [vmem:[#allocation3 + $0x28] sm:$0xff] %v1259_v8  ;;  %v1263_v10 = vadd.f32 %v1262_v9, %v4460_v51 }
 0x2b6   : > { %v1264_v11 = vpop.f32.mrf.mxu0 }
 0x2b7   : > { %1414 = vst [vmem:[#allocation3 + $0xc0] sm:$0xff] %v1263_v10  ;;  %v1265_v62 = vadd.f32 %v1264_v11, %v4462_v52 }
 0x2b8   : > { %v1266_v12 = vpop.f32.mrf.mxu0 }
 0x2b9   : > { %1415 = vst [vmem:[#allocation3 + $0x18] sm:$0xff] %v1265_v62  ;;  %v1267_v38 = vadd.f32 %v1266_v12, %v4460_v51 }
 0x2ba   : > { %v1268_v13 = vpop.f32.mrf.mxu0 }
 0x2bb   : > { %1417 = vst [vmem:[#allocation3 + $0x8] sm:$0xff] %v1267_v38  ;;  %v1269_v39 = vadd.f32 %v1268_v13, %v4462_v52 }
 0x2bc   : > { %v1272_v14 = vpop.f32.mrf.mxu0 }
 0x2bd   : > { %1418 = vst [vmem:[#allocation3] sm:$0xff] %v1269_v39  ;;  %v1273_v15 = vadd.f32 %v1272_v14, %v4460_v51 }
 0x2be   : > { %v1274_v16 = vpop.f32.mrf.mxu0 }
 0x2bf   : > { %1420 = vst [vmem:[#allocation3 + $0x50] sm:$0xff] %v1273_v15  ;;  %v1275_v17 = vadd.f32 %v1274_v16, %v4462_v52 }
 0x2c0   : > { %v1276_v18 = vpop.f32.mrf.mxu0 }
 0x2c1   : > { %1421 = vst [vmem:[#allocation3 + $0x68] sm:$0xff] %v1275_v17  ;;  %v1277_v19 = vadd.f32 %v1276_v18, %v4460_v51 }
 0x2c2   : > { %v1278_v20 = vpop.f32.mrf.mxu0 }
 0x2c3   : > { %1423 = vst [vmem:[#allocation3 + $0x30] sm:$0xff] %v1277_v19  ;;  %v1279_v21 = vadd.f32 %v1278_v20, %v4462_v52 }
 0x2c5   : > { %1424 = vst [vmem:[#allocation3 + $0x158] sm:$0xff] %v1279_v21 }
 0x2c6 PF: > { %v4515_v22 = vld [vmem:[%s4294_s18 + $0x74] ss:$8 sps:$4 sm:$0xff]   ;;  %v4518_v23 = vld [vmem:[%s4294_s18 + $0x70] ss:$8 sps:$4 sm:$0xff]   ;;  %v4080_v24 = vmov 0.0   ;;  %v4081_v51 = vmov 0  }
 0x2c7   : > { %3386 = vmatprep.subr.bf16.mxu1 %v4080_v24  ;;  %1587 = vmatprep.mubr.bf16.mxu0 %v4081_v51  ;;  %v4524_v52 = vld [vmem:[%s4294_s18 + $0x64] ss:$8 sps:$4 sm:$0xff]   ;;  %vm4082_vm0 = vmmov 0   ;;  %v4530_v25 = vld [vmem:[%s4294_s18 + $0x60] ss:$8 sps:$4 sm:$0xff]   ;;  %v4545_v29 = vld [vmem:[%s4312_s1 + $0x38] sm:$0xff]  }
 0x2c8   : > { %1555 = vmatprep.subr.bf16.mxu0 %v4515_v22  ;;  %3402 = vmatprep.mubr.msk.bf16.mxu1 %vm4082_vm0, %v4080_v24  ;;  %v4534_v26 = vld [vmem:[%s4294_s18 + $0x54] ss:$8 sps:$4 sm:$0xff]   ;;  %v4538_v27 = vld [vmem:[%s4294_s18 + $0x50] ss:$8 sps:$4 sm:$0xff]   ;;  %v4542_v28 = vld [vmem:[%s4294_s18 + $0x44] ss:$8 sps:$4 sm:$0xff]  }
 0x2c9   : > { %1556 = vmatpush1.bf16.msra.mxu0 %v4518_v23  ;;  %v4549_v30 = vld [vmem:[%s4294_s18 + $0x40] ss:$8 sps:$4 sm:$0xff]   ;;  %v4552_v31 = vld [vmem:[%s4294_s18 + $0x34] ss:$8 sps:$4 sm:$0xff]   ;;  %3387 = vmatpush3.bf16.msra.mxu1 %v4545_v29  ;;  %v4561_v33 = vld [vmem:[%s4294_s18 + $0x30] ss:$8 sps:$4 sm:$0xff]  }
 0x2ca   : > { %1557 = vmatprep.subr.bf16.mxu0 %v4524_v52  ;;  %v4557_v32 = vld [vmem:[%s4312_s1 + $0x30] sm:$0xff]   ;;  %3388 = vmatprep.subr.bf16.mxu1 %v4080_v24  ;;  %v4565_v34 = vld [vmem:[%s4294_s18 + $0x24] ss:$8 sps:$4 sm:$0xff]   ;;  %v4575_v36 = vld [vmem:[%s4294_s18 + $0x20] ss:$8 sps:$4 sm:$0xff]   ;;  %p3137_p6 = scmp.ne.s32.totalorder %s4149_s9, 1 }
 0x2cb   : > { %v4570_v35 = vld [vmem:[%s4312_s1 + $0x28] sm:$0xff]   ;;  %v4579_v37 = vld [vmem:[%s4294_s18 + $0x14] ss:$8 sps:$4 sm:$0xff]   ;;  %v4583_v40 = vld [vmem:[%s4312_s1 + $0x20] sm:$0xff]  }
 0x2cc   : > { %v4588_v41 = vld [vmem:[%s4294_s18 + $0x10] ss:$8 sps:$4 sm:$0xff]   ;;  %v4592_v42 = vld [vmem:[%s4294_s18 + $0x4] ss:$8 sps:$4 sm:$0xff]   ;;  %v4601_v44 = vld [vmem:[%s4294_s18] ss:$8 sps:$4 sm:$0xff]  }
 0x2cd   : > { %1558 = vmatpush1.bf16.msra.mxu0 %v4530_v25  ;;  %3389 = vmatpush3.bf16.msra.mxu1 %v4557_v32  ;;  %v4596_v43 = vld [vmem:[%s4312_s1 + $0x18] sm:$0xff]   ;;  %v4606_v45 = vld [vmem:[%s4312_s1 + $0x10] sm:$0xff]   ;;  %v4612_v46 = vld [vmem:[%s4312_s1 + $0x8] sm:$0xff]  }
 0x2ce   : > { %1559 = vmatprep.subr.bf16.mxu0 %v4534_v26  ;;  %3390 = vmatprep.subr.bf16.mxu1 %v4080_v24  ;;  %v4621_v47 = vld [vmem:[%s4312_s1] sm:$0xff]   ;;  %v1469_v48 = vld [vmem:[#allocation3 + $0xb0] sm:$0xff]  ;;  %v1472_v55 = vld [vmem:[#allocation3 + $0x48] sm:$0xff] }
 0x2cf   : > { %v1470_v61 = vld [vmem:[#allocation3 + $0xd0] sm:$0xff]  ;;  %v1473_v49 = vld [vmem:[#allocation3 + $0x160] sm:$0xff]  ;;  %v1474_v19 = vld [vmem:[#allocation3 + $0x128] sm:$0xff] }
 0x2d0   : > { %v4661_v11 = vld [vmem:[%s4305_s13] ss:$0 sm:$0xff]  ;;  %v1471_v38 = vld [vmem:[#allocation3 + $0x10] sm:$0xff] }
 0x2d1   : > { %1560 = vmatpush1.bf16.msra.mxu0 %v4538_v27  ;;  %3391 = vmatpush3.bf16.msra.mxu1 %v4570_v35 }
 0x2d2   : > { %1561 = vmatprep.subr.bf16.mxu0 %v4542_v28  ;;  %3392 = vmatprep.subr.bf16.mxu1 %v4080_v24 }
 0x2d5   : > { %1562 = vmatpush1.bf16.msra.mxu0 %v4549_v30  ;;  %3393 = vmatpush3.bf16.msra.mxu1 %v4583_v40 }
 0x2d6   : > { %1563 = vmatprep.subr.bf16.mxu0 %v4552_v31  ;;  %3394 = vmatprep.subr.bf16.mxu1 %v4080_v24 }
 0x2d9   : > { %1564 = vmatpush1.bf16.msra.mxu0 %v4561_v33  ;;  %3395 = vmatpush3.bf16.msra.mxu1 %v4596_v43 }
 0x2da   : > { %1565 = vmatprep.subr.bf16.mxu0 %v4565_v34  ;;  %3396 = vmatprep.subr.bf16.mxu1 %v4080_v24 }
 0x2dd   : > { %1566 = vmatpush1.bf16.msra.mxu0 %v4575_v36  ;;  %3397 = vmatpush3.bf16.msra.mxu1 %v4606_v45 }
 0x2de   : > { %1567 = vmatprep.subr.bf16.mxu0 %v4579_v37  ;;  %3398 = vmatprep.subr.bf16.mxu1 %v4080_v24 }
 0x2e1   : > { %1568 = vmatpush1.bf16.msra.mxu0 %v4588_v41  ;;  %3399 = vmatpush3.bf16.msra.mxu1 %v4612_v46 }
 0x2e2   : > { %1569 = vmatprep.subr.bf16.mxu0 %v4592_v42  ;;  %3400 = vmatprep.subr.bf16.mxu1 %v4080_v24 }
 0x2e5   : > { %1570 = vmatpush1.bf16.msra.mxu0 %v4601_v44  ;;  %3401 = vmatpush3.bf16.msra.mxu1 %v4621_v47 }
 0x2e6   : > { %1746 = vmatprep.subr.bf16.mxu0 %v4515_v22  ;;  %3406 = vmatprep.subr.bf16.mxu1 %v4080_v24 }
 0x2e8   : > { %1588 = vmatmul.mubr.bf16.vlgmr.msra.gmra.mxu0 %v4081_v51  ;;  %3403 = vmatmul.mubr.bf16.vlgmr.msra.gmra.mxu1 %v4081_v51 }
 0x2e9   : > { %1747 = vmatpush1.bf16.msra.mxu0 %v4518_v23  ;;  %1778 = vmatprep.mubr.bf16.mxu0 %v4081_v51 }
 0x2ea   : > { %1748 = vmatprep.subr.bf16.mxu0 %v4524_v52  ;;  %3407 = vmatpush3.bf16.msra.mxu1 %v4545_v29 }
 0x2eb   : > { %3408 = vmatprep.subr.bf16.mxu1 %v4080_v24  ;;  %3422 = vmatprep.mubr.msk.bf16.mxu1 %vm4082_vm0, %v4080_v24 }
 0x2ed   : > { %1749 = vmatpush1.bf16.msra.mxu0 %v4530_v25 }
 0x2ee   : > { %1750 = vmatprep.subr.bf16.mxu0 %v4534_v26  ;;  %3409 = vmatpush3.bf16.msra.mxu1 %v4557_v32 }
 0x2ef   : > { %3410 = vmatprep.subr.bf16.mxu1 %v4080_v24 }
 0x2f1   : > { %1751 = vmatpush1.bf16.msra.mxu0 %v4538_v27 }
 0x2f2   : > { %1752 = vmatprep.subr.bf16.mxu0 %v4542_v28  ;;  %3411 = vmatpush3.bf16.msra.mxu1 %v4570_v35 }
 0x2f3   : > { %3412 = vmatprep.subr.bf16.mxu1 %v4080_v24 }
 0x2f5   : > { %1753 = vmatpush1.bf16.msra.mxu0 %v4549_v30 }
 0x2f6   : > { %1754 = vmatprep.subr.bf16.mxu0 %v4552_v31  ;;  %3413 = vmatpush3.bf16.msra.mxu1 %v4583_v40 }
 0x2f7   : > { %3414 = vmatprep.subr.bf16.mxu1 %v4080_v24 }
 0x2f9   : > { %1755 = vmatpush1.bf16.msra.mxu0 %v4561_v33 }
 0x2fa   : > { %1756 = vmatprep.subr.bf16.mxu0 %v4565_v34  ;;  %3415 = vmatpush3.bf16.msra.mxu1 %v4596_v43 }
 0x2fb   : > { %3416 = vmatprep.subr.bf16.mxu1 %v4080_v24 }
 0x2fd   : > { %1757 = vmatpush1.bf16.msra.mxu0 %v4575_v36 }
 0x2fe   : > { %1758 = vmatprep.subr.bf16.mxu0 %v4579_v37  ;;  %3417 = vmatpush3.bf16.msra.mxu1 %v4606_v45 }
 0x2ff   : > { %3418 = vmatprep.subr.bf16.mxu1 %v4080_v24 }
 0x301   : > { %1759 = vmatpush1.bf16.msra.mxu0 %v4588_v41 }
 0x302   : > { %1760 = vmatprep.subr.bf16.mxu0 %v4592_v42  ;;  %3419 = vmatpush3.bf16.msra.mxu1 %v4612_v46 }
 0x303   : > { %3420 = vmatprep.subr.bf16.mxu1 %v4080_v24 }
 0x305   : > { %1761 = vmatpush1.bf16.msra.mxu0 %v4601_v44 }
 0x306   : > { %1890 = vmatprep.subr.bf16.mxu0 %v4515_v22  ;;  %3421 = vmatpush3.bf16.msra.mxu1 %v4621_v47 }
 0x307   : > { %3426 = vmatprep.subr.bf16.mxu1 %v4080_v24 }
 0x3a8   : > { %v1589_v50 = vpop.f32.mrf.mxu0  ;;  %v1708_v60 = vpop.f32.mrf.mxu1 }
 0x3a9   : > { %v1598_v53 = vadd.f32 %v1589_v50, %v1469_v48  ;;  %v1709_v62 = vadd.f32 %v4661_v11, %v1708_v60 }
 0x3aa   : > { %v1591_v54 = vpop.f32.mrf.mxu0  ;;  %v3404_v63 = vpop.f32.mrf.mxu1 }
 0x3ab   : > { %v3081_v56 = vmul.f32 -1.442695, %v1598_v53  ;;  %v1612_v2 = vadd.f32 %v1591_v54, %v1470_v61 }
 0x3ac   : > { %v1593_v57 = vpop.f32.mrf.mxu0  ;;  %v1711_v1 = vpop.f32.mrf.mxu1 }
 0x3ad   : > { %3744 = vpow2.f32 %v3081_v56  ;;  %v1599_v58 = vadd.f32 %v1593_v57, %v1472_v55  ;;  %v3083_v6 = vmul.f32 -1.442695, %v1612_v2  ;;  %v1712_v16 = vadd.f32 %v4661_v11, %v1711_v1 }
 0x3ae   : > { %v1595_v0 = vpop.f32.mrf.mxu0  ;;  %v3405_v3 = vpop.f32.mrf.mxu1 }
 0x3af   : > { %v3082_v59 = vmul.f32 -1.442695, %v1599_v58  ;;  %v1613_v4 = vadd.f32 %v1595_v0, %v1473_v49  ;;  %v1740_v49 = vld [vmem:[#allocation3 + $0x40] sm:$0xff] }
 0x3b1   : > { %3746 = vpow2.f32 %v3082_v59  ;;  %v3084_v8 = vmul.f32 -1.442695, %v1613_v4 }
 0x3ba   : > { %v3745_v5 = vpop.eup %3744 }
 0x3bb   : > { %v1606_v7 = vadd.f32 1.0, %v3745_v5  ;;  %v1743_v5 = vld [vmem:[#allocation3 + $0x110] sm:$0xff] }
 0x3bd   : > { %3748 = vrcp.f32 %v1606_v7 }
 0x3be   : > { %v3747_v9 = vpop.eup %3746  ;;  %3750 = vpow2.f32 %v3083_v6 }
 0x3bf   : > { %v1607_v10 = vadd.f32 1.0, %v3747_v9  ;;  %3752 = vpow2.f32 %v3084_v8 }
 0x3c1   : > { %3754 = vrcp.f32 %v1607_v10 }
 0x3ca   : > { %v3749_v12 = vpop.eup %3748 }
 0x3cb   : > { %v3751_v13 = vpop.eup %3750  ;;  %v1715_v39 = vmul.f32 %v3749_v12, %v1709_v62  ;;  %v1741_v12 = vld [vmem:[#allocation3 + $0x178] sm:$0xff] }
 0x3cc   : > { %v3753_v14 = vpop.eup %3752  ;;  %v1620_v18 = vadd.f32 1.0, %v3751_v13 }
 0x3cd   : > { %v1717_v15 = vadd.f32 %v1715_v39, %v1471_v38  ;;  %v1621_v21 = vadd.f32 1.0, %v3753_v14  ;;  %v1744_v38 = vld [vmem:[#allocation3 + $0x90] sm:$0xff] }
 0x3ce   : > { %v3755_v17 = vpop.eup %3754 }
 0x3cf   : > { %3756 = vtanh.f32 %v1717_v15  ;;  %v1716_v20 = vmul.f32 %v3755_v17, %v1712_v16 }
 0x3d0   : > { %3758 = vrcp.f32 %v1620_v18 }
 0x3d1   : > { %v1718_v48 = vadd.f32 %v1716_v20, %v1474_v19 }
 0x3d3   : > { %3760 = vtanh.f32 %v1718_v48 }
 0x3d4   : > { %3762 = vrcp.f32 %v1621_v21 }
 0x3dc   : > { %v3757_v50 = vpop.eup %3756 }
 0x3dd   : > { %v1721_v53 = vsub.f32 0.0, %v3757_v50  ;;  %v3759_v54 = vpop.eup %3758 }
 0x3df   : > { %v1723_v57 = vmul.f32 %v3759_v54, %v1721_v53 }
 0x3e0   : > { %v3761_v55 = vpop.eup %3760 }
 0x3e1   : > { %v1722_v56 = vsub.f32 0.0, %v3761_v55  ;;  %v3763_v58 = vpop.eup %3762  ;;  %v4665_v60 = vadd.f32 %v3757_v50, %v1723_v57  ;;  %v1742_v50 = vld [vmem:[#allocation3 + $0x108] sm:$0xff] }
 0x3e3   : > { %v1724_v59 = vmul.f32 %v3763_v58, %v1722_v56 }
 0x3e5   : > { %v4667_v61 = vadd.f32 %v3761_v55, %v1724_v59 }
 0x3e7   : > { %v1727_v63 = vpack.c.bf16 %v4667_v61, %v4665_v60 }
 0x3e9   : > { %3173 = vst [vmem:[#allocation2] sm:$0xff] %v1727_v63   ;;  %1779 = vmatmul.mubr.bf16.vlgmr.msra.gmra.mxu0 %v1727_v63  ;;  %3423 = vmatmul.mubr.bf16.vlgmr.msra.gmra.mxu1 %v1727_v63  ;;  %v1745_v63 = vld [vmem:[#allocation3 + $0x118] sm:$0xff] }
 0x3ea   : > { %1891 = vmatpush1.bf16.msra.mxu0 %v4518_v23  ;;  %3427 = vmatpush3.bf16.msra.mxu1 %v4545_v29 }
 0x3eb   : > { %1892 = vmatprep.subr.bf16.mxu0 %v4524_v52  ;;  %3428 = vmatprep.subr.bf16.mxu1 %v4080_v24 }
 0x3ec   : > { %1922 = vmatprep.mubr.bf16.mxu0 %v4081_v51  ;;  %3442 = vmatprep.mubr.msk.bf16.mxu1 %vm4082_vm0, %v4080_v24 }
 0x3ee   : > { %1893 = vmatpush1.bf16.msra.mxu0 %v4530_v25  ;;  %3429 = vmatpush3.bf16.msra.mxu1 %v4557_v32 }
 0x3ef   : > { %1894 = vmatprep.subr.bf16.mxu0 %v4534_v26  ;;  %3430 = vmatprep.subr.bf16.mxu1 %v4080_v24 }
 0x3f2   : > { %1895 = vmatpush1.bf16.msra.mxu0 %v4538_v27  ;;  %3431 = vmatpush3.bf16.msra.mxu1 %v4570_v35 }
 0x3f3   : > { %1896 = vmatprep.subr.bf16.mxu0 %v4542_v28  ;;  %3432 = vmatprep.subr.bf16.mxu1 %v4080_v24 }
 0x3f6   : > { %1897 = vmatpush1.bf16.msra.mxu0 %v4549_v30  ;;  %3433 = vmatpush3.bf16.msra.mxu1 %v4583_v40 }
 0x3f7   : > { %1898 = vmatprep.subr.bf16.mxu0 %v4552_v31  ;;  %3434 = vmatprep.subr.bf16.mxu1 %v4080_v24 }
 0x3fa   : > { %1899 = vmatpush1.bf16.msra.mxu0 %v4561_v33  ;;  %3435 = vmatpush3.bf16.msra.mxu1 %v4596_v43 }
 0x3fb   : > { %1900 = vmatprep.subr.bf16.mxu0 %v4565_v34  ;;  %3436 = vmatprep.subr.bf16.mxu1 %v4080_v24 }
 0x3fe   : > { %1901 = vmatpush1.bf16.msra.mxu0 %v4575_v36  ;;  %3437 = vmatpush3.bf16.msra.mxu1 %v4606_v45 }
 0x3ff   : > { %1902 = vmatprep.subr.bf16.mxu0 %v4579_v37  ;;  %3438 = vmatprep.subr.bf16.mxu1 %v4080_v24 }
 0x402   : > { %1903 = vmatpush1.bf16.msra.mxu0 %v4588_v41  ;;  %3439 = vmatpush3.bf16.msra.mxu1 %v4612_v46 }
 0x403   : > { %1904 = vmatprep.subr.bf16.mxu0 %v4592_v42  ;;  %3440 = vmatprep.subr.bf16.mxu1 %v4080_v24 }
 0x406   : > { %1905 = vmatpush1.bf16.msra.mxu0 %v4601_v44  ;;  %3441 = vmatpush3.bf16.msra.mxu1 %v4621_v47 }
 0x407   : > { %2034 = vmatprep.subr.bf16.mxu0 %v4515_v22  ;;  %3446 = vmatprep.subr.bf16.mxu1 %v4080_v24 }
 0x4a9   : > { %v1780_v0 = vpop.f32.mrf.mxu0  ;;  %v1851_v1 = vpop.f32.mrf.mxu1 }
 0x4aa   : > { %v1789_v2 = vadd.f32 %v1780_v0, %v1740_v49  ;;  %v1852_v21 = vadd.f32 %v4661_v11, %v1851_v1 }
 0x4ab   : > { %v1782_v3 = vpop.f32.mrf.mxu0  ;;  %v3424_v4 = vpop.f32.mrf.mxu1 }
 0x4ac   : > { %v3095_v6 = vmul.f32 -1.442695, %v1789_v2  ;;  %v1803_v39 = vadd.f32 %v1782_v3, %v1741_v12 }
 0x4ad   : > { %v1784_v7 = vpop.f32.mrf.mxu0  ;;  %v1854_v8 = vpop.f32.mrf.mxu1 }
 0x4ae   : > { %3764 = vpow2.f32 %v3095_v6  ;;  %v1790_v9 = vadd.f32 %v1784_v7, %v1743_v5  ;;  %v3097_v16 = vmul.f32 -1.442695, %v1803_v39  ;;  %v1855_v57 = vadd.f32 %v4661_v11, %v1854_v8 }
 0x4af   : > { %v3425_v10 = vpop.f32.mrf.mxu1  ;;  %v1786_v13 = vpop.f32.mrf.mxu0 }
 0x4b0   : > { %v3096_v62 = vmul.f32 -1.442695, %v1790_v9  ;;  %v1804_v14 = vadd.f32 %v1786_v13, %v1744_v38 }
 0x4b2   : > { %3766 = vpow2.f32 %v3096_v62  ;;  %v3098_v18 = vmul.f32 -1.442695, %v1804_v14 }
 0x4bb   : > { %v3765_v15 = vpop.eup %3764 }
 0x4bc   : > { %v1797_v17 = vadd.f32 1.0, %v3765_v15  ;;  %v1887_v15 = vld [vmem:[#allocation3 + $0xd8] sm:$0xff] }
 0x4be   : > { %3768 = vrcp.f32 %v1797_v17 }
 0x4bf   : > { %v3767_v19 = vpop.eup %3766  ;;  %3770 = vpow2.f32 %v3097_v16 }
 0x4c0   : > { %v1798_v20 = vadd.f32 1.0, %v3767_v19  ;;  %3772 = vpow2.f32 %v3098_v18 }
 0x4c2   : > { %3774 = vrcp.f32 %v1798_v20 }
 0x4cb   : > { %v3769_v48 = vpop.eup %3768 }
 0x4cc   : > { %v3771_v53 = vpop.eup %3770  ;;  %v1858_v54 = vmul.f32 %v3769_v48, %v1852_v21  ;;  %v1885_v48 = vld [vmem:[#allocation3 + $0x100] sm:$0xff] }
 0x4cd   : > { %v3773_v55 = vpop.eup %3772  ;;  %v1811_v59 = vadd.f32 1.0, %v3771_v53 }
 0x4ce   : > { %v1860_v56 = vadd.f32 %v1858_v54, %v1742_v50  ;;  %v1812_v2 = vadd.f32 1.0, %v3773_v55  ;;  %v1888_v50 = vld [vmem:[#allocation3 + $0x80] sm:$0xff] }
 0x4cf   : > { %v3775_v58 = vpop.eup %3774 }
 0x4d0   : > { %3776 = vtanh.f32 %v1860_v56  ;;  %v1859_v49 = vmul.f32 %v3775_v58, %v1855_v57 }
 0x4d1   : > { %3778 = vrcp.f32 %v1811_v59 }
 0x4d2   : > { %v1861_v0 = vadd.f32 %v1859_v49, %v1745_v63 }
 0x4d4   : > { %3780 = vtanh.f32 %v1861_v0 }
 0x4d5   : > { %3782 = vrcp.f32 %v1812_v2 }
 0x4dd   : > { %v3777_v3 = vpop.eup %3776 }
 0x4de   : > { %v1864_v1 = vsub.f32 %v4665_v60, %v3777_v3  ;;  %v3779_v4 = vpop.eup %3778  ;;  %v1884_v60 = vld [vmem:[#allocation3 + $0x148] sm:$0xff] }
 0x4e0   : > { %v1866_v7 = vmul.f32 %v3779_v4, %v1864_v1 }
 0x4e1   : > { %v3781_v5 = vpop.eup %3780 }
 0x4e2   : > { %v1865_v6 = vsub.f32 %v4667_v61, %v3781_v5  ;;  %v3783_v9 = vpop.eup %3782  ;;  %v4710_v10 = vadd.f32 %v3777_v3, %v1866_v7  ;;  %v1886_v3 = vld [vmem:[#allocation3 + $0x58] sm:$0xff] }
 0x4e4   : > { %v1867_v8 = vmul.f32 %v3783_v9, %v1865_v6 }
 0x4e6   : > { %v4712_v62 = vadd.f32 %v3781_v5, %v1867_v8 }
 0x4e8   : > { %v1870_v12 = vpack.c.bf16 %v4712_v62, %v4710_v10 }
 0x4ea   : > { %3178 = vst [vmem:[#allocation2 + $0x8] sm:$0xff] %v1870_v12   ;;  %1923 = vmatmul.mubr.bf16.vlgmr.msra.gmra.mxu0 %v1870_v12  ;;  %3443 = vmatmul.mubr.bf16.vlgmr.msra.gmra.mxu1 %v1870_v12  ;;  %v1889_v12 = vld [vmem:[#allocation3 + $0x130] sm:$0xff] }
 0x4eb   : > { %2035 = vmatpush1.bf16.msra.mxu0 %v4518_v23  ;;  %3447 = vmatpush3.bf16.msra.mxu1 %v4545_v29 }
 0x4ec   : > { %2036 = vmatprep.subr.bf16.mxu0 %v4524_v52  ;;  %3448 = vmatprep.subr.bf16.mxu1 %v4080_v24 }
 0x4ed   : > { %2066 = vmatprep.mubr.bf16.mxu0 %v4081_v51  ;;  %3462 = vmatprep.mubr.msk.bf16.mxu1 %vm4082_vm0, %v4080_v24 }
 0x4ef   : > { %2037 = vmatpush1.bf16.msra.mxu0 %v4530_v25  ;;  %3449 = vmatpush3.bf16.msra.mxu1 %v4557_v32 }
 0x4f0   : > { %2038 = vmatprep.subr.bf16.mxu0 %v4534_v26  ;;  %3450 = vmatprep.subr.bf16.mxu1 %v4080_v24 }
 0x4f3   : > { %2039 = vmatpush1.bf16.msra.mxu0 %v4538_v27  ;;  %3451 = vmatpush3.bf16.msra.mxu1 %v4570_v35 }
 0x4f4   : > { %2040 = vmatprep.subr.bf16.mxu0 %v4542_v28  ;;  %3452 = vmatprep.subr.bf16.mxu1 %v4080_v24 }
 0x4f7   : > { %2041 = vmatpush1.bf16.msra.mxu0 %v4549_v30  ;;  %3453 = vmatpush3.bf16.msra.mxu1 %v4583_v40 }
 0x4f8   : > { %2042 = vmatprep.subr.bf16.mxu0 %v4552_v31  ;;  %3454 = vmatprep.subr.bf16.mxu1 %v4080_v24 }
 0x4fb   : > { %2043 = vmatpush1.bf16.msra.mxu0 %v4561_v33  ;;  %3455 = vmatpush3.bf16.msra.mxu1 %v4596_v43 }
 0x4fc   : > { %2044 = vmatprep.subr.bf16.mxu0 %v4565_v34  ;;  %3456 = vmatprep.subr.bf16.mxu1 %v4080_v24 }
 0x4ff   : > { %2045 = vmatpush1.bf16.msra.mxu0 %v4575_v36  ;;  %3457 = vmatpush3.bf16.msra.mxu1 %v4606_v45 }
 0x500   : > { %2046 = vmatprep.subr.bf16.mxu0 %v4579_v37  ;;  %3458 = vmatprep.subr.bf16.mxu1 %v4080_v24 }
 0x503   : > { %2047 = vmatpush1.bf16.msra.mxu0 %v4588_v41  ;;  %3459 = vmatpush3.bf16.msra.mxu1 %v4612_v46 }
 0x504   : > { %2048 = vmatprep.subr.bf16.mxu0 %v4592_v42  ;;  %3460 = vmatprep.subr.bf16.mxu1 %v4080_v24 }
 0x507   : > { %2049 = vmatpush1.bf16.msra.mxu0 %v4601_v44  ;;  %3461 = vmatpush3.bf16.msra.mxu1 %v4621_v47 }
 0x508   : > { %2178 = vmatprep.subr.bf16.mxu0 %v4515_v22  ;;  %3466 = vmatprep.subr.bf16.mxu1 %v4080_v24 }
 0x5aa   : > { %v1924_v61 = vpop.f32.mrf.mxu0  ;;  %v1995_v38 = vpop.f32.mrf.mxu1 }
 0x5ab   : > { %v1933_v13 = vadd.f32 %v1924_v61, %v1884_v60  ;;  %v1996_v0 = vadd.f32 %v4661_v11, %v1995_v38 }
 0x5ac   : > { %v1926_v39 = vpop.f32.mrf.mxu0  ;;  %v3444_v14 = vpop.f32.mrf.mxu1 }
 0x5ad   : > { %v3101_v16 = vmul.f32 -1.442695, %v1933_v13  ;;  %v1947_v54 = vadd.f32 %v1926_v39, %v1885_v48 }
 0x5ae   : > { %v1928_v17 = vpop.f32.mrf.mxu0  ;;  %v1998_v18 = vpop.f32.mrf.mxu1 }
 0x5af   : > { %3784 = vpow2.f32 %v3101_v16  ;;  %v1934_v19 = vadd.f32 %v1928_v17, %v1887_v15  ;;  %v3103_v57 = vmul.f32 -1.442695, %v1947_v54  ;;  %v1999_v7 = vadd.f32 %v4661_v11, %v1998_v18 }
 0x5b0   : > { %v3445_v20 = vpop.f32.mrf.mxu1  ;;  %v1930_v53 = vpop.f32.mrf.mxu0 }
 0x5b1   : > { %v3102_v21 = vmul.f32 -1.442695, %v1934_v19  ;;  %v1948_v55 = vadd.f32 %v1930_v53, %v1888_v50 }
 0x5b3   : > { %3786 = vpow2.f32 %v3102_v21  ;;  %v3104_v59 = vmul.f32 -1.442695, %v1948_v55 }
 0x5bc   : > { %v3785_v56 = vpop.eup %3784 }
 0x5bd   : > { %v1941_v58 = vadd.f32 1.0, %v3785_v56  ;;  %v2031_v56 = vld [vmem:[#allocation3 + $0xa8] sm:$0xff] }
 0x5bf   : > { %3788 = vrcp.f32 %v1941_v58 }
 0x5c0   : > { %v3787_v63 = vpop.eup %3786  ;;  %3790 = vpow2.f32 %v3103_v57 }
 0x5c1   : > { %v1942_v49 = vadd.f32 1.0, %v3787_v63  ;;  %3792 = vpow2.f32 %v3104_v59 }
 0x5c3   : > { %3794 = vrcp.f32 %v1942_v49 }
 0x5cc   : > { %v3789_v2 = vpop.eup %3788 }
 0x5cd   : > { %v3791_v1 = vpop.eup %3790  ;;  %v2002_v4 = vmul.f32 %v3789_v2, %v1996_v0  ;;  %v2029_v2 = vld [vmem:[#allocation3 + $0x120] sm:$0xff] }
 0x5ce   : > { %v3793_v5 = vpop.eup %3792  ;;  %v1955_v8 = vadd.f32 1.0, %v3791_v1 }
 0x5cf   : > { %v2004_v6 = vadd.f32 %v2002_v4, %v1886_v3  ;;  %v1956_v13 = vadd.f32 1.0, %v3793_v5  ;;  %v2032_v3 = vld [vmem:[#allocation3 + $0xb8] sm:$0xff] }
 0x5d0   : > { %v3795_v9 = vpop.eup %3794 }
 0x5d1   : > { %3796 = vtanh.f32 %v2004_v6  ;;  %v2003_v60 = vmul.f32 %v3795_v9, %v1999_v7 }
 0x5d2   : > { %3798 = vrcp.f32 %v1955_v8 }
 0x5d3   : > { %v2005_v61 = vadd.f32 %v2003_v60, %v1889_v12 }
 0x5d5   : > { %3800 = vtanh.f32 %v2005_v61 }
 0x5d6   : > { %3802 = vrcp.f32 %v1956_v13  ;;  %v2030_v13 = vld [vmem:[#allocation3 + $0xe0] sm:$0xff] }
 0x5de   : > { %v3797_v39 = vpop.eup %3796 }
 0x5df   : > { %v2008_v38 = vsub.f32 %v4710_v10, %v3797_v39  ;;  %v3799_v14 = vpop.eup %3798  ;;  %v2028_v10 = vld [vmem:[#allocation3 + $0x138] sm:$0xff] }
 0x5e1   : > { %v2010_v17 = vmul.f32 %v3799_v14, %v2008_v38 }
 0x5e2   : > { %v3801_v15 = vpop.eup %3800 }
 0x5e3   : > { %v2009_v16 = vsub.f32 %v4712_v62, %v3801_v15  ;;  %v3803_v19 = vpop.eup %3802  ;;  %v4755_v20 = vadd.f32 %v3797_v39, %v2010_v17 }
 0x5e5   : > { %v2011_v18 = vmul.f32 %v3803_v19, %v2009_v16 }
 0x5e7   : > { %v4757_v21 = vadd.f32 %v3801_v15, %v2011_v18  ;;  %v2033_v18 = vld [vmem:[#allocation3 + $0x168] sm:$0xff] }
 0x5e9   : > { %v2014_v48 = vpack.c.bf16 %v4757_v21, %v4755_v20 }
 0x5eb   : > { %3183 = vst [vmem:[#allocation2 + $0x10] sm:$0xff] %v2014_v48   ;;  %2067 = vmatmul.mubr.bf16.vlgmr.msra.gmra.mxu0 %v2014_v48  ;;  %3463 = vmatmul.mubr.bf16.vlgmr.msra.gmra.mxu1 %v2014_v48 }
 0x5ec   : > { %2179 = vmatpush1.bf16.msra.mxu0 %v4518_v23  ;;  %3467 = vmatpush3.bf16.msra.mxu1 %v4545_v29 }
 0x5ed   : > { %2180 = vmatprep.subr.bf16.mxu0 %v4524_v52  ;;  %3468 = vmatprep.subr.bf16.mxu1 %v4080_v24 }
 0x5ee   : > { %2210 = vmatprep.mubr.bf16.mxu0 %v4081_v51  ;;  %3482 = vmatprep.mubr.msk.bf16.mxu1 %vm4082_vm0, %v4080_v24 }
 0x5f0   : > { %2181 = vmatpush1.bf16.msra.mxu0 %v4530_v25  ;;  %3469 = vmatpush3.bf16.msra.mxu1 %v4557_v32 }
 0x5f1   : > { %2182 = vmatprep.subr.bf16.mxu0 %v4534_v26  ;;  %3470 = vmatprep.subr.bf16.mxu1 %v4080_v24 }
 0x5f4   : > { %2183 = vmatpush1.bf16.msra.mxu0 %v4538_v27  ;;  %3471 = vmatpush3.bf16.msra.mxu1 %v4570_v35 }
 0x5f5   : > { %2184 = vmatprep.subr.bf16.mxu0 %v4542_v28  ;;  %3472 = vmatprep.subr.bf16.mxu1 %v4080_v24 }
 0x5f8   : > { %2185 = vmatpush1.bf16.msra.mxu0 %v4549_v30  ;;  %3473 = vmatpush3.bf16.msra.mxu1 %v4583_v40 }
 0x5f9   : > { %2186 = vmatprep.subr.bf16.mxu0 %v4552_v31  ;;  %3474 = vmatprep.subr.bf16.mxu1 %v4080_v24 }
 0x5fc   : > { %2187 = vmatpush1.bf16.msra.mxu0 %v4561_v33  ;;  %3475 = vmatpush3.bf16.msra.mxu1 %v4596_v43 }
 0x5fd   : > { %2188 = vmatprep.subr.bf16.mxu0 %v4565_v34  ;;  %3476 = vmatprep.subr.bf16.mxu1 %v4080_v24 }
 0x600   : > { %2189 = vmatpush1.bf16.msra.mxu0 %v4575_v36  ;;  %3477 = vmatpush3.bf16.msra.mxu1 %v4606_v45 }
 0x601   : > { %2190 = vmatprep.subr.bf16.mxu0 %v4579_v37  ;;  %3478 = vmatprep.subr.bf16.mxu1 %v4080_v24 }
 0x604   : > { %2191 = vmatpush1.bf16.msra.mxu0 %v4588_v41  ;;  %3479 = vmatpush3.bf16.msra.mxu1 %v4612_v46 }
 0x605   : > { %2192 = vmatprep.subr.bf16.mxu0 %v4592_v42  ;;  %3480 = vmatprep.subr.bf16.mxu1 %v4080_v24 }
 0x608   : > { %2193 = vmatpush1.bf16.msra.mxu0 %v4601_v44  ;;  %3481 = vmatpush3.bf16.msra.mxu1 %v4621_v47 }
 0x609   : > { %2322 = vmatprep.subr.bf16.mxu0 %v4515_v22  ;;  %3486 = vmatprep.subr.bf16.mxu1 %v4080_v24 }
 0x6ab   : > { %v2068_v62 = vpop.f32.mrf.mxu0  ;;  %v2139_v50 = vpop.f32.mrf.mxu1 }
 0x6ac   : > { %v2077_v53 = vadd.f32 %v2068_v62, %v2028_v10  ;;  %v2140_v60 = vadd.f32 %v4661_v11, %v2139_v50 }
 0x6ad   : > { %v2070_v54 = vpop.f32.mrf.mxu0  ;;  %v3464_v55 = vpop.f32.mrf.mxu1 }
 0x6ae   : > { %v3107_v57 = vmul.f32 -1.442695, %v2077_v53  ;;  %v2091_v1 = vadd.f32 %v2070_v54, %v2029_v2 }
 0x6af   : > { %v2072_v58 = vpop.f32.mrf.mxu0  ;;  %v2142_v59 = vpop.f32.mrf.mxu1 }
 0x6b0   : > { %3804 = vpow2.f32 %v3107_v57  ;;  %v2078_v63 = vadd.f32 %v2072_v58, %v2031_v56  ;;  %v3109_v6 = vmul.f32 -1.442695, %v2091_v1  ;;  %v2143_v16 = vadd.f32 %v4661_v11, %v2142_v59 }
 0x6b1   : > { %v3465_v49 = vpop.f32.mrf.mxu1  ;;  %v2074_v22 = vpop.f32.mrf.mxu0 }
 0x6b2   : > { %v3108_v0 = vmul.f32 -1.442695, %v2078_v63  ;;  %v2092_v4 = vadd.f32 %v2074_v22, %v2032_v3  ;;  %v2174_v22 = vld [vmem:[#allocation3 + $0x20] sm:$0xff] }
 0x6b4   : > { %3806 = vpow2.f32 %v3108_v0  ;;  %v3110_v9 = vmul.f32 -1.442695, %v2092_v4 }
 0x6bd   : > { %v3805_v5 = vpop.eup %3804 }
 0x6be   : > { %v2085_v7 = vadd.f32 1.0, %v3805_v5 }
 0x6c0   : > { %3808 = vrcp.f32 %v2085_v7 }
 0x6c1   : > { %v3807_v8 = vpop.eup %3806  ;;  %3810 = vpow2.f32 %v3109_v6 }
 0x6c2   : > { %v2086_v12 = vadd.f32 1.0, %v3807_v8  ;;  %3812 = vpow2.f32 %v3110_v9 }
 0x6c4   : > { %3814 = vrcp.f32 %v2086_v12  ;;  %v2177_v12 = vld [vmem:[#allocation3 + $0x170] sm:$0xff] }
 0x6cd   : > { %v3809_v61 = vpop.eup %3808 }
 0x6ce   : > { %v3811_v39 = vpop.eup %3810  ;;  %v2146_v38 = vmul.f32 %v3809_v61, %v2140_v60 }
 0x6cf   : > { %v3813_v14 = vpop.eup %3812  ;;  %v2099_v19 = vadd.f32 1.0, %v3811_v39 }
 0x6d0   : > { %v2148_v15 = vadd.f32 %v2146_v38, %v2030_v13  ;;  %v2100_v62 = vadd.f32 1.0, %v3813_v14 }
 0x6d1   : > { %v3815_v17 = vpop.eup %3814 }
 0x6d2   : > { %3816 = vtanh.f32 %v2148_v15  ;;  %v2147_v48 = vmul.f32 %v3815_v17, %v2143_v16 }
 0x6d3   : > { %3818 = vrcp.f32 %v2099_v19 }
 0x6d4   : > { %v2149_v10 = vadd.f32 %v2147_v48, %v2033_v18 }
 0x6d6   : > { %3820 = vtanh.f32 %v2149_v10 }
 0x6d7   : > { %3822 = vrcp.f32 %v2100_v62 }
 0x6df   : > { %v3817_v53 = vpop.eup %3816 }
 0x6e0   : > { %v2152_v50 = vsub.f32 %v4755_v20, %v3817_v53  ;;  %v3819_v54 = vpop.eup %3818 }
 0x6e2   : > { %v2154_v57 = vmul.f32 %v3819_v54, %v2152_v50  ;;  %v4859_v50 = vld [vmem:[%s4312_s1 + $0x38] sm:$0xff]   ;;  %v4863_v54 = vld [vmem:[%s4294_s18 + $0x64] ss:$8 sps:$4 sm:$0xff]  }
 0x6e3   : > { %v3821_v55 = vpop.eup %3820 }
 0x6e4   : > { %v2153_v56 = vsub.f32 %v4757_v21, %v3821_v55  ;;  %v3823_v58 = vpop.eup %3822  ;;  %v4800_v63 = vadd.f32 %v3817_v53, %v2154_v57  ;;  %v4855_v53 = vld [vmem:[%s4294_s18 + $0x70] ss:$8 sps:$4 sm:$0xff]   ;;  %v4879_v57 = vld [vmem:[%s4294_s18 + $0x54] ss:$8 sps:$4 sm:$0xff]  }
 0x6e6   : > { %v2155_v59 = vmul.f32 %v3823_v58, %v2153_v56  ;;  %v4875_v56 = vld [vmem:[%s4312_s1 + $0x30] sm:$0xff]  }
 0x6e7   : > { %v4884_v58 = vld [vmem:[%s4294_s18 + $0x50] ss:$8 sps:$4 sm:$0xff]  }
 0x6e8   : > { %v4802_v49 = vadd.f32 %v3821_v55, %v2155_v59  ;;  %v4871_v55 = vld [vmem:[%s4294_s18 + $0x60] ss:$8 sps:$4 sm:$0xff]  }
 0x6e9   : > { %v4888_v59 = vld [vmem:[%s4312_s1 + $0x28] sm:$0xff]  }
 0x6ea   : > { %v2158_v0 = vpack.c.bf16 %v4802_v49, %v4800_v63 }
 0x6ec   : > { %3188 = vst [vmem:[#allocation2 + $0x18] sm:$0xff] %v2158_v0   ;;  %2211 = vmatmul.mubr.bf16.vlgmr.msra.gmra.mxu0 %v2158_v0  ;;  %3483 = vmatmul.mubr.bf16.vlgmr.msra.gmra.mxu1 %v2158_v0  ;;  %v4901_v0 = vld [vmem:[%s4312_s1 + $0x20] sm:$0xff]  }
 0x6ed   : > { %2323 = vmatpush1.bf16.msra.mxu0 %v4518_v23  ;;  %3487 = vmatpush3.bf16.msra.mxu1 %v4545_v29  ;;  %v4840_v23 = vld [vmem:[%s4294_s18 + $0x74] ss:$8 sps:$4 sm:$0xff]  }
 0x6ee   : > { %2324 = vmatprep.subr.bf16.mxu0 %v4524_v52  ;;  %3488 = vmatprep.subr.bf16.mxu1 %v4080_v24  ;;  %v2172_v52 = vld [vmem:[#allocation3 + $0xe8] sm:$0xff] }
 0x6ef   : > { %2354 = vmatprep.mubr.bf16.mxu0 %v4081_v51  ;;  %3502 = vmatprep.mubr.msk.bf16.mxu1 %vm4082_vm0, %v4080_v24 }
 0x6f1   : > { %2325 = vmatpush1.bf16.msra.mxu0 %v4530_v25  ;;  %3489 = vmatpush3.bf16.msra.mxu1 %v4557_v32 }
 0x6f2   : > { %2326 = vmatprep.subr.bf16.mxu0 %v4534_v26  ;;  %3490 = vmatprep.subr.bf16.mxu1 %v4080_v24 }
 0x6f5   : > { %2327 = vmatpush1.bf16.msra.mxu0 %v4538_v27  ;;  %3491 = vmatpush3.bf16.msra.mxu1 %v4570_v35 }
 0x6f6   : > { %2328 = vmatprep.subr.bf16.mxu0 %v4542_v28  ;;  %3492 = vmatprep.subr.bf16.mxu1 %v4080_v24 }
 0x6f9   : > { %2329 = vmatpush1.bf16.msra.mxu0 %v4549_v30  ;;  %3493 = vmatpush3.bf16.msra.mxu1 %v4583_v40  ;;  %v2175_v30 = vld [vmem:[#allocation3 + $0x88] sm:$0xff]  ;;  %v2176_v40 = vld [vmem:[#allocation3 + $0xa0] sm:$0xff] }
 0x6fa   : > { %2330 = vmatprep.subr.bf16.mxu0 %v4552_v31  ;;  %3494 = vmatprep.subr.bf16.mxu1 %v4080_v24 }
 0x6fd   : > { %2331 = vmatpush1.bf16.msra.mxu0 %v4561_v33  ;;  %3495 = vmatpush3.bf16.msra.mxu1 %v4596_v43 }
 0x6fe   : > { %2332 = vmatprep.subr.bf16.mxu0 %v4565_v34  ;;  %3496 = vmatprep.subr.bf16.mxu1 %v4080_v24 }
 0x701   : > { %2333 = vmatpush1.bf16.msra.mxu0 %v4575_v36  ;;  %3497 = vmatpush3.bf16.msra.mxu1 %v4606_v45 }
 0x702   : > { %2334 = vmatprep.subr.bf16.mxu0 %v4579_v37  ;;  %3498 = vmatprep.subr.bf16.mxu1 %v4080_v24  ;;  %v2173_v37 = vld [vmem:[#allocation3 + $0xf8] sm:$0xff] }
 0x705   : > { %2335 = vmatpush1.bf16.msra.mxu0 %v4588_v41  ;;  %3499 = vmatpush3.bf16.msra.mxu1 %v4612_v46 }
 0x706   : > { %2336 = vmatprep.subr.bf16.mxu0 %v4592_v42  ;;  %3500 = vmatprep.subr.bf16.mxu1 %v4080_v24 }
 0x709   : > { %2337 = vmatpush1.bf16.msra.mxu0 %v4601_v44  ;;  %3501 = vmatpush3.bf16.msra.mxu1 %v4621_v47 }
 0x70a   : > { %2466 = vmatprep.subr.bf16.mxu0 %v4840_v23  ;;  %3506 = vmatprep.subr.bf16.mxu1 %v4080_v24 }
 0x7ac   : > { %v2212_v25 = vpop.f32.mrf.mxu0  ;;  %v2283_v26 = vpop.f32.mrf.mxu1 }
 0x7ad   : > { %v2221_v27 = vadd.f32 %v2212_v25, %v2172_v52  ;;  %v2284_v2 = vadd.f32 %v4661_v11, %v2283_v26  ;;  %v4905_v52 = vld [vmem:[%s4294_s18 + $0x34] ss:$8 sps:$4 sm:$0xff]   ;;  %v4910_v25 = vld [vmem:[%s4294_s18 + $0x30] ss:$8 sps:$4 sm:$0xff]  }
 0x7ae   : > { %v2214_v28 = vpop.f32.mrf.mxu0  ;;  %v3484_v29 = vpop.f32.mrf.mxu1  ;;  %v4914_v26 = vld [vmem:[%s4312_s1 + $0x18] sm:$0xff]  }
 0x7af   : > { %v3113_v31 = vmul.f32 -1.442695, %v2221_v27  ;;  %v2235_v42 = vadd.f32 %v2214_v28, %v2173_v37  ;;  %v4918_v27 = vld [vmem:[%s4294_s18 + $0x24] ss:$8 sps:$4 sm:$0xff]   ;;  %v4923_v28 = vld [vmem:[%s4294_s18 + $0x20] ss:$8 sps:$4 sm:$0xff]  }
 0x7b0   : > { %v2216_v32 = vpop.f32.mrf.mxu0  ;;  %v2286_v33 = vpop.f32.mrf.mxu1  ;;  %v4927_v29 = vld [vmem:[%s4312_s1 + $0x10] sm:$0xff]  }
 0x7b1   : > { %3824 = vpow2.f32 %v3113_v31  ;;  %v2222_v34 = vadd.f32 %v2216_v32, %v2175_v30  ;;  %v3115_v45 = vmul.f32 -1.442695, %v2235_v42  ;;  %v2287_v7 = vadd.f32 %v4661_v11, %v2286_v33  ;;  %v4931_v30 = vld [vmem:[%s4294_s18 + $0x14] ss:$8 sps:$4 sm:$0xff]   ;;  %v4936_v31 = vld [vmem:[%s4294_s18 + $0x10] ss:$8 sps:$4 sm:$0xff]  }
 0x7b2   : > { %v3485_v35 = vpop.f32.mrf.mxu1  ;;  %v2218_v41 = vpop.f32.mrf.mxu0  ;;  %v4940_v32 = vld [vmem:[%s4312_s1 + $0x8] sm:$0xff]  }
 0x7b3   : > { %v3114_v36 = vmul.f32 -1.442695, %v2222_v34  ;;  %v2236_v43 = vadd.f32 %v2218_v41, %v2176_v40  ;;  %v4944_v33 = vld [vmem:[%s4294_s18 + $0x4] ss:$8 sps:$4 sm:$0xff]   ;;  %v4949_v34 = vld [vmem:[%s4294_s18] ss:$8 sps:$4 sm:$0xff]  }
 0x7b4   : > { %v4953_v35 = vld [vmem:[%s4312_s1] sm:$0xff]  }
 0x7b5   : > { %3826 = vpow2.f32 %v3114_v36  ;;  %v3116_v47 = vmul.f32 -1.442695, %v2236_v43  ;;  %v2316_v36 = vld [vmem:[#allocation3 + $0xf0] sm:$0xff] }
 0x7be   : > { %v3825_v44 = vpop.eup %3824 }
 0x7bf   : > { %v2229_v46 = vadd.f32 1.0, %v3825_v44  ;;  %v2319_v44 = vld [vmem:[#allocation3 + $0xc8] sm:$0xff] }
 0x7c1   : > { %3828 = vrcp.f32 %v2229_v46 }
 0x7c2   : > { %v3827_v20 = vpop.eup %3826  ;;  %3830 = vpow2.f32 %v3115_v45 }
 0x7c3   : > { %v2230_v21 = vadd.f32 1.0, %v3827_v20  ;;  %3832 = vpow2.f32 %v3116_v47 }
 0x7c5   : > { %3834 = vrcp.f32 %v2230_v21 }
 0x7ce   : > { %v3829_v3 = vpop.eup %3828 }
 0x7cf   : > { %v3831_v1 = vpop.eup %3830  ;;  %v2290_v4 = vmul.f32 %v3829_v3, %v2284_v2  ;;  %v2317_v3 = vld [vmem:[#allocation3 + $0x140] sm:$0xff] }
 0x7d0   : > { %v3833_v5 = vpop.eup %3832  ;;  %v2243_v8 = vadd.f32 1.0, %v3831_v1 }
 0x7d1   : > { %v2292_v6 = vadd.f32 %v2290_v4, %v2174_v22  ;;  %v2244_v13 = vadd.f32 1.0, %v3833_v5  ;;  %v2320_v22 = vld [vmem:[#allocation3 + $0x28] sm:$0xff] }
 0x7d2   : > { %v3835_v9 = vpop.eup %3834 }
 0x7d3   : > { %3836 = vtanh.f32 %v2292_v6  ;;  %v2291_v60 = vmul.f32 %v3835_v9, %v2287_v7 }
 0x7d4   : > { %3838 = vrcp.f32 %v2243_v8 }
 0x7d5   : > { %v2293_v61 = vadd.f32 %v2291_v60, %v2177_v12 }
 0x7d7   : > { %3840 = vtanh.f32 %v2293_v61 }
 0x7d8   : > { %3842 = vrcp.f32 %v2244_v13  ;;  %v2318_v13 = vld [vmem:[#allocation3 + $0x60] sm:$0xff] }
 0x7e0   : > { %v3837_v39 = vpop.eup %3836 }
 0x7e1   : > { %v2296_v38 = vsub.f32 %v4800_v63, %v3837_v39  ;;  %v3839_v14 = vpop.eup %3838  ;;  %v4892_v63 = vld [vmem:[%s4294_s18 + $0x44] ss:$8 sps:$4 sm:$0xff]  }
 0x7e3   : > { %v2298_v17 = vmul.f32 %v3839_v14, %v2296_v38 }
 0x7e4   : > { %v3841_v15 = vpop.eup %3840 }
 0x7e5   : > { %v2297_v16 = vsub.f32 %v4802_v49, %v3841_v15  ;;  %v3843_v19 = vpop.eup %3842  ;;  %v4848_v48 = vadd.f32 %v3837_v39, %v2298_v17  ;;  %v4897_v49 = vld [vmem:[%s4294_s18 + $0x40] ss:$8 sps:$4 sm:$0xff]  }
 0x7e7   : > { %v2299_v18 = vmul.f32 %v3843_v19, %v2297_v16 }
 0x7e9   : > { %v4850_v10 = vadd.f32 %v3841_v15, %v2299_v18  ;;  %v2321_v18 = vld [vmem:[#allocation3 + $0x38] sm:$0xff] }
 0x7eb   : > { %v2302_v62 = vpack.c.bf16 %v4850_v10, %v4848_v48 }
 0x7ed   : > { %3193 = vst [vmem:[#allocation2 + $0x20] sm:$0xff] %v2302_v62   ;;  %2355 = vmatmul.mubr.bf16.vlgmr.msra.gmra.mxu0 %v2302_v62  ;;  %3503 = vmatmul.mubr.bf16.vlgmr.msra.gmra.mxu1 %v2302_v62 }
 0x7ee   : > { %2467 = vmatpush1.bf16.msra.mxu0 %v4855_v53  ;;  %3507 = vmatpush3.bf16.msra.mxu1 %v4859_v50 }
 0x7ef   : > { %2468 = vmatprep.subr.bf16.mxu0 %v4863_v54  ;;  %3508 = vmatprep.subr.bf16.mxu1 %v4080_v24 }
 0x7f0   : > { %2498 = vmatprep.mubr.bf16.mxu0 %v4081_v51  ;;  %3522 = vmatprep.mubr.msk.bf16.mxu1 %vm4082_vm0, %v4080_v24 }
 0x7f2   : > { %2469 = vmatpush1.bf16.msra.mxu0 %v4871_v55  ;;  %3509 = vmatpush3.bf16.msra.mxu1 %v4875_v56 }
 0x7f3   : > { %2470 = vmatprep.subr.bf16.mxu0 %v4879_v57  ;;  %3510 = vmatprep.subr.bf16.mxu1 %v4080_v24 }
 0x7f6   : > { %2471 = vmatpush1.bf16.msra.mxu0 %v4884_v58  ;;  %3511 = vmatpush3.bf16.msra.mxu1 %v4888_v59 }
 0x7f7   : > { %2472 = vmatprep.subr.bf16.mxu0 %v4892_v63  ;;  %3512 = vmatprep.subr.bf16.mxu1 %v4080_v24 }
 0x7fa   : > { %2473 = vmatpush1.bf16.msra.mxu0 %v4897_v49  ;;  %3513 = vmatpush3.bf16.msra.mxu1 %v4901_v0 }
 0x7fb   : > { %2474 = vmatprep.subr.bf16.mxu0 %v4905_v52  ;;  %3514 = vmatprep.subr.bf16.mxu1 %v4080_v24 }
 0x7fe   : > { %2475 = vmatpush1.bf16.msra.mxu0 %v4910_v25  ;;  %3515 = vmatpush3.bf16.msra.mxu1 %v4914_v26 }
 0x7ff   : > { %2476 = vmatprep.subr.bf16.mxu0 %v4918_v27  ;;  %3516 = vmatprep.subr.bf16.mxu1 %v4080_v24 }
 0x802   : > { %2477 = vmatpush1.bf16.msra.mxu0 %v4923_v28  ;;  %3517 = vmatpush3.bf16.msra.mxu1 %v4927_v29 }
 0x803   : > { %2478 = vmatprep.subr.bf16.mxu0 %v4931_v30  ;;  %3518 = vmatprep.subr.bf16.mxu1 %v4080_v24 }
 0x806   : > { %2479 = vmatpush1.bf16.msra.mxu0 %v4936_v31  ;;  %3519 = vmatpush3.bf16.msra.mxu1 %v4940_v32 }
 0x807   : > { %2480 = vmatprep.subr.bf16.mxu0 %v4944_v33  ;;  %3520 = vmatprep.subr.bf16.mxu1 %v4080_v24 }
 0x80a   : > { %2481 = vmatpush1.bf16.msra.mxu0 %v4949_v34  ;;  %3521 = vmatpush3.bf16.msra.mxu1 %v4953_v35 }
 0x80b   : > { %2610 = vmatprep.subr.bf16.mxu0 %v4840_v23  ;;  %3526 = vmatprep.subr.bf16.mxu1 %v4080_v24 }
 0x8ad   : > { %v2356_v37 = vpop.f32.mrf.mxu0  ;;  %v2427_v40 = vpop.f32.mrf.mxu1 }
 0x8ae   : > { %v2365_v41 = vadd.f32 %v2356_v37, %v2316_v36  ;;  %v2428_v60 = vadd.f32 %v4661_v11, %v2427_v40 }
 0x8af   : > { %v2358_v42 = vpop.f32.mrf.mxu0  ;;  %v3504_v43 = vpop.f32.mrf.mxu1 }
 0x8b0   : > { %v3119_v45 = vmul.f32 -1.442695, %v2365_v41  ;;  %v2379_v1 = vadd.f32 %v2358_v42, %v2317_v3 }
 0x8b1   : > { %v2360_v46 = vpop.f32.mrf.mxu0  ;;  %v2430_v47 = vpop.f32.mrf.mxu1 }
 0x8b2   : > { %3844 = vpow2.f32 %v3119_v45  ;;  %v2366_v20 = vadd.f32 %v2360_v46, %v2319_v44  ;;  %v3121_v6 = vmul.f32 -1.442695, %v2379_v1  ;;  %v2431_v16 = vadd.f32 %v4661_v11, %v2430_v47 }
 0x8b3   : > { %v3505_v21 = vpop.f32.mrf.mxu1  ;;  %v2362_v23 = vpop.f32.mrf.mxu0 }
 0x8b4   : > { %v3120_v2 = vmul.f32 -1.442695, %v2366_v20  ;;  %v2380_v4 = vadd.f32 %v2362_v23, %v2320_v22 }
 0x8b6   : > { %3846 = vpow2.f32 %v3120_v2  ;;  %v3122_v9 = vmul.f32 -1.442695, %v2380_v4  ;;  %v2462_v2 = vld [vmem:[#allocation3 + $0x98] sm:$0xff] }
 0x8bf   : > { %v3845_v5 = vpop.eup %3844 }
 0x8c0   : > { %v2373_v7 = vadd.f32 1.0, %v3845_v5 }
 0x8c2   : > { %3848 = vrcp.f32 %v2373_v7  ;;  %v2465_v7 = vld [vmem:[#allocation3 + $0x78] sm:$0xff] }
 0x8c3   : > { %v3847_v8 = vpop.eup %3846  ;;  %3850 = vpow2.f32 %v3121_v6 }
 0x8c4   : > { %v2374_v12 = vadd.f32 1.0, %v3847_v8  ;;  %3852 = vpow2.f32 %v3122_v9 }
 0x8c6   : > { %3854 = vrcp.f32 %v2374_v12 }
 0x8cf   : > { %v3849_v61 = vpop.eup %3848 }
 0x8d0   : > { %v3851_v39 = vpop.eup %3850  ;;  %v2434_v38 = vmul.f32 %v3849_v61, %v2428_v60 }
 0x8d1   : > { %v3853_v14 = vpop.eup %3852  ;;  %v2387_v19 = vadd.f32 1.0, %v3851_v39 }
 0x8d2   : > { %v2436_v15 = vadd.f32 %v2434_v38, %v2318_v13  ;;  %v2388_v37 = vadd.f32 1.0, %v3853_v14 }
 0x8d3   : > { %v3855_v17 = vpop.eup %3854 }
 0x8d4   : > { %3856 = vtanh.f32 %v2436_v15  ;;  %v2435_v62 = vmul.f32 %v3855_v17, %v2431_v16 }
 0x8d5   : > { %3858 = vrcp.f32 %v2387_v19 }
 0x8d6   : > { %v2437_v36 = vadd.f32 %v2435_v62, %v2321_v18  ;;  %v2604_v62 = vld [vmem:[#allocation3 + $0x50] sm:$0xff] }
 0x8d8   : > { %3860 = vtanh.f32 %v2437_v36 }
 0x8d9   : > { %3862 = vrcp.f32 %v2388_v37 }
 0x8e1   : > { %v3857_v41 = vpop.eup %3856 }
 0x8e2   : > { %v2440_v40 = vsub.f32 %v4848_v48, %v3857_v41  ;;  %v3859_v42 = vpop.eup %3858 }
 0x8e4   : > { %v2442_v45 = vmul.f32 %v3859_v42, %v2440_v40 }
 0x8e5   : > { %v3861_v43 = vpop.eup %3860 }
 0x8e6   : > { %v2441_v44 = vsub.f32 %v4850_v10, %v3861_v43  ;;  %v3863_v46 = vpop.eup %3862  ;;  %v4962_v47 = vadd.f32 %v3857_v41, %v2442_v45 }
 0x8e8   : > { %v2443_v11 = vmul.f32 %v3863_v46, %v2441_v44 }
 0x8ea   : > { %v4964_v20 = vadd.f32 %v3861_v43, %v2443_v11  ;;  %v2607_v43 = vld [vmem:[#allocation3 + $0x30] sm:$0xff] }
 0x8ec   : > { %v2446_v21 = vpack.c.bf16 %v4964_v20, %v4962_v47 }
 0x8ee   : > { %3198 = vst [vmem:[#allocation2 + $0x28] sm:$0xff] %v2446_v21   ;;  %2499 = vmatmul.mubr.bf16.vlgmr.msra.gmra.mxu0 %v2446_v21  ;;  %3523 = vmatmul.mubr.bf16.vlgmr.msra.gmra.mxu1 %v2446_v21  ;;  %v2605_v21 = vld [vmem:[#allocation3 + $0x68] sm:$0xff] }
 0x8ef   : > { %2611 = vmatpush1.bf16.msra.mxu0 %v4855_v53  ;;  %3527 = vmatpush3.bf16.msra.mxu1 %v4859_v50 }
 0x8f0   : > { %2612 = vmatprep.subr.bf16.mxu0 %v4863_v54  ;;  %3528 = vmatprep.subr.bf16.mxu1 %v4080_v24 }
 0x8f1   : > { %2642 = vmatprep.mubr.bf16.mxu0 %v4081_v51  ;;  %3542 = vmatprep.mubr.msk.bf16.mxu1 %vm4082_vm0, %v4080_v24  ;;  %v2460_v51 = vld [vmem:[#allocation3 + $0xc0] sm:$0xff] }
 0x8f3   : > { %2613 = vmatpush1.bf16.msra.mxu0 %v4871_v55  ;;  %3529 = vmatpush3.bf16.msra.mxu1 %v4875_v56  ;;  %v2463_v55 = vld [vmem:[#allocation3 + $0x8] sm:$0xff] }
 0x8f4   : > { %2614 = vmatprep.subr.bf16.mxu0 %v4879_v57  ;;  %3530 = vmatprep.subr.bf16.mxu1 %v4080_v24 }
 0x8f7   : > { %2615 = vmatpush1.bf16.msra.mxu0 %v4884_v58  ;;  %3531 = vmatpush3.bf16.msra.mxu1 %v4888_v59 }
 0x8f8   : > { %2616 = vmatprep.subr.bf16.mxu0 %v4892_v63  ;;  %3532 = vmatprep.subr.bf16.mxu1 %v4080_v24 }
 0x8fb   : > { %2617 = vmatpush1.bf16.msra.mxu0 %v4897_v49  ;;  %3533 = vmatpush3.bf16.msra.mxu1 %v4901_v0  ;;  %v2464_v0 = vld [vmem:[#allocation3] sm:$0xff] }
 0x8fc   : > { %2618 = vmatprep.subr.bf16.mxu0 %v4905_v52  ;;  %3534 = vmatprep.subr.bf16.mxu1 %v4080_v24 }
 0x8ff   : > { %2619 = vmatpush1.bf16.msra.mxu0 %v4910_v25  ;;  %3535 = vmatpush3.bf16.msra.mxu1 %v4914_v26 }
 0x900   : > { %2620 = vmatprep.subr.bf16.mxu0 %v4918_v27  ;;  %3536 = vmatprep.subr.bf16.mxu1 %v4080_v24 }
 0x903   : > { %2621 = vmatpush1.bf16.msra.mxu0 %v4923_v28  ;;  %3537 = vmatpush3.bf16.msra.mxu1 %v4927_v29 }
 0x904   : > { %2622 = vmatprep.subr.bf16.mxu0 %v4931_v30  ;;  %3538 = vmatprep.subr.bf16.mxu1 %v4080_v24 }
 0x907   : > { %2623 = vmatpush1.bf16.msra.mxu0 %v4936_v31  ;;  %3539 = vmatpush3.bf16.msra.mxu1 %v4940_v32 }
 0x908   : > { %2624 = vmatprep.subr.bf16.mxu0 %v4944_v33  ;;  %3540 = vmatprep.subr.bf16.mxu1 %v4080_v24  ;;  %v2461_v24 = vld [vmem:[#allocation3 + $0x18] sm:$0xff]  ;;  %v5002_v33 = vld [vmem:[%s4305_s13] ss:$0 sm:$0xff] }
 0x90b   : > { %2625 = vmatpush1.bf16.msra.mxu0 %v4949_v34  ;;  %3541 = vmatpush3.bf16.msra.mxu1 %v4953_v35 }
 0x9ae   : > { %v2500_v48 = vpop.f32.mrf.mxu0  ;;  %v2571_v10 = vpop.f32.mrf.mxu1 }
 0x9af   : > { %v2509_v53 = vadd.f32 %v2500_v48, %v2460_v51  ;;  %v2572_v34 = vadd.f32 %v5002_v33, %v2571_v10  ;;  %v2608_v51 = vld [vmem:[#allocation3 + $0x158] sm:$0xff] }
 0x9b0   : > { %v2502_v50 = vpop.f32.mrf.mxu0  ;;  %v3524_v54 = vpop.f32.mrf.mxu1 }
 0x9b1   : > { %v3125_v56 = vmul.f32 -1.442695, %v2509_v53  ;;  %v2523_v25 = vadd.f32 %v2502_v50, %v2461_v24 }
 0x9b2   : > { %v2504_v57 = vpop.f32.mrf.mxu0  ;;  %v2574_v58 = vpop.f32.mrf.mxu1 }
 0x9b3   : > { %3864 = vpow2.f32 %v3125_v56  ;;  %v2510_v59 = vadd.f32 %v2504_v57, %v2463_v55  ;;  %v3127_v28 = vmul.f32 -1.442695, %v2523_v25  ;;  %v2575_v4 = vadd.f32 %v5002_v33, %v2574_v58 }
 0x9b4   : > { %v3525_v63 = vpop.f32.mrf.mxu1  ;;  %v2506_v52 = vpop.f32.mrf.mxu0 }
 0x9b5   : > { %v3126_v49 = vmul.f32 -1.442695, %v2510_v59  ;;  %v2524_v26 = vadd.f32 %v2506_v52, %v2464_v0 }
 0x9b7   : > { %3866 = vpow2.f32 %v3126_v49  ;;  %v3128_v30 = vmul.f32 -1.442695, %v2524_v26  ;;  %v2606_v49 = vld [vmem:[#allocation3 + $0x70] sm:$0xff] }
 0x9c0   : > { %v3865_v27 = vpop.eup %3864 }
 0x9c1   : > { %v2517_v29 = vadd.f32 1.0, %v3865_v27 }
 0x9c3   : > { %3868 = vrcp.f32 %v2517_v29  ;;  %v2609_v29 = vld [vmem:[#allocation3 + $0x150] sm:$0xff] }
 0x9c4   : > { %v3867_v31 = vpop.eup %3866  ;;  %3870 = vpow2.f32 %v3127_v28 }
 0x9c5   : > { %v2518_v32 = vadd.f32 1.0, %v3867_v31  ;;  %3872 = vpow2.f32 %v3128_v30 }
 0x9c7   : > { %3874 = vrcp.f32 %v2518_v32 }
 0x9d0   : > { %v3869_v35 = vpop.eup %3868 }
 0x9d1   : > { %v3871_v3 = vpop.eup %3870  ;;  %v2578_v22 = vmul.f32 %v3869_v35, %v2572_v34 }
 0x9d2   : > { %v3873_v23 = vpop.eup %3872  ;;  %v2531_v6 = vadd.f32 1.0, %v3871_v3 }
 0x9d3   : > { %v2580_v1 = vadd.f32 %v2578_v22, %v2462_v2  ;;  %v2532_v12 = vadd.f32 1.0, %v3873_v23 }
 0x9d4   : > { %v3875_v5 = vpop.eup %3874 }
 0x9d5   : > { %3876 = vtanh.f32 %v2580_v1  ;;  %v2579_v9 = vmul.f32 %v3875_v5, %v2575_v4 }
 0x9d6   : > { %3878 = vrcp.f32 %v2531_v6 }
 0x9d7   : > { %v2581_v8 = vadd.f32 %v2579_v9, %v2465_v7 }
 0x9d9   : > { %3880 = vtanh.f32 %v2581_v8 }
 0x9da   : > { %3882 = vrcp.f32 %v2532_v12 }
 0x9e2   : > { %v3877_v60 = vpop.eup %3876 }
 0x9e3   : > { %v2584_v61 = vsub.f32 %v4962_v47, %v3877_v60  ;;  %v3879_v13 = vpop.eup %3878 }
 0x9e5   : > { %v2586_v14 = vmul.f32 %v3879_v13, %v2584_v61 }
 0x9e6   : > { %v3881_v39 = vpop.eup %3880 }
 0x9e7   : > { %v2585_v38 = vsub.f32 %v4964_v20, %v3881_v39  ;;  %v3883_v15 = vpop.eup %3882  ;;  %v2588_v17 = vadd.f32 %v3877_v60, %v2586_v14 }
 0x9e9   : > { %v2587_v16 = vmul.f32 %v3883_v15, %v2585_v38 }
 0x9eb   : > { %v2589_v19 = vadd.f32 %v3881_v39, %v2587_v16 }
 0x9ed   : > { %v2590_v18 = vpack.c.bf16 %v2589_v19, %v2588_v17 }
 0x9ef   : > { %3203 = vst [vmem:[#allocation2 + $0x30] sm:$0xff] %v2590_v18   ;;  %2643 = vmatmul.mubr.bf16.vlgmr.msra.gmra.mxu0 %v2590_v18  ;;  %3543 = vmatmul.mubr.bf16.vlgmr.msra.gmra.mxu1 %v2590_v18 }
 0xaaf   : > { %v2644_v36 = vpop.f32.mrf.mxu0  ;;  %v2715_v37 = vpop.f32.mrf.mxu1 }
 0xab0   : > { %v2653_v41 = vadd.f32 %v2644_v36, %v2604_v62  ;;  %v2716_v59 = vadd.f32 %v5002_v33, %v2715_v37 }
 0xab1   : > { %v2646_v40 = vpop.f32.mrf.mxu0  ;;  %v3544_v42 = vpop.f32.mrf.mxu1 }
 0xab2   : > { %v3131_v44 = vmul.f32 -1.442695, %v2653_v41  ;;  %v2667_v10 = vadd.f32 %v2646_v40, %v2605_v21 }
 0xab3   : > { %v2648_v45 = vpop.f32.mrf.mxu0  ;;  %v2718_v46 = vpop.f32.mrf.mxu1 }
 0xab4   : > { %3884 = vpow2.f32 %v3131_v44  ;;  %v2654_v11 = vadd.f32 %v2648_v45, %v2607_v43  ;;  %v3133_v54 = vmul.f32 -1.442695, %v2667_v10  ;;  %v2719_v26 = vadd.f32 %v5002_v33, %v2718_v46 }
 0xab5   : > { %v3545_v47 = vpop.f32.mrf.mxu1  ;;  %v2650_v48 = vpop.f32.mrf.mxu0 }
 0xab6   : > { %v3132_v20 = vmul.f32 -1.442695, %v2654_v11  ;;  %v2668_v53 = vadd.f32 %v2650_v48, %v2608_v51 }
 0xab8   : > { %3886 = vpow2.f32 %v3132_v20  ;;  %v3134_v56 = vmul.f32 -1.442695, %v2668_v53 }
 0xac1   : > { %v3885_v50 = vpop.eup %3884 }
 0xac2   : > { %v2661_v55 = vadd.f32 1.0, %v3885_v50 }
 0xac4   : > { %3888 = vrcp.f32 %v2661_v55 }
 0xac5   : > { %v3887_v57 = vpop.eup %3886  ;;  %3890 = vpow2.f32 %v3133_v54 }
 0xac6   : > { %v2662_v58 = vadd.f32 1.0, %v3887_v57  ;;  %3892 = vpow2.f32 %v3134_v56 }
 0xac8   : > { %3894 = vrcp.f32 %v2662_v58 }
 0xad1   : > { %v3889_v63 = vpop.eup %3888 }
 0xad2   : > { %v3891_v24 = vpop.eup %3890  ;;  %v2722_v0 = vmul.f32 %v3889_v63, %v2716_v59 }
 0xad3   : > { %v3893_v52 = vpop.eup %3892  ;;  %v2675_v28 = vadd.f32 1.0, %v3891_v24 }
 0xad4   : > { %v2724_v25 = vadd.f32 %v2722_v0, %v2606_v49  ;;  %v2676_v32 = vadd.f32 1.0, %v3893_v52 }
 0xad5   : > { %v3895_v27 = vpop.eup %3894 }
 0xad6   : > { %3896 = vtanh.f32 %v2724_v25  ;;  %v2723_v30 = vmul.f32 %v3895_v27, %v2719_v26 }
 0xad7   : > { %3898 = vrcp.f32 %v2675_v28 }
 0xad8   : > { %v2725_v31 = vadd.f32 %v2723_v30, %v2609_v29 }
 0xada   : > { %3900 = vtanh.f32 %v2725_v31 }
 0xadb   : > { %3902 = vrcp.f32 %v2676_v32 }
 0xae3   : > { %v3897_v34 = vpop.eup %3896 }
 0xae4   : > { %v2728_v35 = vsub.f32 %v2588_v17, %v3897_v34  ;;  %v3899_v2 = vpop.eup %3898 }
 0xae6   : > { %v2730_v22 = vmul.f32 %v3899_v2, %v2728_v35 }
 0xae7   : > { %v3901_v3 = vpop.eup %3900 }
 0xae8   : > { %v2729_v23 = vsub.f32 %v2589_v19, %v3901_v3  ;;  %v3903_v1 = vpop.eup %3902  ;;  %v2732_v5 = vadd.f32 %v3897_v34, %v2730_v22 }
 0xaea   : > { %v2731_v4 = vmul.f32 %v3903_v1, %v2729_v23 }
 0xaec   : > { %v2733_v33 = vadd.f32 %v3901_v3, %v2731_v4  ;;  %2748 = sbr.rel (%p3137_p6) target bundleno = 3066 (0xbfa), region = 76 }
 0xaee   : > { %v2734_v6 = vpack.c.bf16 %v2733_v33, %v2732_v5 }
 0xaf0   : > { %3208 = vst [vmem:[#allocation2 + $0x38] sm:$0xff] %v2734_v6  }
 0xaf1   : > { %v3929_v7 = vld [vmem:[%s5063_s6 + $0x38] sm:$0xff]   ;;  %v4083_v9 = vmov 0.0   ;;  %v3930_v8 = vld [vmem:[%s5063_s6 + $0x30] sm:$0xff]   ;;  %vm4084_vm1 = vmmov 0   ;;  %v3931_v12 = vld [vmem:[%s5063_s6 + $0x28] sm:$0xff]  }
 0xaf2   : > { %3546 = vmatprep.subr.bf16.mxu0 %v4083_v9  ;;  %3562 = vmatprep.mubr.msk.bf16.mxu0 %vm4084_vm1, %v4083_v9  ;;  %v3932_v60 = vld [vmem:[%s5063_s6 + $0x20] sm:$0xff]   ;;  %v3933_v61 = vld [vmem:[%s5063_s6 + $0x18] sm:$0xff]   ;;  %v3934_v13 = vld [vmem:[%s5063_s6 + $0x10] sm:$0xff]  }
 0xaf3   : > { %3547 = vmatpush3.bf16.msra.mxu0 %v3929_v7  ;;  %v3935_v39 = vld [vmem:[%s5063_s6 + $0x8] sm:$0xff]   ;;  %v3936_v38 = vld [vmem:[%s5063_s6] sm:$0xff]  }
 0xaf4   : > { %3548 = vmatprep.subr.bf16.mxu0 %v4083_v9  ;;  %v3138_v14 = vld [vmem:[%s5064_s7] ss:$0 sm:$0xff] }
 0xaf7   : > { %3549 = vmatpush3.bf16.msra.mxu0 %v3930_v8 }
 0xaf8   : > { %3550 = vmatprep.subr.bf16.mxu0 %v4083_v9 }
 0xafb   : > { %3551 = vmatpush3.bf16.msra.mxu0 %v3931_v12 }
 0xafc   : > { %3552 = vmatprep.subr.bf16.mxu0 %v4083_v9 }
 0xaff   : > { %3553 = vmatpush3.bf16.msra.mxu0 %v3932_v60 }
 0xb00   : > { %3554 = vmatprep.subr.bf16.mxu0 %v4083_v9 }
 0xb03   : > { %3555 = vmatpush3.bf16.msra.mxu0 %v3933_v61 }
 0xb04   : > { %3556 = vmatprep.subr.bf16.mxu0 %v4083_v9 }
 0xb07   : > { %3557 = vmatpush3.bf16.msra.mxu0 %v3934_v13 }
 0xb08   : > { %3558 = vmatprep.subr.bf16.mxu0 %v4083_v9 }
 0xb0b   : > { %3559 = vmatpush3.bf16.msra.mxu0 %v3935_v39 }
 0xb0c   : > { %3560 = vmatprep.subr.bf16.mxu0 %v4083_v9 }
 0xb0f   : > { %3561 = vmatpush3.bf16.msra.mxu0 %v3936_v38 }
 0xb12   : > { %3563 = vmatmul.mubr.bf16.vlgmr.msra.gmra.mxu0 %v2734_v6 }
 0xbd2   : > { %v2854_v15 = vpop.f32.mrf.mxu0 }
 0xbd3   : > { %v2855_v16 = vadd.f32 %v3138_v14, %v2854_v15 }
 0xbd4   : > { %v3564_v17 = vpop.f32.mrf.mxu0 }
 0xbd5   : > { %v3147_v19 = vmul.f32 -1.442695, %v2855_v16 }
 0xbd6   : > { %v2857_v18 = vpop.f32.mrf.mxu0 }
 0xbd7   : > { %3937 = vpow2.f32 %v3147_v19  ;;  %v2858_v62 = vadd.f32 %v3138_v14, %v2857_v18 }
 0xbd8   : > { %v3565_v36 = vpop.f32.mrf.mxu0 }
 0xbd9   : > { %v3148_v37 = vmul.f32 -1.442695, %v2858_v62 }
 0xbdb   : > { %3939 = vpow2.f32 %v3148_v37 }
 0xbe4   : > { %v3938_v41 = vpop.eup %3937 }
 0xbe5   : > { %v2867_v40 = vadd.f32 1.0, %v3938_v41 }
 0xbe7   : > { %3941 = vrcp.f32 %v2867_v40 }
 0xbe8   : > { %v3940_v42 = vpop.eup %3939 }
 0xbe9   : > { %v2868_v43 = vadd.f32 1.0, %v3940_v42 }
 0xbeb   : > { %3943 = vrcp.f32 %v2868_v43 }
 0xbf4   : > { %v3942_v44 = vpop.eup %3941 }
 0xbf5   : > { %2873 = vst [vmem:[%s5065_s8] sm:$0xff] %v3942_v44 }
 0xbf8   : > { %v3944_v45 = vpop.eup %3943 }
 0xbf9   : > { %2874 = vst [vmem:[%s5065_s8 + $0x8] sm:$0xff] %v3944_v45 }
 0xbfa PF: > { %s5078_s18 = sld [smem:[#allocation11_spill]]  ;;  %p21_p9 = scmp.ge.s32.totalorder %s4152_s10, 4  }
 0xbfb   : > { %s5079_s27 = smov %s4059_s28  ;;  %s5080_s28 = smov %s4063_s29 }
 0xbfc   : > { %s5082_s30 = smov %s4152_s10  ;;  %23 = sbr.rel (!%p21_p9) target bundleno = 8 (0x8), region = 145 }
 0xc00   : > { %s5081_s29 = smov %s5078_s18 }
 0xc01   :  { %2886 = vsyncpa [#allocation5], 1 }
 0xc02   :  { %2888 = vsyncpa [#allocation5 + $0x1], 1 }
 0xc03   :  { %2889 = vsyncpa [#allocation7], 1 }
 0xc04   :  { %2891 = vsyncpa [#allocation7 + $0x1], 1 }

</bundles_post_ra>
